<compile_context>
chip_gen: v7x
topology: tpu7x:2x2x1
jax: 0.10.0
libtpu: 0.0.40
codegen_flags: <defaults>
</compile_context>

<pallas_src>
import functools
from types import SimpleNamespace

import jax
import jax.numpy as jnp
from jax import lax
from jax.experimental import pallas as pl
from jax.experimental.pallas import tpu as pltpu

TILE_N = 1024    # points per grid step (lane axis)
NCORES = 2       # leading "parallel" grid axis (2 TCs on v7x; harmless on 1-TC chips)
ACC_ROWS = 16    # accumulator rows: row 0 = global sums, rows 1..B = per-batch bucket sums
NQ = 16          # packed quantity columns (13 used, 3 zero-padded)

# feature-row offsets inside the packed float slab (feature-major [C, N])
_PTS, _TRN, _ROT, _RZ, _PK, _CAB, _CHA, _COFF, _LOG = 0, 3, 6, 15, 24, 36, 39, 42, 43
CF = 49          # 3 + 3 + 9 + 9 + 12 + 3 + 3 + 1 + 6


# --------------------------------------------------------------------------
# Pallas kernel: per-point compute + in-kernel reductions
# --------------------------------------------------------------------------
def _selfsuper_point_kernel(n_ref, feat_ref, int_ref, acc_ref, *, tile_n,
                            cabin_ignore_z, cabin_q, chasis_ignore_z, chasis_q):
  c = pl.program_id(0)
  i = pl.program_id(1)

  @pl.when(i == 0)
  def _init():
    acc_ref[...] = jnp.zeros_like(acc_ref)

  TN = tile_n
  f32 = jnp.float32
  eps = 1e-6

  def row(k):          # (1, TN) f32, points on lanes
    return feat_ref[k:k + 1, :]

  def irow(k):         # (1, TN) int32
    return int_ref[k:k + 1, :]

  # validity mask (handles padding of N to a multiple of NCORES*TILE_N)
  tile_idx = c * pl.num_programs(1) + i
  pos = lax.broadcasted_iota(jnp.int32, (1, TN), 1) + tile_idx * TN
  valid_b = pos < n_ref[0]
  valid_f = valid_b.astype(f32)

  bidx = irow(0)        # batch index per point
  lbl = irow(1)         # original segmentation label per point

  # ---- project points to machine frame: proj = (p - t) @ R[batch] --------
  dx = row(_PTS + 0) - row(_TRN + 0)
  dy = row(_PTS + 1) - row(_TRN + 1)
  dz = row(_PTS + 2) - row(_TRN + 2)
  px = dx * row(_ROT + 0) + dy * row(_ROT + 3) + dz * row(_ROT + 6)
  py = dx * row(_ROT + 1) + dy * row(_ROT + 4) + dz * row(_ROT + 7)
  pz = dx * row(_ROT + 2) + dy * row(_ROT + 5) + dz * row(_ROT + 8)

  # ---- softmax over the 6 segment classes --------------------------------
  logit = [row(_LOG + k) for k in range(6)]
  mx = logit[0]
  for k in range(1, 6):
    mx = jnp.maximum(mx, logit[k])
  ex = [jnp.exp(l - mx) for l in logit]
  sx = ex[0] + ex[1] + ex[2] + ex[3] + ex[4] + ex[5]
  inv_sx = pl.reciprocal(sx, approx=True)
  ms = [e * inv_sx for e in ex]
  log_sx = jnp.log(sx)

  # ---- point-to-line losses (boom: 'two ends', stick: 'uniform') ---------
  def p2line(sx2, sz2, ex2, ez2, memb, two_ends):
    lv0, lv1 = ex2 - sx2, ez2 - sz2
    pv0, pv1 = px - sx2, pz - sz2
    cn = jnp.abs(pv0 * lv1 - pv1 * lv0)
    llen = jnp.maximum(jnp.sqrt(lv0 * lv0 + lv1 * lv1), eps)
    inv_l = pl.reciprocal(llen, approx=True)
    dist = cn * inv_l
    posn = (pv0 * lv0 + pv1 * lv1) * inv_l * inv_l
    if two_ends:
      er = 0.2
      b = 1.0 / (er * er)
      w = jnp.where((posn >= 0.0) & (posn <= er), b * (er - posn) ** 2,
                    jnp.where((posn >= 1.0 - er) & (posn <= 1.0),
                              b * (posn - (1.0 - er)) ** 2, 0.0))
    else:
      w = ((posn >= 0.0) & (posn <= 1.0)).astype(f32)
    mask = w * memb * valid_f
    num = jnp.where(valid_b, dist, 0.0) * mask
    return num, mask

  q_boom_num, q_boom_den = p2line(row(_PK + 0), row(_PK + 2), row(_PK + 3),
                                  row(_PK + 5), ms[1], True)
  q_stick_num, q_stick_den = p2line(row(_PK + 3), row(_PK + 5), row(_PK + 6),
                                    row(_PK + 8), ms[2], False)

  # ---- bucket centroid contributions (scatter-by-batch done via matmul) --
  ms3 = ms[3]
  memb_bkt = ms3 * (ms3 > 0.3).astype(f32) * valid_f
  q_bkt_x = memb_bkt * px
  q_bkt_z = memb_bkt * pz
  q_bkt_m = memb_bkt

  # ---- point-to-cuboid losses + cuboid memberships (cabin / chassis) -----
  def cuboid(px_, py_, pz_, sxr, syr, szr, memb, ignore_z, qw):
    hx, hy, hz = sxr * 0.5, syr * 0.5, szr * 0.5
    ihx = pl.reciprocal(jnp.maximum(hx, eps), approx=True)
    ihy = pl.reciprocal(jnp.maximum(hy, eps), approx=True)
    ihz = pl.reciprocal(jnp.maximum(hz, eps), approx=True)
    ax, ay, az = jnp.abs(px_), jnp.abs(py_), jnp.abs(pz_)
    in_x, in_y, in_z = 1.0 - ax * ihx, 1.0 - ay * ihy, 1.0 - az * ihz
    inside = jnp.minimum(in_x, in_y) if ignore_z else jnp.minimum(
        jnp.minimum(in_x, in_y), in_z)
    inside_term = jnp.maximum(inside, 0.0)
    ox = jnp.maximum(ax - hx, 0.0)
    oy = jnp.maximum(ay - hy, 0.0)
    oz = jnp.maximum(az - hz, 0.0)
    outside_term = jnp.sqrt(ox * ox + oy * oy + oz * oz)
    distance = inside_term + qw * outside_term
    m = memb * valid_f
    num = jnp.where(valid_b, distance, 0.0) * m     # where-mask: no NaN leak
    new_ms = (outside_term < 0.1).astype(f32)       # compute_ms_cuboid, ext_thres=0.1
    return num, m, new_ms

  pcx = px - row(_COFF)
  pcy = py
  pcz = pz - row(_CAB + 2) * 0.5
  q_cab_num, q_cab_den, ms_cabin = cuboid(pcx, pcy, pcz, row(_CAB + 0),
                                          row(_CAB + 1), row(_CAB + 2),
                                          ms[4], cabin_ignore_z, cabin_q)

  phx = px * row(_RZ + 0) + py * row(_RZ + 3) + pz * row(_RZ + 6)
  phy = px * row(_RZ + 1) + py * row(_RZ + 4) + pz * row(_RZ + 7)
  phz = px * row(_RZ + 2) + py * row(_RZ + 5) + pz * row(_RZ + 8)
  phz = phz + row(_CHA + 2) * 0.5
  q_cha_num, q_cha_den, ms_chassis = cuboid(phx, phy, phz, row(_CHA + 0),
                                            row(_CHA + 1), row(_CHA + 2),
                                            ms[5], chasis_ignore_z, chasis_q)

  # ---- arm (cuboid-around-line) memberships: boom / stick / bucket -------
  def arm_membership(s0, s1, s2, e0, e1, e2, size_y, size_z, extra_len, ed):
    vx, vy, vz = e0 - s0, e1 - s1, e2 - s2
    len2 = jnp.maximum(vx * vx + vy * vy + vz * vz, eps * eps)
    inv_len = lax.rsqrt(len2)
    length = len2 * inv_len
    xx, xy, xz = vx * inv_len, vy * inv_len, vz * inv_len
    # y-axis = (0,1,0) orthogonalized against x-axis, normalized
    yx, yy, yz = -xy * xx, 1.0 - xy * xy, -xy * xz
    inv_yn = lax.rsqrt(jnp.maximum(yx * yx + yy * yy + yz * yz, eps * eps))
    yx, yy, yz = yx * inv_yn, yy * inv_yn, yz * inv_yn
    zx = xy * yz - xz * yy
    zy = xz * yx - xx * yz
    zz = xx * yy - xy * yx
    rx, ry, rz = px - s0, py - s1, pz - s2
    pxl = rx * xx + ry * xy + rz * xz
    pyl = rx * yx + ry * yy + rz * yz
    pzl = rx * zx + ry * zy + rz * zz
    size_x = length + extra_len
    in_x = (pxl >= 0.0) & (pxl <= size_x)
    in_y = (pyl >= -size_y * 0.5) & (pyl <= size_y * 0.5)
    in_z = (pzl >= -ed) & (pzl <= size_z)
    return (in_x & in_y & in_z).astype(f32)

  ms_boom = arm_membership(row(_PK + 0), row(_PK + 1), row(_PK + 2),
                           row(_PK + 3), row(_PK + 4), row(_PK + 5),
                           0.8, 1.2, 0.0, 0.3)
  ms_stick = arm_membership(row(_PK + 3), row(_PK + 4), row(_PK + 5),
                            row(_PK + 6), row(_PK + 7), row(_PK + 8),
                            0.5, 1.0, 0.0, 0.3)
  ms_bucket = arm_membership(row(_PK + 6), row(_PK + 7), row(_PK + 8),
                             row(_PK + 9), row(_PK + 10), row(_PK + 11),
                             1.5, 1.5, 0.3, 0.4)

  # argmax of [bg, boom, stick, bucket, cabin, chassis] over {0,1} values
  new_lbl = jnp.where(ms_boom > 0.0, 1,
             jnp.where(ms_stick > 0.0, 2,
              jnp.where(ms_bucket > 0.0, 3,
               jnp.where(ms_cabin > 0.0, 4,
                jnp.where(ms_chassis > 0.0, 5, 0))))).astype(jnp.int32)

  upd_lbl = jnp.where(((lbl == 3) | (lbl == 5)) & (new_lbl == 0),
                      jnp.zeros_like(lbl), lbl)

  # ---- cross entropy with updated labels (ignore_index = -100) -----------
  l_sel = jnp.zeros((1, TN), f32)
  for k in range(6):
    l_sel = jnp.where(upd_lbl == k, logit[k], l_sel)
  ce = (mx - l_sel) + log_sx          # -log_softmax(logits)[label]
  lbl_ok = (upd_lbl != -100) & valid_b
  q_ce = jnp.where(lbl_ok, ce, 0.0)
  q_cnt = lbl_ok.astype(f32)

  # ---- pack the 13 per-point quantities (sublane concat) and reduce with
  #      one MXU matmul contracting over the point/lane axis ---------------
  quantities = [q_boom_num, q_boom_den, q_stick_num, q_stick_den,
                q_cab_num, q_cab_den, q_cha_num, q_cha_den,
                q_ce, q_cnt, q_bkt_x, q_bkt_z, q_bkt_m]
  contrib = jnp.concatenate(
      quantities + [jnp.zeros((NQ - len(quantities), TN), f32)], axis=0)  # (NQ, TN)

  # selector: row 0 -> global sums, row 1+b -> per-batch sums
  rsel = lax.broadcasted_iota(jnp.int32, (ACC_ROWS, TN), 0)
  sel = jnp.where(((rsel == 0) | (rsel == 1 + bidx)) & valid_b,
                  1.0, 0.0).astype(f32)                                   # (ACC_ROWS, TN)

  partial = lax.dot_general(sel, contrib,
                            dimension_numbers=(((1,), (1,)), ((), ())),
                            preferred_element_type=jnp.float32)           # (ACC_ROWS, NQ)
  acc_ref[...] += partial[None]


# --------------------------------------------------------------------------
# Kernel wrapper
# --------------------------------------------------------------------------
def run_point_kernel(feat_pm, ints_pm, n_points, cfg,
                     tile_n=TILE_N, ncores=NCORES):
  """feat_pm: (N, CF) float32 point-major slab, ints_pm: (N, 2) int32."""
  n = feat_pm.shape[0]
  tiles_per_core = max(1, pl.cdiv(n, tile_n * ncores))
  n_pad = tiles_per_core * tile_n * ncores

  feat = jnp.pad(feat_pm, ((0, n_pad - n), (0, 0))).T      # (CF, n_pad), lane-dense
  ints = jnp.pad(ints_pm, ((0, n_pad - n), (0, 0))).T      # (2, n_pad)
  nvec = jnp.array([n_points], jnp.int32)                  # scalar prefetch

  kernel = functools.partial(
      _selfsuper_point_kernel, tile_n=tile_n,
      cabin_ignore_z=bool(cfg.cabin_ignore_z), cabin_q=float(cfg.cabin_q),
      chasis_ignore_z=bool(cfg.chasis_ignore_z), chasis_q=float(cfg.chasis_q))

  T = tiles_per_core
  grid_spec = pltpu.PrefetchScalarGridSpec(
      num_scalar_prefetch=1,
      grid=(ncores, T),
      in_specs=[
          pl.BlockSpec((CF, tile_n), lambda c, i, nref: (0, c * T + i)),
          pl.BlockSpec((2, tile_n), lambda c, i, nref: (0, c * T + i)),
      ],
      out_specs=pl.BlockSpec((1, ACC_ROWS, NQ), lambda c, i, nref: (c, 0, 0)),
  )

  acc = pl.pallas_call(
      kernel,
      out_shape=jax.ShapeDtypeStruct((ncores, ACC_ROWS, NQ), jnp.float32),
      grid_spec=grid_spec,
      compiler_params=pltpu.CompilerParams(
          dimension_semantics=("parallel", "arbitrary")),
  )(nvec, feat, ints)
  return jnp.sum(acc, axis=0)      # (ACC_ROWS, NQ)


# --------------------------------------------------------------------------
# Plain JAX glue (small per-batch math, B is tiny)
# --------------------------------------------------------------------------
def vector6d_to_rotation_matrix(v6):
  a1, a2 = v6[:, :3], v6[:, 3:6]
  b1 = a1 / (jnp.linalg.norm(a1, axis=1, keepdims=True) + 1e-8)
  a2p = a2 - jnp.sum(b1 * a2, axis=1, keepdims=True) * b1
  b2 = a2p / (jnp.linalg.norm(a2p, axis=1, keepdims=True) + 1e-8)
  b3 = jnp.cross(b1, b2)
  return jnp.stack([b1, b2, b3], axis=-1)  # basis vectors as columns


def get_rotmat_from_z(theta):
  length = jnp.maximum(jnp.linalg.norm(theta, axis=1), 1e-6)
  c = theta[:, 0] / length
  s = theta[:, 1] / length
  z = jnp.zeros_like(c)
  o = jnp.ones_like(c)
  return jnp.stack([jnp.stack([c, -s, z], axis=1),
                    jnp.stack([s, c, z], axis=1),
                    jnp.stack([z, z, o], axis=1)], axis=1)


def regress_loss(p, g, loss_type):
  if loss_type == 'l1':
    return jnp.mean(jnp.abs(p - g))
  if loss_type in ('mse', 'l2'):
    return jnp.mean((p - g) ** 2)
  if loss_type == 'smooth_l1':
    d = jnp.abs(p - g)
    return jnp.mean(jnp.where(d < 1.0, 0.5 * d * d, d - 0.5))
  raise ValueError(loss_type)


def planarity_loss(points):
  eps = 1e-6

  def planarity(p1, p2, p3, p4):
    n = jnp.cross(p2 - p1, p3 - p1)
    n = n / (jnp.linalg.norm(n, axis=1, keepdims=True) + eps)
    return jnp.sum(n * (p4 - p1), axis=1) ** 2

  l = (planarity(points[:, 0], points[:, 1], points[:, 2], points[:, 3]) +
       planarity(points[:, 1], points[:, 2], points[:, 3], points[:, 0]) +
       planarity(points[:, 2], points[:, 3], points[:, 0], points[:, 1]) +
       planarity(points[:, 3], points[:, 0], points[:, 1], points[:, 2])) / 4.0
  return jnp.mean(l)


def points2plane_loss(points, rot_mat):
  eps = 1e-6
  normal = rot_mat[:, :, 1]                       # rot_mat @ [0,1,0]^T
  normal = normal / (jnp.linalg.norm(normal, axis=1, keepdims=True) + eps)
  v1 = points[:, 1:] - points[:, :-1]
  v2 = points[:, 2:] - points[:, 0:1]
  v = jnp.concatenate([v1, v2], axis=1)
  sqd = jnp.sum(v * normal[:, None, :], axis=2) ** 2
  return jnp.mean(sqd)


def self_super_loss_forward(pred_dict, target_dict, points, batch, loss_info, cfg):
  loss = jnp.float32(0.0)
  record = {}

  def add(name, val):
    nonlocal loss
    record[name] = val
    loss = loss + val * loss_info[name]['weight']

  B = pred_dict['keypoints'].shape[0]
  assert B + 1 <= ACC_ROWS, "batch size too large for accumulator rows"

  kps = pred_dict['keypoints'].reshape(B, 4, 3)
  rot_mat = vector6d_to_rotation_matrix(target_dict['rotation'])
  translation = kps[:, 0]
  v_z = rot_mat[:, :, 2] * pred_dict['other_offset'][:, 0:1]
  v_y = rot_mat[:, :, 1] * pred_dict['other_offset'][:, 1:2]
  kps_ = kps.at[:, 0].set(kps[:, 0] + v_y + v_z)
  arm_length = jnp.linalg.norm(kps_[:, 1:] - kps_[:, :-1], axis=2)
  pred = dict(pred_dict)
  pred['arm_length'] = arm_length

  for key in ['arm_length', 'cabin_size', 'chasis_size', 'bucket_size',
              'other_offset', 'rotation']:
    add(key, regress_loss(pred[key], target_dict[key],
                          loss_info[key]['loss_type']))

  add('point2plane', points2plane_loss(kps_, rot_mat))
  add('planarity', planarity_loss(kps_))

  proj_kps_ = jnp.einsum('bni,bij->bnj', kps_ - translation[:, None, :], rot_mat)
  rotmat_z = get_rotmat_from_z(pred_dict['theta'])

  # per-point gathers + feature-major slab packing (glue)
  # TODO(synk): for v5e HBM-bound clouds, pass the (B, ~40) per-batch param
  # table untiled and reconstruct per-point rows in-kernel instead of
  # expanding to per-point rows here (cuts DMA bytes ~3.5x).
  batch = batch.astype(jnp.int32)
  n = points.shape[0]
  trans_pt = translation[batch]
  R_pt = rot_mat[batch].reshape(n, 9)
  Rz_pt = rotmat_z[batch].reshape(n, 9)
  pk_pt = proj_kps_[batch].reshape(n, 12)
  cab_pt = target_dict['cabin_size'][batch]
  cha_pt = target_dict['chasis_size'][batch]
  caboff_pt = pred_dict['other_offset'][:, 2][batch][:, None]
  logits = pred_dict['segment'].astype(jnp.float32)
  labels = target_dict['segment'].astype(jnp.int32)[:, None]

  feat_pm = jnp.concatenate(
      [points.astype(jnp.float32), trans_pt, R_pt, Rz_pt, pk_pt,
       cab_pt, cha_pt, caboff_pt, logits], axis=1).astype(jnp.float32)  # (N, 49)
  ints_pm = jnp.concatenate([batch[:, None], labels], axis=1).astype(jnp.int32)

  acc = run_point_kernel(feat_pm, ints_pm, n, cfg)

  def safe_div(num, den):
    return num / jnp.maximum(den, 1.0)

  row0 = acc[0]
  add('p2p_boom', safe_div(row0[0], row0[1]))
  add('p2p_stick', safe_div(row0[2], row0[3]))

  # bucket loss finalization (per-batch, tiny)
  lam1, lam2 = cfg.bucket_lambda
  mid = (1.0 - lam1) * proj_kps_[:, 2] + lam1 * proj_kps_[:, 3]
  dvec = proj_kps_[:, 3] - proj_kps_[:, 2]
  yv = jnp.broadcast_to(jnp.array([0.0, 1.0, 0.0], jnp.float32), dvec.shape)
  v_ = jnp.cross(dvec, yv)
  v_ = v_ / (jnp.linalg.norm(v_, axis=1, keepdims=True) + 1e-6)
  v_ = v_ * target_dict['bucket_size'][:, 0:1]
  anchor = mid + lam2 * v_
  anchor_xz = jnp.stack([anchor[:, 0], anchor[:, 2]], axis=1)
  msum = acc[1:1 + B, 12]
  cent = jnp.stack([acc[1:1 + B, 10], acc[1:1 + B, 11]], axis=1)
  cent = cent / jnp.maximum(msum, 1e-6)[:, None]
  vmask = (msum > 1.0).astype(jnp.float32)
  dists = jnp.linalg.norm(cent - anchor_xz, axis=1)
  nvalid = jnp.sum(vmask)
  bk = jnp.where(nvalid > 0,
                 jnp.sum(dists * vmask) / jnp.maximum(nvalid, 1.0), 0.0)
  add('p2p_bucket', bk)

  add('p2p_cabin', safe_div(row0[4], row0[5]))
  add('p2p_chassis', safe_div(row0[6], row0[7]))
  add('segment', safe_div(row0[8], row0[9]))   # mean CE over non-ignored points
  return loss, record


# --------------------------------------------------------------------------
if __name__ == "__main__":
  key = jax.random.PRNGKey(0)
  B, N = 2, 300
  ks = jax.random.split(key, 16)

  pred_dict = {
      'keypoints': jax.random.normal(ks[0], (B, 12)) * 2.0,
      'other_offset': jax.random.normal(ks[1], (B, 3)) * 0.1,
      'segment': jax.random.normal(ks[2], (N, 6)),
      'theta': jax.random.normal(ks[3], (B, 2)),
      'cabin_size': jax.random.uniform(ks[4], (B, 3), minval=0.5, maxval=2.0),
      'chasis_size': jax.random.uniform(ks[5], (B, 3), minval=0.5, maxval=2.0),
      'bucket_size': jax.random.uniform(ks[6], (B, 3), minval=0.5, maxval=2.0),
      'rotation': jax.random.normal(ks[7], (B, 6)),
  }
  target_dict = {
      'rotation': jax.random.normal(ks[8], (B, 6)),
      'arm_length': jax.random.uniform(ks[9], (B, 3), minval=1.0, maxval=4.0),
      'cabin_size': jax.random.uniform(ks[10], (B, 3), minval=0.5, maxval=2.0),
      'chasis_size': jax.random.uniform(ks[11], (B, 3), minval=0.5, maxval=2.0),
      'bucket_size': jax.random.uniform(ks[12], (B, 3), minval=0.5, maxval=2.0),
      'other_offset': jax.random.normal(ks[13], (B, 3)) * 0.1,
      'segment': jax.random.randint(ks[14], (N,), 0, 6),
  }
  points = jax.random.normal(ks[15], (N, 3)) * 3.0
  batch = jnp.concatenate([jnp.zeros(N // 2, jnp.int32),
                           jnp.ones(N - N // 2, jnp.int32)])

  loss_keys = ['arm_length', 'cabin_size', 'chasis_size', 'bucket_size',
               'other_offset', 'rotation', 'point2plane', 'planarity',
               'p2p_boom', 'p2p_stick', 'p2p_bucket', 'p2p_cabin',
               'p2p_chassis', 'segment']
  loss_info = {k: {'weight': 1.0} for k in loss_keys}
  for k, t in [('arm_length', 'l1'), ('cabin_size', 'l1'),
               ('chasis_size', 'l1'), ('bucket_size', 'l1'),
               ('other_offset', 'smooth_l1'), ('rotation', 'mse')]:
    loss_info[k]['loss_type'] = t

  cfg = SimpleNamespace(bucket_lambda=(0.4, 0.2),
                        cabin_ignore_z=True, cabin_q=2.0,
                        chasis_ignore_z=False, chasis_q=2.0)

  total_loss, loss_record = self_super_loss_forward(
      pred_dict, target_dict, points, batch, loss_info, cfg)
  total_loss = jax.block_until_ready(total_loss)
  print("KERNEL_OK")
</pallas_src>

<mosaic_0001>
module attributes {stable_mosaic.version = 11 : i64} {
  func.func @_selfsuper_point_kernel(%arg0: i32, %arg1: i32, %arg2: memref<1xi32, #tpu.memory_space<smem>>, %arg3: memref<49x1024xf32, #tpu.memory_space<vmem>>, %arg4: memref<2x1024xi32, #tpu.memory_space<vmem>>, %arg5: memref<1x16x16xf32, #tpu.memory_space<vmem>>) attributes {dimension_semantics = [#tpu.dimension_semantics<parallel>, #tpu.dimension_semantics<arbitrary>], iteration_bounds = array<i64: 2, 1>, scalar_prefetch = 1 : i64, scratch_operands = 0 : i64, tpu.core_type = #tpu.core_type<tc>, window_params = [{transform_indices = @transform_0, window_bounds = array<i64: 49, 1024>}, {transform_indices = @transform_1, window_bounds = array<i64: 2, 1024>}, {transform_indices = @transform_2, window_bounds = array<i64: 1, 16, 16>}]} {
    %c0_i32 = arith.constant 0 : i32
    %0 = arith.cmpi eq, %arg1, %c0_i32 : i32
    %1 = arith.extui %0 : i1 to i32
    %c0_i32_0 = arith.constant 0 : i32
    %2 = arith.cmpi ne, %1, %c0_i32_0 : i32
    scf.if %2 {
      %cst_198 = arith.constant 0.000000e+00 : f32
      %672 = vector.broadcast %cst_198 : f32 to vector<1x16x16xf32>
      %c0_199 = arith.constant 0 : index
      %c0_200 = arith.constant 0 : index
      %c0_201 = arith.constant 0 : index
      %673 = vector.load %arg5[%c0_199, %c0_200, %c0_201] : memref<1x16x16xf32, #tpu.memory_space<vmem>>, vector<1x16x16xf32>
      tpu.vector_store %arg5[%c0_199, %c0_200, %c0_201], %672 {strides = array<i32>} : memref<1x16x16xf32, #tpu.memory_space<vmem>>, vector<1x16x16xf32>,
    } else {
    }
    %c1_i32 = arith.constant 1 : i32
    %3 = arith.muli %arg0, %c1_i32 : i32
    %4 = arith.addi %3, %arg1 : i32
    %5 = tpu.iota {dimensions = array<i32: 1>} : vector<1x1024xi32>
    %c1024_i32 = arith.constant 1024 : i32
    %6 = arith.muli %4, %c1024_i32 : i32
    %7 = vector.broadcast %6 : i32 to vector<1x1024xi32>
    %8 = arith.addi %5, %7 : vector<1x1024xi32>
    %c0 = arith.constant 0 : index
    %9 = memref.load %arg2[%c0] : memref<1xi32, #tpu.memory_space<smem>>
    %10 = vector.broadcast %9 : i32 to vector<1x1024xi32>
    %11 = arith.cmpi slt, %8, %10 : vector<1x1024xi32>
    %12 = arith.extui %11 : vector<1x1024xi1> to vector<1x1024xi32>
    %13 = arith.sitofp %12 : vector<1x1024xi32> to vector<1x1024xf32>
    %c0_1 = arith.constant 0 : index
    %c0_2 = arith.constant 0 : index
    %14 = vector.load %arg4[%c0_1, %c0_2] : memref<2x1024xi32, #tpu.memory_space<vmem>>, vector<1x1024xi32>
    %c1 = arith.constant 1 : index
    %c0_3 = arith.constant 0 : index
    %15 = vector.load %arg4[%c1, %c0_3] : memref<2x1024xi32, #tpu.memory_space<vmem>>, vector<1x1024xi32>
    %c0_4 = arith.constant 0 : index
    %c0_5 = arith.constant 0 : index
    %16 = vector.load %arg3[%c0_4, %c0_5] : memref<49x1024xf32, #tpu.memory_space<vmem>>, vector<1x1024xf32>
    %c3 = arith.constant 3 : index
    %c0_6 = arith.constant 0 : index
    %17 = vector.load %arg3[%c3, %c0_6] : memref<49x1024xf32, #tpu.memory_space<vmem>>, vector<1x1024xf32>
    %18 = arith.subf %16, %17 : vector<1x1024xf32>
    %c1_7 = arith.constant 1 : index
    %c0_8 = arith.constant 0 : index
    %19 = vector.load %arg3[%c1_7, %c0_8] : memref<49x1024xf32, #tpu.memory_space<vmem>>, vector<1x1024xf32>
    %c4 = arith.constant 4 : index
    %c0_9 = arith.constant 0 : index
    %20 = vector.load %arg3[%c4, %c0_9] : memref<49x1024xf32, #tpu.memory_space<vmem>>, vector<1x1024xf32>
    %21 = arith.subf %19, %20 : vector<1x1024xf32>
    %c2 = arith.constant 2 : index
    %c0_10 = arith.constant 0 : index
    %22 = vector.load %arg3[%c2, %c0_10] : memref<49x1024xf32, #tpu.memory_space<vmem>>, vector<1x1024xf32>
    %c5 = arith.constant 5 : index
    %c0_11 = arith.constant 0 : index
    %23 = vector.load %arg3[%c5, %c0_11] : memref<49x1024xf32, #tpu.memory_space<vmem>>, vector<1x1024xf32>
    %24 = arith.subf %22, %23 : vector<1x1024xf32>
    %c6 = arith.constant 6 : index
    %c0_12 = arith.constant 0 : index
    %25 = vector.load %arg3[%c6, %c0_12] : memref<49x1024xf32, #tpu.memory_space<vmem>>, vector<1x1024xf32>
    %26 = arith.mulf %18, %25 : vector<1x1024xf32>
    %c9 = arith.constant 9 : index
    %c0_13 = arith.constant 0 : index
    %27 = vector.load %arg3[%c9, %c0_13] : memref<49x1024xf32, #tpu.memory_space<vmem>>, vector<1x1024xf32>
    %28 = arith.mulf %21, %27 : vector<1x1024xf32>
    %29 = arith.addf %26, %28 : vector<1x1024xf32>
    %c12 = arith.constant 12 : index
    %c0_14 = arith.constant 0 : index
    %30 = vector.load %arg3[%c12, %c0_14] : memref<49x1024xf32, #tpu.memory_space<vmem>>, vector<1x1024xf32>
    %31 = arith.mulf %24, %30 : vector<1x1024xf32>
    %32 = arith.addf %29, %31 : vector<1x1024xf32>
    %c7 = arith.constant 7 : index
    %c0_15 = arith.constant 0 : index
    %33 = vector.load %arg3[%c7, %c0_15] : memref<49x1024xf32, #tpu.memory_space<vmem>>, vector<1x1024xf32>
    %34 = arith.mulf %18, %33 : vector<1x1024xf32>
    %c10 = arith.constant 10 : index
    %c0_16 = arith.constant 0 : index
    %35 = vector.load %arg3[%c10, %c0_16] : memref<49x1024xf32, #tpu.memory_space<vmem>>, vector<1x1024xf32>
    %36 = arith.mulf %21, %35 : vector<1x1024xf32>
    %37 = arith.addf %34, %36 : vector<1x1024xf32>
    %c13 = arith.constant 13 : index
    %c0_17 = arith.constant 0 : index
    %38 = vector.load %arg3[%c13, %c0_17] : memref<49x1024xf32, #tpu.memory_space<vmem>>, vector<1x1024xf32>
    %39 = arith.mulf %24, %38 : vector<1x1024xf32>
    %40 = arith.addf %37, %39 : vector<1x1024xf32>
    %c8 = arith.constant 8 : index
    %c0_18 = arith.constant 0 : index
    %41 = vector.load %arg3[%c8, %c0_18] : memref<49x1024xf32, #tpu.memory_space<vmem>>, vector<1x1024xf32>
    %42 = arith.mulf %18, %41 : vector<1x1024xf32>
    %c11 = arith.constant 11 : index
    %c0_19 = arith.constant 0 : index
    %43 = vector.load %arg3[%c11, %c0_19] : memref<49x1024xf32, #tpu.memory_space<vmem>>, vector<1x1024xf32>
    %44 = arith.mulf %21, %43 : vector<1x1024xf32>
    %45 = arith.addf %42, %44 : vector<1x1024xf32>
    %c14 = arith.constant 14 : index
    %c0_20 = arith.constant 0 : index
    %46 = vector.load %arg3[%c14, %c0_20] : memref<49x1024xf32, #tpu.memory_space<vmem>>, vector<1x1024xf32>
    %47 = arith.mulf %24, %46 : vector<1x1024xf32>
    %48 = arith.addf %45, %47 : vector<1x1024xf32>
    %c43 = arith.constant 43 : index
    %c0_21 = arith.constant 0 : index
    %49 = vector.load %arg3[%c43, %c0_21] : memref<49x1024xf32, #tpu.memory_space<vmem>>, vector<1x1024xf32>
    %c44 = arith.constant 44 : index
    %c0_22 = arith.constant 0 : index
    %50 = vector.load %arg3[%c44, %c0_22] : memref<49x1024xf32, #tpu.memory_space<vmem>>, vector<1x1024xf32>
    %c45 = arith.constant 45 : index
    %c0_23 = arith.constant 0 : index
    %51 = vector.load %arg3[%c45, %c0_23] : memref<49x1024xf32, #tpu.memory_space<vmem>>, vector<1x1024xf32>
    %c46 = arith.constant 46 : index
    %c0_24 = arith.constant 0 : index
    %52 = vector.load %arg3[%c46, %c0_24] : memref<49x1024xf32, #tpu.memory_space<vmem>>, vector<1x1024xf32>
    %c47 = arith.constant 47 : index
    %c0_25 = arith.constant 0 : index
    %53 = vector.load %arg3[%c47, %c0_25] : memref<49x1024xf32, #tpu.memory_space<vmem>>, vector<1x1024xf32>
    %c48 = arith.constant 48 : index
    %c0_26 = arith.constant 0 : index
    %54 = vector.load %arg3[%c48, %c0_26] : memref<49x1024xf32, #tpu.memory_space<vmem>>, vector<1x1024xf32>
    %55 = arith.maximumf %49, %50 : vector<1x1024xf32>
    %56 = arith.maximumf %55, %51 : vector<1x1024xf32>
    %57 = arith.maximumf %56, %52 : vector<1x1024xf32>
    %58 = arith.maximumf %57, %53 : vector<1x1024xf32>
    %59 = arith.maximumf %58, %54 : vector<1x1024xf32>
    %60 = arith.subf %49, %59 : vector<1x1024xf32>
    %61 = math.exp %60 : vector<1x1024xf32>
    %62 = arith.subf %50, %59 : vector<1x1024xf32>
    %63 = math.exp %62 : vector<1x1024xf32>
    %64 = arith.subf %51, %59 : vector<1x1024xf32>
    %65 = math.exp %64 : vector<1x1024xf32>
    %66 = arith.subf %52, %59 : vector<1x1024xf32>
    %67 = math.exp %66 : vector<1x1024xf32>
    %68 = arith.subf %53, %59 : vector<1x1024xf32>
    %69 = math.exp %68 : vector<1x1024xf32>
    %70 = arith.subf %54, %59 : vector<1x1024xf32>
    %71 = math.exp %70 : vector<1x1024xf32>
    %72 = arith.addf %61, %63 : vector<1x1024xf32>
    %73 = arith.addf %72, %65 : vector<1x1024xf32>
    %74 = arith.addf %73, %67 : vector<1x1024xf32>
    %75 = arith.addf %74, %69 : vector<1x1024xf32>
    %76 = arith.addf %75, %71 : vector<1x1024xf32>
    %77 = tpu.reciprocal %76 {approx = true} : vector<1x1024xf32> -> vector<1x1024xf32>
    %78 = arith.mulf %63, %77 : vector<1x1024xf32>
    %79 = arith.mulf %65, %77 : vector<1x1024xf32>
    %80 = arith.mulf %67, %77 : vector<1x1024xf32>
    %81 = arith.mulf %69, %77 : vector<1x1024xf32>
    %82 = arith.mulf %71, %77 : vector<1x1024xf32>
    %83 = math.log %76 : vector<1x1024xf32>
    %c24 = arith.constant 24 : index
    %c0_27 = arith.constant 0 : index
    %84 = vector.load %arg3[%c24, %c0_27] : memref<49x1024xf32, #tpu.memory_space<vmem>>, vector<1x1024xf32>
    %c26 = arith.constant 26 : index
    %c0_28 = arith.constant 0 : index
    %85 = vector.load %arg3[%c26, %c0_28] : memref<49x1024xf32, #tpu.memory_space<vmem>>, vector<1x1024xf32>
    %c27 = arith.constant 27 : index
    %c0_29 = arith.constant 0 : index
    %86 = vector.load %arg3[%c27, %c0_29] : memref<49x1024xf32, #tpu.memory_space<vmem>>, vector<1x1024xf32>
    %c29 = arith.constant 29 : index
    %c0_30 = arith.constant 0 : index
    %87 = vector.load %arg3[%c29, %c0_30] : memref<49x1024xf32, #tpu.memory_space<vmem>>, vector<1x1024xf32>
    %88 = arith.subf %86, %84 : vector<1x1024xf32>
    %89 = arith.subf %87, %85 : vector<1x1024xf32>
    %90 = arith.subf %32, %84 : vector<1x1024xf32>
    %91 = arith.subf %48, %85 : vector<1x1024xf32>
    %92 = arith.mulf %90, %89 : vector<1x1024xf32>
    %93 = arith.mulf %91, %88 : vector<1x1024xf32>
    %94 = arith.subf %92, %93 : vector<1x1024xf32>
    %95 = math.absf %94 : vector<1x1024xf32>
    %96 = arith.mulf %88, %88 : vector<1x1024xf32>
    %97 = arith.mulf %89, %89 : vector<1x1024xf32>
    %98 = arith.addf %96, %97 : vector<1x1024xf32>
    %99 = math.sqrt %98 : vector<1x1024xf32>
    %cst = arith.constant 9.99999997E-7 : f32
    %100 = vector.broadcast %cst : f32 to vector<1x1024xf32>
    %101 = arith.maximumf %99, %100 : vector<1x1024xf32>
    %102 = tpu.reciprocal %101 {approx = true} : vector<1x1024xf32> -> vector<1x1024xf32>
    %103 = arith.mulf %95, %102 : vector<1x1024xf32>
    %104 = arith.mulf %90, %88 : vector<1x1024xf32>
    %105 = arith.mulf %91, %89 : vector<1x1024xf32>
    %106 = arith.addf %104, %105 : vector<1x1024xf32>
    %107 = arith.mulf %106, %102 : vector<1x1024xf32>
    %108 = arith.mulf %107, %102 : vector<1x1024xf32>
    %cst_31 = arith.constant 0.000000e+00 : f32
    %109 = vector.broadcast %cst_31 : f32 to vector<1x1024xf32>
    %110 = arith.cmpf oge, %108, %109 : vector<1x1024xf32>
    %cst_32 = arith.constant 2.000000e-01 : f32
    %111 = vector.broadcast %cst_32 : f32 to vector<1x1024xf32>
    %112 = arith.cmpf ole, %108, %111 : vector<1x1024xf32>
    %113 = arith.andi %110, %112 : vector<1x1024xi1>
    %cst_33 = arith.constant 2.000000e-01 : f32
    %114 = vector.broadcast %cst_33 : f32 to vector<1x1024xf32>
    %115 = arith.subf %114, %108 : vector<1x1024xf32>
    %116 = arith.mulf %115, %115 : vector<1x1024xf32>
    %cst_34 = arith.constant 2.500000e+01 : f32
    %117 = vector.broadcast %cst_34 : f32 to vector<1x1024xf32>
    %118 = arith.mulf %117, %116 : vector<1x1024xf32>
    %cst_35 = arith.constant 8.000000e-01 : f32
    %119 = vector.broadcast %cst_35 : f32 to vector<1x1024xf32>
    %120 = arith.cmpf oge, %108, %119 : vector<1x1024xf32>
    %cst_36 = arith.constant 1.000000e+00 : f32
    %121 = vector.broadcast %cst_36 : f32 to vector<1x1024xf32>
    %122 = arith.cmpf ole, %108, %121 : vector<1x1024xf32>
    %123 = arith.andi %120, %122 : vector<1x1024xi1>
    %cst_37 = arith.constant 8.000000e-01 : f32
    %124 = vector.broadcast %cst_37 : f32 to vector<1x1024xf32>
    %125 = arith.subf %108, %124 : vector<1x1024xf32>
    %126 = arith.mulf %125, %125 : vector<1x1024xf32>
    %cst_38 = arith.constant 2.500000e+01 : f32
    %127 = vector.broadcast %cst_38 : f32 to vector<1x1024xf32>
    %128 = arith.mulf %127, %126 : vector<1x1024xf32>
    %cst_39 = arith.constant 0.000000e+00 : f32
    %129 = vector.broadcast %cst_39 : f32 to vector<1x1024xf32>
    %130 = arith.select %123, %128, %129 : vector<1x1024xi1>, vector<1x1024xf32>
    %131 = arith.select %113, %118, %130 : vector<1x1024xi1>, vector<1x1024xf32>
    %132 = arith.mulf %131, %78 : vector<1x1024xf32>
    %133 = arith.mulf %132, %13 : vector<1x1024xf32>
    %cst_40 = arith.constant 0.000000e+00 : f32
    %134 = vector.broadcast %cst_40 : f32 to vector<1x1024xf32>
    %135 = arith.select %11, %103, %134 : vector<1x1024xi1>, vector<1x1024xf32>
    %136 = arith.mulf %135, %133 : vector<1x1024xf32>
    %c27_41 = arith.constant 27 : index
    %c0_42 = arith.constant 0 : index
    %137 = vector.load %arg3[%c27_41, %c0_42] : memref<49x1024xf32, #tpu.memory_space<vmem>>, vector<1x1024xf32>
    %c29_43 = arith.constant 29 : index
    %c0_44 = arith.constant 0 : index
    %138 = vector.load %arg3[%c29_43, %c0_44] : memref<49x1024xf32, #tpu.memory_space<vmem>>, vector<1x1024xf32>
    %c30 = arith.constant 30 : index
    %c0_45 = arith.constant 0 : index
    %139 = vector.load %arg3[%c30, %c0_45] : memref<49x1024xf32, #tpu.memory_space<vmem>>, vector<1x1024xf32>
    %c32 = arith.constant 32 : index
    %c0_46 = arith.constant 0 : index
    %140 = vector.load %arg3[%c32, %c0_46] : memref<49x1024xf32, #tpu.memory_space<vmem>>, vector<1x1024xf32>
    %141 = arith.subf %139, %137 : vector<1x1024xf32>
    %142 = arith.subf %140, %138 : vector<1x1024xf32>
    %143 = arith.subf %32, %137 : vector<1x1024xf32>
    %144 = arith.subf %48, %138 : vector<1x1024xf32>
    %145 = arith.mulf %143, %142 : vector<1x1024xf32>
    %146 = arith.mulf %144, %141 : vector<1x1024xf32>
    %147 = arith.subf %145, %146 : vector<1x1024xf32>
    %148 = math.absf %147 : vector<1x1024xf32>
    %149 = arith.mulf %141, %141 : vector<1x1024xf32>
    %150 = arith.mulf %142, %142 : vector<1x1024xf32>
    %151 = arith.addf %149, %150 : vector<1x1024xf32>
    %152 = math.sqrt %151 : vector<1x1024xf32>
    %cst_47 = arith.constant 9.99999997E-7 : f32
    %153 = vector.broadcast %cst_47 : f32 to vector<1x1024xf32>
    %154 = arith.maximumf %152, %153 : vector<1x1024xf32>
    %155 = tpu.reciprocal %154 {approx = true} : vector<1x1024xf32> -> vector<1x1024xf32>
    %156 = arith.mulf %148, %155 : vector<1x1024xf32>
    %157 = arith.mulf %143, %141 : vector<1x1024xf32>
    %158 = arith.mulf %144, %142 : vector<1x1024xf32>
    %159 = arith.addf %157, %158 : vector<1x1024xf32>
    %160 = arith.mulf %159, %155 : vector<1x1024xf32>
    %161 = arith.mulf %160, %155 : vector<1x1024xf32>
    %cst_48 = arith.constant 0.000000e+00 : f32
    %162 = vector.broadcast %cst_48 : f32 to vector<1x1024xf32>
    %163 = arith.cmpf oge, %161, %162 : vector<1x1024xf32>
    %cst_49 = arith.constant 1.000000e+00 : f32
    %164 = vector.broadcast %cst_49 : f32 to vector<1x1024xf32>
    %165 = arith.cmpf ole, %161, %164 : vector<1x1024xf32>
    %166 = arith.andi %163, %165 : vector<1x1024xi1>
    %167 = arith.extui %166 : vector<1x1024xi1> to vector<1x1024xi32>
    %168 = arith.sitofp %167 : vector<1x1024xi32> to vector<1x1024xf32>
    %169 = arith.mulf %168, %79 : vector<1x1024xf32>
    %170 = arith.mulf %169, %13 : vector<1x1024xf32>
    %cst_50 = arith.constant 0.000000e+00 : f32
    %171 = vector.broadcast %cst_50 : f32 to vector<1x1024xf32>
    %172 = arith.select %11, %156, %171 : vector<1x1024xi1>, vector<1x1024xf32>
    %173 = arith.mulf %172, %170 : vector<1x1024xf32>
    %cst_51 = arith.constant 3.000000e-01 : f32
    %174 = vector.broadcast %cst_51 : f32 to vector<1x1024xf32>
    %175 = arith.cmpf ogt, %80, %174 : vector<1x1024xf32>
    %176 = arith.extui %175 : vector<1x1024xi1> to vector<1x1024xi32>
    %177 = arith.sitofp %176 : vector<1x1024xi32> to vector<1x1024xf32>
    %178 = arith.mulf %80, %177 : vector<1x1024xf32>
    %179 = arith.mulf %178, %13 : vector<1x1024xf32>
    %180 = arith.mulf %179, %32 : vector<1x1024xf32>
    %181 = arith.mulf %179, %48 : vector<1x1024xf32>
    %c42 = arith.constant 42 : index
    %c0_52 = arith.constant 0 : index
    %182 = vector.load %arg3[%c42, %c0_52] : memref<49x1024xf32, #tpu.memory_space<vmem>>, vector<1x1024xf32>
    %183 = arith.subf %32, %182 : vector<1x1024xf32>
    %c38 = arith.constant 38 : index
    %c0_53 = arith.constant 0 : index
    %184 = vector.load %arg3[%c38, %c0_53] : memref<49x1024xf32, #tpu.memory_space<vmem>>, vector<1x1024xf32>
    %cst_54 = arith.constant 5.000000e-01 : f32
    %185 = vector.broadcast %cst_54 : f32 to vector<1x1024xf32>
    %186 = arith.mulf %184, %185 : vector<1x1024xf32>
    %187 = arith.subf %48, %186 : vector<1x1024xf32>
    %c36 = arith.constant 36 : index
    %c0_55 = arith.constant 0 : index
    %188 = vector.load %arg3[%c36, %c0_55] : memref<49x1024xf32, #tpu.memory_space<vmem>>, vector<1x1024xf32>
    %c37 = arith.constant 37 : index
    %c0_56 = arith.constant 0 : index
    %189 = vector.load %arg3[%c37, %c0_56] : memref<49x1024xf32, #tpu.memory_space<vmem>>, vector<1x1024xf32>
    %c38_57 = arith.constant 38 : index
    %c0_58 = arith.constant 0 : index
    %190 = vector.load %arg3[%c38_57, %c0_58] : memref<49x1024xf32, #tpu.memory_space<vmem>>, vector<1x1024xf32>
    %cst_59 = arith.constant 5.000000e-01 : f32
    %191 = vector.broadcast %cst_59 : f32 to vector<1x1024xf32>
    %192 = arith.mulf %188, %191 : vector<1x1024xf32>
    %cst_60 = arith.constant 5.000000e-01 : f32
    %193 = vector.broadcast %cst_60 : f32 to vector<1x1024xf32>
    %194 = arith.mulf %189, %193 : vector<1x1024xf32>
    %cst_61 = arith.constant 5.000000e-01 : f32
    %195 = vector.broadcast %cst_61 : f32 to vector<1x1024xf32>
    %196 = arith.mulf %190, %195 : vector<1x1024xf32>
    %cst_62 = arith.constant 9.99999997E-7 : f32
    %197 = vector.broadcast %cst_62 : f32 to vector<1x1024xf32>
    %198 = arith.maximumf %192, %197 : vector<1x1024xf32>
    %199 = tpu.reciprocal %198 {approx = true} : vector<1x1024xf32> -> vector<1x1024xf32>
    %cst_63 = arith.constant 9.99999997E-7 : f32
    %200 = vector.broadcast %cst_63 : f32 to vector<1x1024xf32>
    %201 = arith.maximumf %194, %200 : vector<1x1024xf32>
    %202 = tpu.reciprocal %201 {approx = true} : vector<1x1024xf32> -> vector<1x1024xf32>
    %203 = math.absf %183 : vector<1x1024xf32>
    %204 = math.absf %40 : vector<1x1024xf32>
    %205 = math.absf %187 : vector<1x1024xf32>
    %206 = arith.mulf %203, %199 : vector<1x1024xf32>
    %cst_64 = arith.constant 1.000000e+00 : f32
    %207 = vector.broadcast %cst_64 : f32 to vector<1x1024xf32>
    %208 = arith.subf %207, %206 : vector<1x1024xf32>
    %209 = arith.mulf %204, %202 : vector<1x1024xf32>
    %cst_65 = arith.constant 1.000000e+00 : f32
    %210 = vector.broadcast %cst_65 : f32 to vector<1x1024xf32>
    %211 = arith.subf %210, %209 : vector<1x1024xf32>
    %212 = arith.minimumf %208, %211 : vector<1x1024xf32>
    %cst_66 = arith.constant 0.000000e+00 : f32
    %213 = vector.broadcast %cst_66 : f32 to vector<1x1024xf32>
    %214 = arith.maximumf %212, %213 : vector<1x1024xf32>
    %215 = arith.subf %203, %192 : vector<1x1024xf32>
    %cst_67 = arith.constant 0.000000e+00 : f32
    %216 = vector.broadcast %cst_67 : f32 to vector<1x1024xf32>
    %217 = arith.maximumf %215, %216 : vector<1x1024xf32>
    %218 = arith.subf %204, %194 : vector<1x1024xf32>
    %cst_68 = arith.constant 0.000000e+00 : f32
    %219 = vector.broadcast %cst_68 : f32 to vector<1x1024xf32>
    %220 = arith.maximumf %218, %219 : vector<1x1024xf32>
    %221 = arith.subf %205, %196 : vector<1x1024xf32>
    %cst_69 = arith.constant 0.000000e+00 : f32
    %222 = vector.broadcast %cst_69 : f32 to vector<1x1024xf32>
    %223 = arith.maximumf %221, %222 : vector<1x1024xf32>
    %224 = arith.mulf %217, %217 : vector<1x1024xf32>
    %225 = arith.mulf %220, %220 : vector<1x1024xf32>
    %226 = arith.addf %224, %225 : vector<1x1024xf32>
    %227 = arith.mulf %223, %223 : vector<1x1024xf32>
    %228 = arith.addf %226, %227 : vector<1x1024xf32>
    %229 = math.sqrt %228 : vector<1x1024xf32>
    %cst_70 = arith.constant 2.000000e+00 : f32
    %230 = vector.broadcast %cst_70 : f32 to vector<1x1024xf32>
    %231 = arith.mulf %230, %229 : vector<1x1024xf32>
    %232 = arith.addf %214, %231 : vector<1x1024xf32>
    %233 = arith.mulf %81, %13 : vector<1x1024xf32>
    %cst_71 = arith.constant 0.000000e+00 : f32
    %234 = vector.broadcast %cst_71 : f32 to vector<1x1024xf32>
    %235 = arith.select %11, %232, %234 : vector<1x1024xi1>, vector<1x1024xf32>
    %236 = arith.mulf %235, %233 : vector<1x1024xf32>
    %cst_72 = arith.constant 1.000000e-01 : f32
    %237 = vector.broadcast %cst_72 : f32 to vector<1x1024xf32>
    %238 = arith.cmpf olt, %229, %237 : vector<1x1024xf32>
    %239 = arith.extui %238 : vector<1x1024xi1> to vector<1x1024xi32>
    %240 = arith.sitofp %239 : vector<1x1024xi32> to vector<1x1024xf32>
    %c15 = arith.constant 15 : index
    %c0_73 = arith.constant 0 : index
    %241 = vector.load %arg3[%c15, %c0_73] : memref<49x1024xf32, #tpu.memory_space<vmem>>, vector<1x1024xf32>
    %242 = arith.mulf %32, %241 : vector<1x1024xf32>
    %c18 = arith.constant 18 : index
    %c0_74 = arith.constant 0 : index
    %243 = vector.load %arg3[%c18, %c0_74] : memref<49x1024xf32, #tpu.memory_space<vmem>>, vector<1x1024xf32>
    %244 = arith.mulf %40, %243 : vector<1x1024xf32>
    %245 = arith.addf %242, %244 : vector<1x1024xf32>
    %c21 = arith.constant 21 : index
    %c0_75 = arith.constant 0 : index
    %246 = vector.load %arg3[%c21, %c0_75] : memref<49x1024xf32, #tpu.memory_space<vmem>>, vector<1x1024xf32>
    %247 = arith.mulf %48, %246 : vector<1x1024xf32>
    %248 = arith.addf %245, %247 : vector<1x1024xf32>
    %c16 = arith.constant 16 : index
    %c0_76 = arith.constant 0 : index
    %249 = vector.load %arg3[%c16, %c0_76] : memref<49x1024xf32, #tpu.memory_space<vmem>>, vector<1x1024xf32>
    %250 = arith.mulf %32, %249 : vector<1x1024xf32>
    %c19 = arith.constant 19 : index
    %c0_77 = arith.constant 0 : index
    %251 = vector.load %arg3[%c19, %c0_77] : memref<49x1024xf32, #tpu.memory_space<vmem>>, vector<1x1024xf32>
    %252 = arith.mulf %40, %251 : vector<1x1024xf32>
    %253 = arith.addf %250, %252 : vector<1x1024xf32>
    %c22 = arith.constant 22 : index
    %c0_78 = arith.constant 0 : index
    %254 = vector.load %arg3[%c22, %c0_78] : memref<49x1024xf32, #tpu.memory_space<vmem>>, vector<1x1024xf32>
    %255 = arith.mulf %48, %254 : vector<1x1024xf32>
    %256 = arith.addf %253, %255 : vector<1x1024xf32>
    %c17 = arith.constant 17 : index
    %c0_79 = arith.constant 0 : index
    %257 = vector.load %arg3[%c17, %c0_79] : memref<49x1024xf32, #tpu.memory_space<vmem>>, vector<1x1024xf32>
    %258 = arith.mulf %32, %257 : vector<1x1024xf32>
    %c20 = arith.constant 20 : index
    %c0_80 = arith.constant 0 : index
    %259 = vector.load %arg3[%c20, %c0_80] : memref<49x1024xf32, #tpu.memory_space<vmem>>, vector<1x1024xf32>
    %260 = arith.mulf %40, %259 : vector<1x1024xf32>
    %261 = arith.addf %258, %260 : vector<1x1024xf32>
    %c23 = arith.constant 23 : index
    %c0_81 = arith.constant 0 : index
    %262 = vector.load %arg3[%c23, %c0_81] : memref<49x1024xf32, #tpu.memory_space<vmem>>, vector<1x1024xf32>
    %263 = arith.mulf %48, %262 : vector<1x1024xf32>
    %264 = arith.addf %261, %263 : vector<1x1024xf32>
    %c41 = arith.constant 41 : index
    %c0_82 = arith.constant 0 : index
    %265 = vector.load %arg3[%c41, %c0_82] : memref<49x1024xf32, #tpu.memory_space<vmem>>, vector<1x1024xf32>
    %cst_83 = arith.constant 5.000000e-01 : f32
    %266 = vector.broadcast %cst_83 : f32 to vector<1x1024xf32>
    %267 = arith.mulf %265, %266 : vector<1x1024xf32>
    %268 = arith.addf %264, %267 : vector<1x1024xf32>
    %c39 = arith.constant 39 : index
    %c0_84 = arith.constant 0 : index
    %269 = vector.load %arg3[%c39, %c0_84] : memref<49x1024xf32, #tpu.memory_space<vmem>>, vector<1x1024xf32>
    %c40 = arith.constant 40 : index
    %c0_85 = arith.constant 0 : index
    %270 = vector.load %arg3[%c40, %c0_85] : memref<49x1024xf32, #tpu.memory_space<vmem>>, vector<1x1024xf32>
    %c41_86 = arith.constant 41 : index
    %c0_87 = arith.constant 0 : index
    %271 = vector.load %arg3[%c41_86, %c0_87] : memref<49x1024xf32, #tpu.memory_space<vmem>>, vector<1x1024xf32>
    %cst_88 = arith.constant 5.000000e-01 : f32
    %272 = vector.broadcast %cst_88 : f32 to vector<1x1024xf32>
    %273 = arith.mulf %269, %272 : vector<1x1024xf32>
    %cst_89 = arith.constant 5.000000e-01 : f32
    %274 = vector.broadcast %cst_89 : f32 to vector<1x1024xf32>
    %275 = arith.mulf %270, %274 : vector<1x1024xf32>
    %cst_90 = arith.constant 5.000000e-01 : f32
    %276 = vector.broadcast %cst_90 : f32 to vector<1x1024xf32>
    %277 = arith.mulf %271, %276 : vector<1x1024xf32>
    %cst_91 = arith.constant 9.99999997E-7 : f32
    %278 = vector.broadcast %cst_91 : f32 to vector<1x1024xf32>
    %279 = arith.maximumf %273, %278 : vector<1x1024xf32>
    %280 = tpu.reciprocal %279 {approx = true} : vector<1x1024xf32> -> vector<1x1024xf32>
    %cst_92 = arith.constant 9.99999997E-7 : f32
    %281 = vector.broadcast %cst_92 : f32 to vector<1x1024xf32>
    %282 = arith.maximumf %275, %281 : vector<1x1024xf32>
    %283 = tpu.reciprocal %282 {approx = true} : vector<1x1024xf32> -> vector<1x1024xf32>
    %cst_93 = arith.constant 9.99999997E-7 : f32
    %284 = vector.broadcast %cst_93 : f32 to vector<1x1024xf32>
    %285 = arith.maximumf %277, %284 : vector<1x1024xf32>
    %286 = tpu.reciprocal %285 {approx = true} : vector<1x1024xf32> -> vector<1x1024xf32>
    %287 = math.absf %248 : vector<1x1024xf32>
    %288 = math.absf %256 : vector<1x1024xf32>
    %289 = math.absf %268 : vector<1x1024xf32>
    %290 = arith.mulf %287, %280 : vector<1x1024xf32>
    %cst_94 = arith.constant 1.000000e+00 : f32
    %291 = vector.broadcast %cst_94 : f32 to vector<1x1024xf32>
    %292 = arith.subf %291, %290 : vector<1x1024xf32>
    %293 = arith.mulf %288, %283 : vector<1x1024xf32>
    %cst_95 = arith.constant 1.000000e+00 : f32
    %294 = vector.broadcast %cst_95 : f32 to vector<1x1024xf32>
    %295 = arith.subf %294, %293 : vector<1x1024xf32>
    %296 = arith.mulf %289, %286 : vector<1x1024xf32>
    %cst_96 = arith.constant 1.000000e+00 : f32
    %297 = vector.broadcast %cst_96 : f32 to vector<1x1024xf32>
    %298 = arith.subf %297, %296 : vector<1x1024xf32>
    %299 = arith.minimumf %292, %295 : vector<1x1024xf32>
    %300 = arith.minimumf %299, %298 : vector<1x1024xf32>
    %cst_97 = arith.constant 0.000000e+00 : f32
    %301 = vector.broadcast %cst_97 : f32 to vector<1x1024xf32>
    %302 = arith.maximumf %300, %301 : vector<1x1024xf32>
    %303 = arith.subf %287, %273 : vector<1x1024xf32>
    %cst_98 = arith.constant 0.000000e+00 : f32
    %304 = vector.broadcast %cst_98 : f32 to vector<1x1024xf32>
    %305 = arith.maximumf %303, %304 : vector<1x1024xf32>
    %306 = arith.subf %288, %275 : vector<1x1024xf32>
    %cst_99 = arith.constant 0.000000e+00 : f32
    %307 = vector.broadcast %cst_99 : f32 to vector<1x1024xf32>
    %308 = arith.maximumf %306, %307 : vector<1x1024xf32>
    %309 = arith.subf %289, %277 : vector<1x1024xf32>
    %cst_100 = arith.constant 0.000000e+00 : f32
    %310 = vector.broadcast %cst_100 : f32 to vector<1x1024xf32>
    %311 = arith.maximumf %309, %310 : vector<1x1024xf32>
    %312 = arith.mulf %305, %305 : vector<1x1024xf32>
    %313 = arith.mulf %308, %308 : vector<1x1024xf32>
    %314 = arith.addf %312, %313 : vector<1x1024xf32>
    %315 = arith.mulf %311, %311 : vector<1x1024xf32>
    %316 = arith.addf %314, %315 : vector<1x1024xf32>
    %317 = math.sqrt %316 : vector<1x1024xf32>
    %cst_101 = arith.constant 2.000000e+00 : f32
    %318 = vector.broadcast %cst_101 : f32 to vector<1x1024xf32>
    %319 = arith.mulf %318, %317 : vector<1x1024xf32>
    %320 = arith.addf %302, %319 : vector<1x1024xf32>
    %321 = arith.mulf %82, %13 : vector<1x1024xf32>
    %cst_102 = arith.constant 0.000000e+00 : f32
    %322 = vector.broadcast %cst_102 : f32 to vector<1x1024xf32>
    %323 = arith.select %11, %320, %322 : vector<1x1024xi1>, vector<1x1024xf32>
    %324 = arith.mulf %323, %321 : vector<1x1024xf32>
    %cst_103 = arith.constant 1.000000e-01 : f32
    %325 = vector.broadcast %cst_103 : f32 to vector<1x1024xf32>
    %326 = arith.cmpf olt, %317, %325 : vector<1x1024xf32>
    %327 = arith.extui %326 : vector<1x1024xi1> to vector<1x1024xi32>
    %328 = arith.sitofp %327 : vector<1x1024xi32> to vector<1x1024xf32>
    %c24_104 = arith.constant 24 : index
    %c0_105 = arith.constant 0 : index
    %329 = vector.load %arg3[%c24_104, %c0_105] : memref<49x1024xf32, #tpu.memory_space<vmem>>, vector<1x1024xf32>
    %c25 = arith.constant 25 : index
    %c0_106 = arith.constant 0 : index
    %330 = vector.load %arg3[%c25, %c0_106] : memref<49x1024xf32, #tpu.memory_space<vmem>>, vector<1x1024xf32>
    %c26_107 = arith.constant 26 : index
    %c0_108 = arith.constant 0 : index
    %331 = vector.load %arg3[%c26_107, %c0_108] : memref<49x1024xf32, #tpu.memory_space<vmem>>, vector<1x1024xf32>
    %c27_109 = arith.constant 27 : index
    %c0_110 = arith.constant 0 : index
    %332 = vector.load %arg3[%c27_109, %c0_110] : memref<49x1024xf32, #tpu.memory_space<vmem>>, vector<1x1024xf32>
    %c28 = arith.constant 28 : index
    %c0_111 = arith.constant 0 : index
    %333 = vector.load %arg3[%c28, %c0_111] : memref<49x1024xf32, #tpu.memory_space<vmem>>, vector<1x1024xf32>
    %c29_112 = arith.constant 29 : index
    %c0_113 = arith.constant 0 : index
    %334 = vector.load %arg3[%c29_112, %c0_113] : memref<49x1024xf32, #tpu.memory_space<vmem>>, vector<1x1024xf32>
    %335 = arith.subf %332, %329 : vector<1x1024xf32>
    %336 = arith.subf %333, %330 : vector<1x1024xf32>
    %337 = arith.subf %334, %331 : vector<1x1024xf32>
    %338 = arith.mulf %335, %335 : vector<1x1024xf32>
    %339 = arith.mulf %336, %336 : vector<1x1024xf32>
    %340 = arith.addf %338, %339 : vector<1x1024xf32>
    %341 = arith.mulf %337, %337 : vector<1x1024xf32>
    %342 = arith.addf %340, %341 : vector<1x1024xf32>
    %cst_114 = arith.constant 9.99999996E-13 : f32
    %343 = vector.broadcast %cst_114 : f32 to vector<1x1024xf32>
    %344 = arith.maximumf %342, %343 : vector<1x1024xf32>
    %345 = math.rsqrt %344 : vector<1x1024xf32>
    %346 = arith.mulf %344, %345 : vector<1x1024xf32>
    %347 = arith.mulf %335, %345 : vector<1x1024xf32>
    %348 = arith.mulf %336, %345 : vector<1x1024xf32>
    %349 = arith.mulf %337, %345 : vector<1x1024xf32>
    %cst_115 = arith.constant 0.000000e+00 : f32
    %350 = vector.broadcast %cst_115 : f32 to vector<1x1024xf32>
    %351 = arith.subf %350, %348 : vector<1x1024xf32>
    %352 = arith.mulf %351, %347 : vector<1x1024xf32>
    %353 = arith.mulf %348, %348 : vector<1x1024xf32>
    %cst_116 = arith.constant 1.000000e+00 : f32
    %354 = vector.broadcast %cst_116 : f32 to vector<1x1024xf32>
    %355 = arith.subf %354, %353 : vector<1x1024xf32>
    %cst_117 = arith.constant 0.000000e+00 : f32
    %356 = vector.broadcast %cst_117 : f32 to vector<1x1024xf32>
    %357 = arith.subf %356, %348 : vector<1x1024xf32>
    %358 = arith.mulf %357, %349 : vector<1x1024xf32>
    %359 = arith.mulf %352, %352 : vector<1x1024xf32>
    %360 = arith.mulf %355, %355 : vector<1x1024xf32>
    %361 = arith.addf %359, %360 : vector<1x1024xf32>
    %362 = arith.mulf %358, %358 : vector<1x1024xf32>
    %363 = arith.addf %361, %362 : vector<1x1024xf32>
    %cst_118 = arith.constant 9.99999996E-13 : f32
    %364 = vector.broadcast %cst_118 : f32 to vector<1x1024xf32>
    %365 = arith.maximumf %363, %364 : vector<1x1024xf32>
    %366 = math.rsqrt %365 : vector<1x1024xf32>
    %367 = arith.mulf %352, %366 : vector<1x1024xf32>
    %368 = arith.mulf %355, %366 : vector<1x1024xf32>
    %369 = arith.mulf %358, %366 : vector<1x1024xf32>
    %370 = arith.mulf %348, %369 : vector<1x1024xf32>
    %371 = arith.mulf %349, %368 : vector<1x1024xf32>
    %372 = arith.subf %370, %371 : vector<1x1024xf32>
    %373 = arith.mulf %349, %367 : vector<1x1024xf32>
    %374 = arith.mulf %347, %369 : vector<1x1024xf32>
    %375 = arith.subf %373, %374 : vector<1x1024xf32>
    %376 = arith.mulf %347, %368 : vector<1x1024xf32>
    %377 = arith.mulf %348, %367 : vector<1x1024xf32>
    %378 = arith.subf %376, %377 : vector<1x1024xf32>
    %379 = arith.subf %32, %329 : vector<1x1024xf32>
    %380 = arith.subf %40, %330 : vector<1x1024xf32>
    %381 = arith.subf %48, %331 : vector<1x1024xf32>
    %382 = arith.mulf %379, %347 : vector<1x1024xf32>
    %383 = arith.mulf %380, %348 : vector<1x1024xf32>
    %384 = arith.addf %382, %383 : vector<1x1024xf32>
    %385 = arith.mulf %381, %349 : vector<1x1024xf32>
    %386 = arith.addf %384, %385 : vector<1x1024xf32>
    %387 = arith.mulf %379, %367 : vector<1x1024xf32>
    %388 = arith.mulf %380, %368 : vector<1x1024xf32>
    %389 = arith.addf %387, %388 : vector<1x1024xf32>
    %390 = arith.mulf %381, %369 : vector<1x1024xf32>
    %391 = arith.addf %389, %390 : vector<1x1024xf32>
    %392 = arith.mulf %379, %372 : vector<1x1024xf32>
    %393 = arith.mulf %380, %375 : vector<1x1024xf32>
    %394 = arith.addf %392, %393 : vector<1x1024xf32>
    %395 = arith.mulf %381, %378 : vector<1x1024xf32>
    %396 = arith.addf %394, %395 : vector<1x1024xf32>
    %cst_119 = arith.constant 0.000000e+00 : f32
    %397 = vector.broadcast %cst_119 : f32 to vector<1x1024xf32>
    %398 = arith.addf %346, %397 : vector<1x1024xf32>
    %cst_120 = arith.constant 0.000000e+00 : f32
    %399 = vector.broadcast %cst_120 : f32 to vector<1x1024xf32>
    %400 = arith.cmpf oge, %386, %399 : vector<1x1024xf32>
    %401 = arith.cmpf ole, %386, %398 : vector<1x1024xf32>
    %402 = arith.andi %400, %401 : vector<1x1024xi1>
    %cst_121 = arith.constant -4.000000e-01 : f32
    %403 = vector.broadcast %cst_121 : f32 to vector<1x1024xf32>
    %404 = arith.cmpf oge, %391, %403 : vector<1x1024xf32>
    %cst_122 = arith.constant 4.000000e-01 : f32
    %405 = vector.broadcast %cst_122 : f32 to vector<1x1024xf32>
    %406 = arith.cmpf ole, %391, %405 : vector<1x1024xf32>
    %407 = arith.andi %404, %406 : vector<1x1024xi1>
    %cst_123 = arith.constant -3.000000e-01 : f32
    %408 = vector.broadcast %cst_123 : f32 to vector<1x1024xf32>
    %409 = arith.cmpf oge, %396, %408 : vector<1x1024xf32>
    %cst_124 = arith.constant 1.200000e+00 : f32
    %410 = vector.broadcast %cst_124 : f32 to vector<1x1024xf32>
    %411 = arith.cmpf ole, %396, %410 : vector<1x1024xf32>
    %412 = arith.andi %409, %411 : vector<1x1024xi1>
    %413 = arith.andi %402, %407 : vector<1x1024xi1>
    %414 = arith.andi %413, %412 : vector<1x1024xi1>
    %415 = arith.extui %414 : vector<1x1024xi1> to vector<1x1024xi32>
    %416 = arith.sitofp %415 : vector<1x1024xi32> to vector<1x1024xf32>
    %c27_125 = arith.constant 27 : index
    %c0_126 = arith.constant 0 : index
    %417 = vector.load %arg3[%c27_125, %c0_126] : memref<49x1024xf32, #tpu.memory_space<vmem>>, vector<1x1024xf32>
    %c28_127 = arith.constant 28 : index
    %c0_128 = arith.constant 0 : index
    %418 = vector.load %arg3[%c28_127, %c0_128] : memref<49x1024xf32, #tpu.memory_space<vmem>>, vector<1x1024xf32>
    %c29_129 = arith.constant 29 : index
    %c0_130 = arith.constant 0 : index
    %419 = vector.load %arg3[%c29_129, %c0_130] : memref<49x1024xf32, #tpu.memory_space<vmem>>, vector<1x1024xf32>
    %c30_131 = arith.constant 30 : index
    %c0_132 = arith.constant 0 : index
    %420 = vector.load %arg3[%c30_131, %c0_132] : memref<49x1024xf32, #tpu.memory_space<vmem>>, vector<1x1024xf32>
    %c31 = arith.constant 31 : index
    %c0_133 = arith.constant 0 : index
    %421 = vector.load %arg3[%c31, %c0_133] : memref<49x1024xf32, #tpu.memory_space<vmem>>, vector<1x1024xf32>
    %c32_134 = arith.constant 32 : index
    %c0_135 = arith.constant 0 : index
    %422 = vector.load %arg3[%c32_134, %c0_135] : memref<49x1024xf32, #tpu.memory_space<vmem>>, vector<1x1024xf32>
    %423 = arith.subf %420, %417 : vector<1x1024xf32>
    %424 = arith.subf %421, %418 : vector<1x1024xf32>
    %425 = arith.subf %422, %419 : vector<1x1024xf32>
    %426 = arith.mulf %423, %423 : vector<1x1024xf32>
    %427 = arith.mulf %424, %424 : vector<1x1024xf32>
    %428 = arith.addf %426, %427 : vector<1x1024xf32>
    %429 = arith.mulf %425, %425 : vector<1x1024xf32>
    %430 = arith.addf %428, %429 : vector<1x1024xf32>
    %cst_136 = arith.constant 9.99999996E-13 : f32
    %431 = vector.broadcast %cst_136 : f32 to vector<1x1024xf32>
    %432 = arith.maximumf %430, %431 : vector<1x1024xf32>
    %433 = math.rsqrt %432 : vector<1x1024xf32>
    %434 = arith.mulf %432, %433 : vector<1x1024xf32>
    %435 = arith.mulf %423, %433 : vector<1x1024xf32>
    %436 = arith.mulf %424, %433 : vector<1x1024xf32>
    %437 = arith.mulf %425, %433 : vector<1x1024xf32>
    %cst_137 = arith.constant 0.000000e+00 : f32
    %438 = vector.broadcast %cst_137 : f32 to vector<1x1024xf32>
    %439 = arith.subf %438, %436 : vector<1x1024xf32>
    %440 = arith.mulf %439, %435 : vector<1x1024xf32>
    %441 = arith.mulf %436, %436 : vector<1x1024xf32>
    %cst_138 = arith.constant 1.000000e+00 : f32
    %442 = vector.broadcast %cst_138 : f32 to vector<1x1024xf32>
    %443 = arith.subf %442, %441 : vector<1x1024xf32>
    %cst_139 = arith.constant 0.000000e+00 : f32
    %444 = vector.broadcast %cst_139 : f32 to vector<1x1024xf32>
    %445 = arith.subf %444, %436 : vector<1x1024xf32>
    %446 = arith.mulf %445, %437 : vector<1x1024xf32>
    %447 = arith.mulf %440, %440 : vector<1x1024xf32>
    %448 = arith.mulf %443, %443 : vector<1x1024xf32>
    %449 = arith.addf %447, %448 : vector<1x1024xf32>
    %450 = arith.mulf %446, %446 : vector<1x1024xf32>
    %451 = arith.addf %449, %450 : vector<1x1024xf32>
    %cst_140 = arith.constant 9.99999996E-13 : f32
    %452 = vector.broadcast %cst_140 : f32 to vector<1x1024xf32>
    %453 = arith.maximumf %451, %452 : vector<1x1024xf32>
    %454 = math.rsqrt %453 : vector<1x1024xf32>
    %455 = arith.mulf %440, %454 : vector<1x1024xf32>
    %456 = arith.mulf %443, %454 : vector<1x1024xf32>
    %457 = arith.mulf %446, %454 : vector<1x1024xf32>
    %458 = arith.mulf %436, %457 : vector<1x1024xf32>
    %459 = arith.mulf %437, %456 : vector<1x1024xf32>
    %460 = arith.subf %458, %459 : vector<1x1024xf32>
    %461 = arith.mulf %437, %455 : vector<1x1024xf32>
    %462 = arith.mulf %435, %457 : vector<1x1024xf32>
    %463 = arith.subf %461, %462 : vector<1x1024xf32>
    %464 = arith.mulf %435, %456 : vector<1x1024xf32>
    %465 = arith.mulf %436, %455 : vector<1x1024xf32>
    %466 = arith.subf %464, %465 : vector<1x1024xf32>
    %467 = arith.subf %32, %417 : vector<1x1024xf32>
    %468 = arith.subf %40, %418 : vector<1x1024xf32>
    %469 = arith.subf %48, %419 : vector<1x1024xf32>
    %470 = arith.mulf %467, %435 : vector<1x1024xf32>
    %471 = arith.mulf %468, %436 : vector<1x1024xf32>
    %472 = arith.addf %470, %471 : vector<1x1024xf32>
    %473 = arith.mulf %469, %437 : vector<1x1024xf32>
    %474 = arith.addf %472, %473 : vector<1x1024xf32>
    %475 = arith.mulf %467, %455 : vector<1x1024xf32>
    %476 = arith.mulf %468, %456 : vector<1x1024xf32>
    %477 = arith.addf %475, %476 : vector<1x1024xf32>
    %478 = arith.mulf %469, %457 : vector<1x1024xf32>
    %479 = arith.addf %477, %478 : vector<1x1024xf32>
    %480 = arith.mulf %467, %460 : vector<1x1024xf32>
    %481 = arith.mulf %468, %463 : vector<1x1024xf32>
    %482 = arith.addf %480, %481 : vector<1x1024xf32>
    %483 = arith.mulf %469, %466 : vector<1x1024xf32>
    %484 = arith.addf %482, %483 : vector<1x1024xf32>
    %cst_141 = arith.constant 0.000000e+00 : f32
    %485 = vector.broadcast %cst_141 : f32 to vector<1x1024xf32>
    %486 = arith.addf %434, %485 : vector<1x1024xf32>
    %cst_142 = arith.constant 0.000000e+00 : f32
    %487 = vector.broadcast %cst_142 : f32 to vector<1x1024xf32>
    %488 = arith.cmpf oge, %474, %487 : vector<1x1024xf32>
    %489 = arith.cmpf ole, %474, %486 : vector<1x1024xf32>
    %490 = arith.andi %488, %489 : vector<1x1024xi1>
    %cst_143 = arith.constant -2.500000e-01 : f32
    %491 = vector.broadcast %cst_143 : f32 to vector<1x1024xf32>
    %492 = arith.cmpf oge, %479, %491 : vector<1x1024xf32>
    %cst_144 = arith.constant 2.500000e-01 : f32
    %493 = vector.broadcast %cst_144 : f32 to vector<1x1024xf32>
    %494 = arith.cmpf ole, %479, %493 : vector<1x1024xf32>
    %495 = arith.andi %492, %494 : vector<1x1024xi1>
    %cst_145 = arith.constant -3.000000e-01 : f32
    %496 = vector.broadcast %cst_145 : f32 to vector<1x1024xf32>
    %497 = arith.cmpf oge, %484, %496 : vector<1x1024xf32>
    %cst_146 = arith.constant 1.000000e+00 : f32
    %498 = vector.broadcast %cst_146 : f32 to vector<1x1024xf32>
    %499 = arith.cmpf ole, %484, %498 : vector<1x1024xf32>
    %500 = arith.andi %497, %499 : vector<1x1024xi1>
    %501 = arith.andi %490, %495 : vector<1x1024xi1>
    %502 = arith.andi %501, %500 : vector<1x1024xi1>
    %503 = arith.extui %502 : vector<1x1024xi1> to vector<1x1024xi32>
    %504 = arith.sitofp %503 : vector<1x1024xi32> to vector<1x1024xf32>
    %c30_147 = arith.constant 30 : index
    %c0_148 = arith.constant 0 : index
    %505 = vector.load %arg3[%c30_147, %c0_148] : memref<49x1024xf32, #tpu.memory_space<vmem>>, vector<1x1024xf32>
    %c31_149 = arith.constant 31 : index
    %c0_150 = arith.constant 0 : index
    %506 = vector.load %arg3[%c31_149, %c0_150] : memref<49x1024xf32, #tpu.memory_space<vmem>>, vector<1x1024xf32>
    %c32_151 = arith.constant 32 : index
    %c0_152 = arith.constant 0 : index
    %507 = vector.load %arg3[%c32_151, %c0_152] : memref<49x1024xf32, #tpu.memory_space<vmem>>, vector<1x1024xf32>
    %c33 = arith.constant 33 : index
    %c0_153 = arith.constant 0 : index
    %508 = vector.load %arg3[%c33, %c0_153] : memref<49x1024xf32, #tpu.memory_space<vmem>>, vector<1x1024xf32>
    %c34 = arith.constant 34 : index
    %c0_154 = arith.constant 0 : index
    %509 = vector.load %arg3[%c34, %c0_154] : memref<49x1024xf32, #tpu.memory_space<vmem>>, vector<1x1024xf32>
    %c35 = arith.constant 35 : index
    %c0_155 = arith.constant 0 : index
    %510 = vector.load %arg3[%c35, %c0_155] : memref<49x1024xf32, #tpu.memory_space<vmem>>, vector<1x1024xf32>
    %511 = arith.subf %508, %505 : vector<1x1024xf32>
    %512 = arith.subf %509, %506 : vector<1x1024xf32>
    %513 = arith.subf %510, %507 : vector<1x1024xf32>
    %514 = arith.mulf %511, %511 : vector<1x1024xf32>
    %515 = arith.mulf %512, %512 : vector<1x1024xf32>
    %516 = arith.addf %514, %515 : vector<1x1024xf32>
    %517 = arith.mulf %513, %513 : vector<1x1024xf32>
    %518 = arith.addf %516, %517 : vector<1x1024xf32>
    %cst_156 = arith.constant 9.99999996E-13 : f32
    %519 = vector.broadcast %cst_156 : f32 to vector<1x1024xf32>
    %520 = arith.maximumf %518, %519 : vector<1x1024xf32>
    %521 = math.rsqrt %520 : vector<1x1024xf32>
    %522 = arith.mulf %520, %521 : vector<1x1024xf32>
    %523 = arith.mulf %511, %521 : vector<1x1024xf32>
    %524 = arith.mulf %512, %521 : vector<1x1024xf32>
    %525 = arith.mulf %513, %521 : vector<1x1024xf32>
    %cst_157 = arith.constant 0.000000e+00 : f32
    %526 = vector.broadcast %cst_157 : f32 to vector<1x1024xf32>
    %527 = arith.subf %526, %524 : vector<1x1024xf32>
    %528 = arith.mulf %527, %523 : vector<1x1024xf32>
    %529 = arith.mulf %524, %524 : vector<1x1024xf32>
    %cst_158 = arith.constant 1.000000e+00 : f32
    %530 = vector.broadcast %cst_158 : f32 to vector<1x1024xf32>
    %531 = arith.subf %530, %529 : vector<1x1024xf32>
    %cst_159 = arith.constant 0.000000e+00 : f32
    %532 = vector.broadcast %cst_159 : f32 to vector<1x1024xf32>
    %533 = arith.subf %532, %524 : vector<1x1024xf32>
    %534 = arith.mulf %533, %525 : vector<1x1024xf32>
    %535 = arith.mulf %528, %528 : vector<1x1024xf32>
    %536 = arith.mulf %531, %531 : vector<1x1024xf32>
    %537 = arith.addf %535, %536 : vector<1x1024xf32>
    %538 = arith.mulf %534, %534 : vector<1x1024xf32>
    %539 = arith.addf %537, %538 : vector<1x1024xf32>
    %cst_160 = arith.constant 9.99999996E-13 : f32
    %540 = vector.broadcast %cst_160 : f32 to vector<1x1024xf32>
    %541 = arith.maximumf %539, %540 : vector<1x1024xf32>
    %542 = math.rsqrt %541 : vector<1x1024xf32>
    %543 = arith.mulf %528, %542 : vector<1x1024xf32>
    %544 = arith.mulf %531, %542 : vector<1x1024xf32>
    %545 = arith.mulf %534, %542 : vector<1x1024xf32>
    %546 = arith.mulf %524, %545 : vector<1x1024xf32>
    %547 = arith.mulf %525, %544 : vector<1x1024xf32>
    %548 = arith.subf %546, %547 : vector<1x1024xf32>
    %549 = arith.mulf %525, %543 : vector<1x1024xf32>
    %550 = arith.mulf %523, %545 : vector<1x1024xf32>
    %551 = arith.subf %549, %550 : vector<1x1024xf32>
    %552 = arith.mulf %523, %544 : vector<1x1024xf32>
    %553 = arith.mulf %524, %543 : vector<1x1024xf32>
    %554 = arith.subf %552, %553 : vector<1x1024xf32>
    %555 = arith.subf %32, %505 : vector<1x1024xf32>
    %556 = arith.subf %40, %506 : vector<1x1024xf32>
    %557 = arith.subf %48, %507 : vector<1x1024xf32>
    %558 = arith.mulf %555, %523 : vector<1x1024xf32>
    %559 = arith.mulf %556, %524 : vector<1x1024xf32>
    %560 = arith.addf %558, %559 : vector<1x1024xf32>
    %561 = arith.mulf %557, %525 : vector<1x1024xf32>
    %562 = arith.addf %560, %561 : vector<1x1024xf32>
    %563 = arith.mulf %555, %543 : vector<1x1024xf32>
    %564 = arith.mulf %556, %544 : vector<1x1024xf32>
    %565 = arith.addf %563, %564 : vector<1x1024xf32>
    %566 = arith.mulf %557, %545 : vector<1x1024xf32>
    %567 = arith.addf %565, %566 : vector<1x1024xf32>
    %568 = arith.mulf %555, %548 : vector<1x1024xf32>
    %569 = arith.mulf %556, %551 : vector<1x1024xf32>
    %570 = arith.addf %568, %569 : vector<1x1024xf32>
    %571 = arith.mulf %557, %554 : vector<1x1024xf32>
    %572 = arith.addf %570, %571 : vector<1x1024xf32>
    %cst_161 = arith.constant 3.000000e-01 : f32
    %573 = vector.broadcast %cst_161 : f32 to vector<1x1024xf32>
    %574 = arith.addf %522, %573 : vector<1x1024xf32>
    %cst_162 = arith.constant 0.000000e+00 : f32
    %575 = vector.broadcast %cst_162 : f32 to vector<1x1024xf32>
    %576 = arith.cmpf oge, %562, %575 : vector<1x1024xf32>
    %577 = arith.cmpf ole, %562, %574 : vector<1x1024xf32>
    %578 = arith.andi %576, %577 : vector<1x1024xi1>
    %cst_163 = arith.constant -7.500000e-01 : f32
    %579 = vector.broadcast %cst_163 : f32 to vector<1x1024xf32>
    %580 = arith.cmpf oge, %567, %579 : vector<1x1024xf32>
    %cst_164 = arith.constant 7.500000e-01 : f32
    %581 = vector.broadcast %cst_164 : f32 to vector<1x1024xf32>
    %582 = arith.cmpf ole, %567, %581 : vector<1x1024xf32>
    %583 = arith.andi %580, %582 : vector<1x1024xi1>
    %cst_165 = arith.constant -4.000000e-01 : f32
    %584 = vector.broadcast %cst_165 : f32 to vector<1x1024xf32>
    %585 = arith.cmpf oge, %572, %584 : vector<1x1024xf32>
    %cst_166 = arith.constant 1.500000e+00 : f32
    %586 = vector.broadcast %cst_166 : f32 to vector<1x1024xf32>
    %587 = arith.cmpf ole, %572, %586 : vector<1x1024xf32>
    %588 = arith.andi %585, %587 : vector<1x1024xi1>
    %589 = arith.andi %578, %583 : vector<1x1024xi1>
    %590 = arith.andi %589, %588 : vector<1x1024xi1>
    %591 = arith.extui %590 : vector<1x1024xi1> to vector<1x1024xi32>
    %592 = arith.sitofp %591 : vector<1x1024xi32> to vector<1x1024xf32>
    %cst_167 = arith.constant 0.000000e+00 : f32
    %593 = vector.broadcast %cst_167 : f32 to vector<1x1024xf32>
    %594 = arith.cmpf ogt, %416, %593 : vector<1x1024xf32>
    %cst_168 = arith.constant 0.000000e+00 : f32
    %595 = vector.broadcast %cst_168 : f32 to vector<1x1024xf32>
    %596 = arith.cmpf ogt, %504, %595 : vector<1x1024xf32>
    %cst_169 = arith.constant 0.000000e+00 : f32
    %597 = vector.broadcast %cst_169 : f32 to vector<1x1024xf32>
    %598 = arith.cmpf ogt, %592, %597 : vector<1x1024xf32>
    %cst_170 = arith.constant 0.000000e+00 : f32
    %599 = vector.broadcast %cst_170 : f32 to vector<1x1024xf32>
    %600 = arith.cmpf ogt, %240, %599 : vector<1x1024xf32>
    %cst_171 = arith.constant 0.000000e+00 : f32
    %601 = vector.broadcast %cst_171 : f32 to vector<1x1024xf32>
    %602 = arith.cmpf ogt, %328, %601 : vector<1x1024xf32>
    %c5_i32 = arith.constant 5 : i32
    %c0_i32_172 = arith.constant 0 : i32
    %603 = vector.broadcast %c5_i32 : i32 to vector<1x1024xi32>
    %604 = vector.broadcast %c0_i32_172 : i32 to vector<1x1024xi32>
    %605 = arith.select %602, %603, %604 : vector<1x1024xi1>, vector<1x1024xi32>
    %c4_i32 = arith.constant 4 : i32
    %606 = vector.broadcast %c4_i32 : i32 to vector<1x1024xi32>
    %607 = arith.select %600, %606, %605 : vector<1x1024xi1>, vector<1x1024xi32>
    %c3_i32 = arith.constant 3 : i32
    %608 = vector.broadcast %c3_i32 : i32 to vector<1x1024xi32>
    %609 = arith.select %598, %608, %607 : vector<1x1024xi1>, vector<1x1024xi32>
    %c2_i32 = arith.constant 2 : i32
    %610 = vector.broadcast %c2_i32 : i32 to vector<1x1024xi32>
    %611 = arith.select %596, %610, %609 : vector<1x1024xi1>, vector<1x1024xi32>
    %c1_i32_173 = arith.constant 1 : i32
    %612 = vector.broadcast %c1_i32_173 : i32 to vector<1x1024xi32>
    %613 = arith.select %594, %612, %611 : vector<1x1024xi1>, vector<1x1024xi32>
    %c3_i32_174 = arith.constant 3 : i32
    %614 = vector.broadcast %c3_i32_174 : i32 to vector<1x1024xi32>
    %615 = arith.cmpi eq, %15, %614 : vector<1x1024xi32>
    %c5_i32_175 = arith.constant 5 : i32
    %616 = vector.broadcast %c5_i32_175 : i32 to vector<1x1024xi32>
    %617 = arith.cmpi eq, %15, %616 : vector<1x1024xi32>
    %618 = arith.ori %615, %617 : vector<1x1024xi1>
    %c0_i32_176 = arith.constant 0 : i32
    %619 = vector.broadcast %c0_i32_176 : i32 to vector<1x1024xi32>
    %620 = arith.cmpi eq, %613, %619 : vector<1x1024xi32>
    %621 = arith.andi %618, %620 : vector<1x1024xi1>
    %c0_i32_177 = arith.constant 0 : i32
    %622 = vector.broadcast %c0_i32_177 : i32 to vector<1x1024xi32>
    %623 = arith.select %621, %622, %15 : vector<1x1024xi1>, vector<1x1024xi32>
    %cst_178 = arith.constant 0.000000e+00 : f32
    %624 = vector.broadcast %cst_178 : f32 to vector<1x1024xf32>
    %c0_i32_179 = arith.constant 0 : i32
    %625 = vector.broadcast %c0_i32_179 : i32 to vector<1x1024xi32>
    %626 = arith.cmpi eq, %623, %625 : vector<1x1024xi32>
    %627 = arith.select %626, %49, %624 : vector<1x1024xi1>, vector<1x1024xf32>
    %c1_i32_180 = arith.constant 1 : i32
    %628 = vector.broadcast %c1_i32_180 : i32 to vector<1x1024xi32>
    %629 = arith.cmpi eq, %623, %628 : vector<1x1024xi32>
    %630 = arith.select %629, %50, %627 : vector<1x1024xi1>, vector<1x1024xf32>
    %c2_i32_181 = arith.constant 2 : i32
    %631 = vector.broadcast %c2_i32_181 : i32 to vector<1x1024xi32>
    %632 = arith.cmpi eq, %623, %631 : vector<1x1024xi32>
    %633 = arith.select %632, %51, %630 : vector<1x1024xi1>, vector<1x1024xf32>
    %c3_i32_182 = arith.constant 3 : i32
    %634 = vector.broadcast %c3_i32_182 : i32 to vector<1x1024xi32>
    %635 = arith.cmpi eq, %623, %634 : vector<1x1024xi32>
    %636 = arith.select %635, %52, %633 : vector<1x1024xi1>, vector<1x1024xf32>
    %c4_i32_183 = arith.constant 4 : i32
    %637 = vector.broadcast %c4_i32_183 : i32 to vector<1x1024xi32>
    %638 = arith.cmpi eq, %623, %637 : vector<1x1024xi32>
    %639 = arith.select %638, %53, %636 : vector<1x1024xi1>, vector<1x1024xf32>
    %c5_i32_184 = arith.constant 5 : i32
    %640 = vector.broadcast %c5_i32_184 : i32 to vector<1x1024xi32>
    %641 = arith.cmpi eq, %623, %640 : vector<1x1024xi32>
    %642 = arith.select %641, %54, %639 : vector<1x1024xi1>, vector<1x1024xf32>
    %643 = arith.subf %59, %642 : vector<1x1024xf32>
    %644 = arith.addf %643, %83 : vector<1x1024xf32>
    %c-100_i32 = arith.constant -100 : i32
    %645 = vector.broadcast %c-100_i32 : i32 to vector<1x1024xi32>
    %646 = arith.cmpi ne, %623, %645 : vector<1x1024xi32>
    %647 = arith.andi %646, %11 : vector<1x1024xi1>
    %cst_185 = arith.constant 0.000000e+00 : f32
    %648 = vector.broadcast %cst_185 : f32 to vector<1x1024xf32>
    %649 = arith.select %647, %644, %648 : vector<1x1024xi1>, vector<1x1024xf32>
    %650 = arith.extui %647 : vector<1x1024xi1> to vector<1x1024xi32>
    %651 = arith.sitofp %650 : vector<1x1024xi32> to vector<1x1024xf32>
    %cst_186 = arith.constant 0.000000e+00 : f32
    %652 = vector.broadcast %cst_186 : f32 to vector<3x1024xf32>
    %653 = tpu.concatenate %136, %133, %173, %170, %236, %233, %324, %321, %649, %651, %180, %181, %179, %652 in 0 : vector<1x1024xf32>, vector<1x1024xf32>, vector<1x1024xf32>, vector<1x1024xf32>, vector<1x1024xf32>, vector<1x1024xf32>, vector<1x1024xf32>, vector<1x1024xf32>, vector<1x1024xf32>, vector<1x1024xf32>, vector<1x1024xf32>, vector<1x1024xf32>, vector<1x1024xf32>, vector<3x1024xf32> -> vector<16x1024xf32>
    %654 = tpu.iota {dimensions = array<i32: 0>} : vector<16x1024xi32>
    %c0_i32_187 = arith.constant 0 : i32
    %655 = vector.broadcast %c0_i32_187 : i32 to vector<16x1024xi32>
    %656 = arith.cmpi eq, %654, %655 : vector<16x1024xi32>
    %c1_i32_188 = arith.constant 1 : i32
    %657 = vector.broadcast %c1_i32_188 : i32 to vector<1x1024xi32>
    %658 = arith.addi %657, %14 : vector<1x1024xi32>
    %659 = vector.broadcast %658 : vector<1x1024xi32> to vector<16x1024xi32>
    %660 = arith.cmpi eq, %654, %659 : vector<16x1024xi32>
    %661 = arith.ori %656, %660 : vector<16x1024xi1>
    %662 = vector.broadcast %11 : vector<1x1024xi1> to vector<16x1024xi1>
    %663 = arith.andi %661, %662 : vector<16x1024xi1>
    %cst_189 = arith.constant 1.000000e+00 : f32
    %cst_190 = arith.constant 0.000000e+00 : f32
    %664 = vector.broadcast %cst_189 : f32 to vector<16x1024xf32>
    %665 = vector.broadcast %cst_190 : f32 to vector<16x1024xf32>
    %666 = arith.select %663, %664, %665 : vector<16x1024xi1>, vector<16x1024xf32>
    %cst_191 = arith.constant dense<0.000000e+00> : vector<16x16xf32>
    %667 = tpu.matmul %666, %653, %cst_191 {dimension_numbers = #tpu.dot_dimension_numbers<[1], [1], [0], [0], [0, 0, 1, 0], [], []>} : vector<16x1024xf32>, vector<16x1024xf32>, vector<16x16xf32> -> vector<16x16xf32>
    %c0_192 = arith.constant 0 : index
    %c0_193 = arith.constant 0 : index
    %c0_194 = arith.constant 0 : index
    %668 = vector.load %arg5[%c0_192, %c0_193, %c0_194] : memref<1x16x16xf32, #tpu.memory_space<vmem>>, vector<1x16x16xf32>
    %669 = vector.shape_cast %667 : vector<16x16xf32> to vector<1x16x16xf32>
    %670 = arith.addf %668, %669 : vector<1x16x16xf32>
    %c0_195 = arith.constant 0 : index
    %c0_196 = arith.constant 0 : index
    %c0_197 = arith.constant 0 : index
    %671 = vector.load %arg5[%c0_195, %c0_196, %c0_197] : memref<1x16x16xf32, #tpu.memory_space<vmem>>, vector<1x16x16xf32>
    tpu.vector_store %arg5[%c0_195, %c0_196, %c0_197], %670 {strides = array<i32>} : memref<1x16x16xf32, #tpu.memory_space<vmem>>, vector<1x16x16xf32>,
    return
  }
  func.func @transform_0(%arg0: i32, %arg1: i32, %arg2: memref<1xi32, #tpu.memory_space<smem>>) -> (i32, i32) {
    %c1_i32 = arith.constant 1 : i32
    %0 = arith.muli %arg0, %c1_i32 : i32
    %1 = arith.addi %0, %arg1 : i32
    %c0_i32 = arith.constant 0 : i32
    %c0_i32_0 = arith.constant 0 : i32
    return %c0_i32, %1 : i32, i32
  }
  func.func @transform_1(%arg0: i32, %arg1: i32, %arg2: memref<1xi32, #tpu.memory_space<smem>>) -> (i32, i32) {
    %c1_i32 = arith.constant 1 : i32
    %0 = arith.muli %arg0, %c1_i32 : i32
    %1 = arith.addi %0, %arg1 : i32
    %c0_i32 = arith.constant 0 : i32
    %c0_i32_0 = arith.constant 0 : i32
    return %c0_i32, %1 : i32, i32
  }
  func.func @transform_2(%arg0: i32, %arg1: i32, %arg2: memref<1xi32, #tpu.memory_space<smem>>) -> (i32, i32, i32) {
    %c0_i32 = arith.constant 0 : i32
    %c0_i32_0 = arith.constant 0 : i32
    %c0_i32_1 = arith.constant 0 : i32
    return %arg0, %c0_i32, %c0_i32_0 : i32, i32, i32
  }
}

</mosaic_0001>

<bundles_post_ra>
// kernel: tpu_custom_call.1
= control target key start
LH: loop header
LB: loop body
LE: loop exit
PB: predicated region body
PF: predicated region fallthrough
CT: control target
= control target key end

     0   :  { %s4671_s0 = inlined_call_operand.<no memory space> [shape: s32[1], index: 0, kind: input, shape index: {}]   ;;  %s4672_s1 = inlined_call_operand.hbm [shape: f32[49,2048], index: 1, kind: input, shape index: {}]   ;;  %s4673_s2 = inlined_call_operand.hbm [shape: s32[2,2048], index: 2, kind: input, shape index: {}]   ;;  %s4674_s3 = inlined_call_operand.hbm [shape: f32[2,16,16], index: 3, kind: output, shape index: {}]  }
   0x1   :  { %8 = sst [smem:[#allocation3]] %s4671_s0 }
   0x2   :  { %9 = vsyncpa [#allocation5], 0 }
   0x3   :  { %11 = vsyncpa [#allocation5 + $0x1], 0 }
   0x4   :  { %12 = vsyncpa [#allocation8], 0 }
   0x5   :  { %14 = vsyncpa [#allocation8 + $0x1], 0 }
   0x6   :  { %15 = vsyncpa [#allocation6], 0 }
   0x7   :  { %17 = vsyncpa [#allocation6 + $0x1], 0  ;;  %s2860_s14 = smov 0   ;;  %s2862_s15 = smov 0  }
   0x8   :  { %s2864_s16 = smov 0   ;;  %s2866_s17 = smov 0  }
   0x9   :  { %s2868_s18 = smov 0   ;;  %s2870_s19 = smov 0  }
   0xa LB: > { %s2364_s0 = sadd.s32 4294967295, %s2822_s19   ;;  %s2365_s20 = sadd.s32 4294967294, %s2822_s19   ;;  %s2822_s19 = sphi %s2870_s19, %s23_s19   ;;  %s2818_s18 = sphi %s2868_s18, %s4992_s18   ;;  %s2814_s17 = sphi %s2866_s17, %s4991_s17   ;;  %s2810_s16 = sphi %s2864_s16, %s4990_s16   ;;  %s2806_s15 = sphi %s2862_s15, %s4989_s15   ;;  %s2802_s14 = sphi %s2860_s14, %s4988_s14  }
   0xb   : > { %s35_s21 = sadd.s32 1, %s2818_s18  ;;  %s44_s22 = sadd.s32 1, %s2810_s16 }
   0xc   : > { %p37_p0 = scmp.ge.s32.totalorder %s35_s21, 2  ;;  %p51_p1 = scmp.ne.s32.totalorder %s2810_s16, %s2806_s15 }
   0xd   : > { %p52_p2 = scmp.eq.s32.totalorder %s2822_s19, 0  ;;  %p57_p3 = scmp.ne.s32.totalorder %s2806_s15, %s2802_s14 }
   0xe   : > { %s4994_s21 = smov (%p37_p0, %s35_s21), 0  ;;  %p58_p5 = scmp.eq.s32.totalorder %s2364_s0, 0 }
   0xf   : > { %p2901_p4 = por %p52_p2, %p51_p1  ;;  %s41_s24 = ssub.s32 %s2818_s18, %s4994_s21 }
  0x10   : > { %p109_p6 = scmp.eq.s32.totalorder %s2364_s0, 1  ;;  %p42_p7 = scmp.eq.s32.totalorder %s41_s24, 0 }
  0x11   : > { %p2907_p8 = por %p58_p5, %p57_p3  ;;  %p115_p10 = scmp.eq.s32.totalorder %s2365_s20, 1 }
  0x12   : > { %p2911_p9 = por %p109_p6, %p51_p1  ;;  %p2566_p13 = scmp.lt.s32.totalorder %s2822_s19, 2 }
  0x13   : > { %s4751_s25 = scalar_select %p2907_p8, 1, 0 }
  0x14   : > { %s4752_s26 = scalar_select %p2911_p9, 1, 0 }
  0x15   : > { %s2916_s27 = scalar_select %p42_p7, %s2810_s16, %s44_s22  }
  0x16   : > { %p2918_p11 = por %p115_p10, %p57_p3  ;;  %s2925_s29 = sand.u32 1, %s2810_s16  }
  0x17   : > { %s2547_s30 = smul.u32 448, %s2925_s29  ;;  %s2520_s4 = sshll.u32 %s2818_s18, 10 }
  0x18   : > { %s4753_s28 = scalar_select %p2918_p11, 1, 0 }
  0x19   : > { %p2931_p0 = pnand %p2566_p13, %p2901_p4  ;;  %s2938_s8 = scalar_lea.hbm %s4672_s1, %s2520_s4 }
  0x1a   : > { %s139_s9 = scalar_lea.vmem [#allocation4], %s2547_s30  ;;  %s136_s11 = scalar_lea.sflag [#allocation5], %s2925_s29 }
  0x1b   : > { %s147_s10 = sshll.u32 %s139_s9, 4  ;;  %s2676_s12 = scalar_lea.hbm %s2938_s8, 7168  ;;  %s2940_s10 = int_to_ptr.vmem [resolvable:$true] %s147_s10 }
  0x1c   : > { %p2677_p1 = scmp.ne.s32.totalorder %s2938_s8, %s2676_s12  ;;  %p2678_p2 = pneg %p2931_p0 }
  0x1d   : > { %s2681_s20 = scalar_lea.hbm %s4672_s1, 14336  ;;  %p2682_p5 = scmp.lt.u32.totalorder %s2938_s8, %s4672_s1 }
  0x1e   : > { %p2679_p3 = pnand %p2678_p2, %p2677_p1  ;;  %p2683_p6 = scmp.lt.u32.totalorder %s2681_s20, %s2676_s12 }
  0x1f   : > { %p2685_p10 = scmp.lt.u32.totalorder %s2676_s12, %s2938_s8 }
  0x20   : > { %p2680_p4 = pneg %p2679_p3  ;;  %p2684_p7 = por %p2683_p6, %p2682_p5 }
  0x22   : > { %p2686_p13 = por %p2685_p10, %p2684_p7 }
  0x24   : > { %p2687_p12 = pnand %p2686_p13, %p2680_p4 }
  0x26   : > { %2690 = shalt.err (!%p2687_p12)
}
  0x27   : > { %s2691_s24 = scalar_lea.vmem %s2940_s10, 7168  ;;  %s2824_s30 = smov [#allocation4]  }
  0x28   : > { %p2692_p1 = scmp.ne.s32.totalorder %s2940_s10, %s2691_s24  ;;  %s2696_s4 = sshll.u32 %s2824_s30, 4  ;;  %s2697_s4 = int_to_ptr.vmem [resolvable:$false] %s2696_s4 }
  0x29   : > { %s2698_s6 = scalar_lea.vmem %s2697_s4, 14336  ;;  %p2699_p9 = scmp.lt.s32.totalorder %s2940_s10, %s2697_s4 }
  0x2a   : > { %p2694_p3 = pnand %p2692_p1, %p2678_p2  ;;  %p2700_p5 = scmp.lt.s32.totalorder %s2698_s6, %s2691_s24 }
  0x2c   : > { %p2695_p11 = pneg %p2694_p3  ;;  %p2701_p6 = por %p2700_p5, %p2699_p9 }
  0x2e   : > { %p2702_p7 = pnand %p2701_p6, %p2695_p11 }
  0x30   : > { %2705 = shalt.err (!%p2702_p7)
}
  0x31   : > { %s2825_s7 = smov 2048   ;;  %s2826_s9 = smov 1024  }
  0x32   : > { %s2827_s12 = smov 64   ;;  %p2373_p12 = scmp.ge.s32.totalorder %s2822_s19, 1 }
  0x33   : > { %2558 = dma.hbm_to_vmem [thread:$0]  (!%p2931_p0), %s2938_s8, 7168, %s2940_s10, %s136_s11, %s2825_s7, %s2826_s9, %s2827_s12  }
  0x34   : > { %p175_p9 = scmp.lt.s32.totalorder %s2822_s19, 3  ;;  %s2370_s13 = sshll.u32 %s2925_s29, 4 }
  0x35   : > { %s2521_s20 = sshll.u32 %s2818_s18, 8  ;;  %s161_s22 = scalar_lea.vmem [#allocation7], %s2370_s13 }
  0x36   : > { %p2973_p11 = pnand %p2373_p12, %p175_p9  ;;  %s170_s23 = sshll.u32 %s161_s22, 4  ;;  %s171_s23 = int_to_ptr.vmem [resolvable:$true] %s170_s23 }
  0x37   : > { %s2981_s4 = scalar_lea.hbm %s4673_s2, %s2521_s20  ;;  %s158_s8 = scalar_lea.sflag [#allocation8], %s2925_s29 }
  0x38   : > { %s4755_s0 = scalar_select %p2973_p11, 1, 0 }
  0x39   : > { %s2706_s10 = scalar_lea.hbm %s2981_s4, 256  ;;  %s2711_s7 = scalar_lea.hbm %s4673_s2, 512 }
  0x3a   : > { %p2707_p4 = scmp.ne.s32.totalorder %s2981_s4, %s2706_s10  ;;  %p2712_p1 = scmp.lt.u32.totalorder %s2981_s4, %s4673_s2 }
  0x3b   : > { %p2713_p3 = scmp.lt.u32.totalorder %s2711_s7, %s2706_s10  ;;  %p2715_p6 = scmp.lt.u32.totalorder %s2706_s10, %s2981_s4 }
  0x3c   : > { %p2709_p10 = pnand %p2707_p4, %p2678_p2 }
  0x3d   : > { %p2714_p5 = por %p2713_p3, %p2712_p1 }
  0x3e   : > { %p2710_p13 = pneg %p2709_p10 }
  0x3f   : > { %p2716_p7 = por %p2715_p6, %p2714_p5 }
  0x41   : > { %p2717_p12 = pnand %p2716_p7, %p2710_p13 }
  0x43   : > { %2720 = shalt.err (!%p2717_p12)
}
  0x44   : > { %s2721_s29 = scalar_lea.vmem %s171_s23, 256  ;;  %s2828_s13 = smov [#allocation7]  }
  0x45   : > { %p2722_p9 = scmp.ne.s32.totalorder %s171_s23, %s2721_s29  ;;  %s2726_s20 = sshll.u32 %s2828_s13, 4  ;;  %s2727_s20 = int_to_ptr.vmem [resolvable:$false] %s2726_s20 }
  0x46   : > { %s2728_s22 = scalar_lea.vmem %s2727_s20, 512  ;;  %p2729_p8 = scmp.lt.s32.totalorder %s171_s23, %s2727_s20 }
  0x47   : > { %p2724_p4 = pnand %p2722_p9, %p2678_p2  ;;  %p2730_p11 = scmp.lt.s32.totalorder %s2728_s22, %s2721_s29 }
  0x49   : > { %p2725_p10 = pneg %p2724_p4  ;;  %p2731_p1 = por %p2730_p11, %p2729_p8 }
  0x4b   : > { %p2732_p3 = pnand %p2731_p1, %p2725_p10 }
  0x4d   : > { %2735 = shalt.err (!%p2732_p3)
}
  0x4e   : > { %2561 = dma.hbm_to_vmem [thread:$0]  (!%p2931_p0), %s2981_s4, 256, %s171_s23, %s158_s8  }
  0x4f   : > { %p4756_p13 = scmp.ne.s32.totalorder %s4755_s0, 0 }
  0x51   : > { %179 = sbr.rel (%p4756_p13) target bundleno = 601 (0x259), region = 28 }
  0x58   : > { %s3006_s24 = sand.u32 1, %s2806_s15   ;;  %p4757_p8 = scmp.ne.s32.totalorder %s4751_s25, 0 }
  0x59   : > { %s2548_s30 = smul.u32 448, %s3006_s24  ;;  %s182_s10 = scalar_lea.sflag [#allocation5], %s3006_s24 }
  0x5b   : > { %s3010_s11 = scalar_lea.vmem [#allocation4], %s2548_s30 }
  0x5c   : > { %2789 = dma.done.wait (%p4757_p8), %s182_s10, 7168  }
  0x5d   : > { %2791 = vsyncadd (%p4757_p8), %s182_s10, 4294960128  ;;  %s2374_s5 = sshll.u32 %s3006_s24, 4  ;;  %s191_s0 = scalar_lea.sflag [#allocation8], %s3006_s24 }
  0x5e   : > { %s3020_s23 = scalar_lea.vmem [#allocation7], %s2374_s5 }
  0x5f   : > { %2793 = dma.done.wait (%p4757_p8), %s191_s0, 256  }
  0x60   : > { %2795 = vsyncadd (%p4757_p8), %s191_s0, 4294967040  ;;  %v232_v0 = vlaneseq  ;;  %s2376_s4 = sshll.u32 %s2814_s17, 10  ;;  %s251_s8 = sld [smem:[#allocation3]]  ;;  %v4759_v20 = vmov 0  ;;  %v4762_v21 = vmov 0  ;;  %v4765_v22 = vmov 0 }
  0x61   : > { %v242_v2 = vstv %s2376_s4  ;;  %v4768_v23 = vmov 0  ;;  %v4771_v24 = vmov 0  ;;  %v4774_v25 = vmov 0  ;;  %v280_v42 = vld [vmem:[%s3010_s11] ss:$8 sm:$0xf] }
  0x62   : > { %v233_v1 = vand.u32 127, %v232_v0  ;;  %v3027_v19 = vshrl.u32 %v232_v0, 7  ;;  %v4777_v26 = vmov 0  ;;  %v4780_v27 = vmov 0  ;;  %s4601_s25 = scalar_lea.vmem [#allocation9], %s2374_s5  ;;  %s2522_s6 = sshll.u32 %s2814_s17, 8 }
  0x63   : > { %v4677_v28 = vmov 0   ;;  %v4678_v36 = vmov 0.0   ;;  %v281_v43 = vld [vmem:[%s3010_s11] ss:$8 sm:$0xf0]  ;;  %s2258_s7 = sshll.u32 %s4601_s25, 4  ;;  %s4618_s29 = scalar_lea.hbm %s4674_s3, %s2522_s6  ;;  %s4620_s7 = int_to_ptr.vmem [resolvable:$true] %s2258_s7 }
  0x64   : > { %v234_v3 = vadd.s32 128, %v233_v1  ;;  %v235_v4 = vadd.s32 256, %v233_v1  ;;  %v236_v5 = vadd.s32 384, %v233_v1  ;;  %v237_v6 = vadd.s32 512, %v233_v1  ;;  %4758 = vst [vmem:[#allocation13_spill] sm:$0xff] %v3027_v19  ;;  %s2245_s17 = scalar_lea.sflag [#allocation6], %s3006_s24 }
  0x65   : > { %v238_v7 = vadd.s32 640, %v233_v1  ;;  %v239_v8 = vadd.s32 768, %v233_v1  ;;  %v240_v9 = vadd.s32 896, %v233_v1  ;;  %v243_v10 = vadd.s32 %v242_v2, %v233_v1  ;;  %v2386_v44 = vld [vmem:[%s3010_s11 + $0x3] ss:$8 sm:$0xf] }
  0x66   : > { %v244_v11 = vadd.s32 %v242_v2, %v234_v3  ;;  %v245_v12 = vadd.s32 %v242_v2, %v235_v4  ;;  %v246_v13 = vadd.s32 %v242_v2, %v236_v5  ;;  %v247_v14 = vadd.s32 %v242_v2, %v237_v6  ;;  %v2387_v45 = vld [vmem:[%s3010_s11 + $0x3] ss:$8 sm:$0xf0]  ;;  %v2388_v46 = vld [vmem:[%s3010_s11 + $0x1] ss:$8 sm:$0xf] }
  0x67   : > { %v248_v15 = vadd.s32 %v242_v2, %v238_v7  ;;  %v249_v16 = vadd.s32 %v242_v2, %v239_v8  ;;  %v250_v17 = vadd.s32 %v242_v2, %v240_v9  ;;  %v252_v18 = vstv %s251_s8  ;;  %v2389_v50 = vld [vmem:[%s3010_s11 + $0x1] ss:$8 sm:$0xf0]  ;;  %v2390_v51 = vld [vmem:[%s3010_s11 + $0x4] ss:$8 sm:$0xf] }
  0x68   : > { %vm3029_vm0 = vcmp.lt.s32.totalorder %v243_v10, %v252_v18  ;;  %vm3033_vm1 = vcmp.lt.s32.totalorder %v244_v11, %v252_v18  ;;  %vm3037_vm2 = vcmp.lt.s32.totalorder %v245_v12, %v252_v18  ;;  %vm3041_vm3 = vcmp.lt.s32.totalorder %v246_v13, %v252_v18  ;;  %v2391_v52 = vld [vmem:[%s3010_s11 + $0x4] ss:$8 sm:$0xf0]  ;;  %v2392_v55 = vld [vmem:[%s3010_s11 + $0x2] ss:$8 sm:$0xf] }
  0x69   : > { %v4760_v20 = vsel %vm3029_vm0, 4294967295, %v4759_v20  ;;  %v4763_v21 = vsel %vm3033_vm1, 4294967295, %v4762_v21  ;;  %v4766_v22 = vsel %vm3037_vm2, 4294967295, %v4765_v22  ;;  %v4769_v23 = vsel %vm3041_vm3, 4294967295, %v4768_v23  ;;  %s2736_s13 = scalar_lea.vmem %s4620_s7, 256  ;;  %p4985_p2 = scmp.ne.s32.totalorder %s4752_s26, 0 }
  0x6a   : > { %4761 = vst [vmem:[#allocation14_spill] sm:$0xff] %v4760_v20  ;;  %4764 = vst [vmem:[#allocation15_spill] sm:$0xff] %v4763_v21  ;;  %vm3045_vm4 = vcmp.lt.s32.totalorder %v247_v14, %v252_v18  ;;  %vm3049_vm5 = vcmp.lt.s32.totalorder %v248_v15, %v252_v18  ;;  %vm3053_vm6 = vcmp.lt.s32.totalorder %v249_v16, %v252_v18  ;;  %v3064_v29 = vsel %vm3029_vm0, 1, %v4677_v28  ;;  %v2393_v56 = vld [vmem:[%s3010_s11 + $0x2] ss:$8 sm:$0xf0]  ;;  %p2737_p0 = scmp.ne.s32.totalorder %s4620_s7, %s2736_s13 }
  0x6b   : > { %4767 = vst [vmem:[#allocation16_spill] sm:$0xff] %v4766_v22  ;;  %4770 = vst [vmem:[#allocation17_spill] sm:$0xff] %v4769_v23  ;;  %v4772_v24 = vsel %vm3045_vm4, 4294967295, %v4771_v24  ;;  %v4775_v25 = vsel %vm3049_vm5, 4294967295, %v4774_v25  ;;  %v4778_v26 = vsel %vm3053_vm6, 4294967295, %v4777_v26  ;;  %vm3057_vm7 = vcmp.lt.s32.totalorder %v250_v17, %v252_v18  ;;  %s2834_s20 = smov [#allocation9]  }
  0x6c   : > { %4773 = vst [vmem:[#allocation18_spill] sm:$0xff] %v4772_v24  ;;  %4776 = vst [vmem:[#allocation19_spill] sm:$0xff] %v4775_v25  ;;  %v4781_v27 = vsel %vm3057_vm7, 4294967295, %v4780_v27  ;;  %v3069_v30 = vsel %vm3033_vm1, 1, %v4677_v28  ;;  %v3074_v31 = vsel %vm3037_vm2, 1, %v4677_v28  ;;  %v3079_v32 = vsel %vm3041_vm3, 1, %v4677_v28  ;;  %p2738_p11 = pnand %p2737_p0, %p4985_p2 }
  0x6d   : > { %4779 = vst [vmem:[#allocation20_spill] sm:$0xff] %v4778_v26  ;;  %4782 = vst [vmem:[#allocation21_spill] sm:$0xff] %v4781_v27  ;;  %v3084_v33 = vsel %vm3045_vm4, 1, %v4677_v28  ;;  %v3089_v34 = vsel %vm3049_vm5, 1, %v4677_v28  ;;  %v3094_v35 = vsel %vm3053_vm6, 1, %v4677_v28  ;;  %v3099_v37 = vsel %vm3029_vm0, 1.0, %v4678_v36 }
  0x6e   : > { %4783 = vst [vmem:[#allocation22_spill] sm:$0xff] %v3094_v35  ;;  %v3104_v38 = vsel %vm3033_vm1, 1.0, %v4678_v36  ;;  %v3109_v39 = vsel %vm3037_vm2, 1.0, %v4678_v36  ;;  %v3114_v40 = vsel %vm3041_vm3, 1.0, %v4678_v36  ;;  %v3119_v41 = vsel %vm3045_vm4, 1.0, %v4678_v36  ;;  %p2739_p5 = pneg %p2738_p11  ;;  %s2740_s22 = sshll.u32 %s2834_s20, 4  ;;  %s2741_s22 = int_to_ptr.vmem [resolvable:$false] %s2740_s22 }
  0x6f   : > { %v3129_v47 = vsel %vm3049_vm5, 1.0, %v4678_v36  ;;  %v3134_v48 = vsel %vm3053_vm6, 1.0, %v4678_v36  ;;  %v3139_v49 = vsel %vm3057_vm7, 1.0, %v4678_v36  ;;  %v2831_v53 = vmov 1966171168   ;;  %s2742_s30 = scalar_lea.vmem %s2741_s22, 512  ;;  %p2743_p6 = scmp.lt.s32.totalorder %s4620_s7, %s2741_s22 }
  0x70   : > { %v487_v54 = vunpack.c.l.s4 %v2831_v53  ;;  %v2394_v57 = vld [vmem:[%s3010_s11 + $0x5] ss:$8 sm:$0xf]  ;;  %v282_v59 = vor.u32 %v281_v43, %v280_v42  ;;  %v286_v60 = vor.u32 %v2387_v45, %v2386_v44  ;;  %v291_v61 = vor.u32 %v2389_v50, %v2388_v46  ;;  %v2402_v63 = vld [vmem:[%s3010_s11 + $0x7] ss:$8 sm:$0xf]  ;;  %p2744_p7 = scmp.lt.s32.totalorder %s2742_s30, %s2736_s13 }
  0x71   : > { %v2395_v58 = vld [vmem:[%s3010_s11 + $0x5] ss:$8 sm:$0xf0]  ;;  %v295_v62 = vor.u32 %v2391_v52, %v2390_v51  ;;  %v2403_v0 = vld [vmem:[%s3010_s11 + $0x7] ss:$8 sm:$0xf0]  ;;  %v300_v9 = vor.u32 %v2393_v56, %v2392_v55  ;;  %v482_v50 = vcombine.low %v3099_v37, %v3104_v38  ;;  %v483_v51 = vcombine.low %v3109_v39, %v3114_v40 }
  0x72   : > { %v2396_v1 = vld [vmem:[%s3010_s11 + $0x6] ss:$8 sm:$0xf]  ;;  %v2404_v3 = vld [vmem:[%s3010_s11 + $0x42] ss:$8 sm:$0xf]  ;;  %v488_v5 = vunpack.c.0.s8 %v487_v54  ;;  %v304_v10 = vor.u32 %v2395_v58, %v2394_v57  ;;  %v3159_v13 = vsub.f32 %v282_v59, %v286_v60  ;;  %v326_v15 = vor.u32 %v2403_v0, %v2402_v63  ;;  %p2745_p12 = por %p2744_p7, %p2743_p6 }
  0x73   : > { %v2397_v2 = vld [vmem:[%s3010_s11 + $0x6] ss:$8 sm:$0xf0]  ;;  %v2405_v4 = vld [vmem:[%s3010_s11 + $0x42] ss:$8 sm:$0xf0]  ;;  %v3161_v14 = vsub.f32 %v291_v61, %v295_v62 }
  0x74   : > { %v2398_v6 = vld [vmem:[%s3010_s11 + $0x41] ss:$8 sm:$0xf]  ;;  %v2406_v8 = vld [vmem:[%s3010_s11 + $0x45] ss:$8 sm:$0xf]  ;;  %v331_v16 = vor.u32 %v2405_v4, %v2404_v3  ;;  %v3180_v52 = vsub.s32 %v488_v5, %v3027_v19  ;;  %v309_v53 = vor.u32 %v2397_v2, %v2396_v1  ;;  %v305_v38 = vsub.f32 %v300_v9, %v304_v10  ;;  %p2746_p9 = pnand %p2745_p12, %p2739_p5 }
  0x75   : > { %v2399_v7 = vld [vmem:[%s3010_s11 + $0x41] ss:$8 sm:$0xf0]  ;;  %v2407_v11 = vld [vmem:[%s3010_s11 + $0x45] ss:$8 sm:$0xf0]  ;;  %v327_v1 = vmul.f32 %v326_v15, %v3159_v13  ;;  %v484_v9 = vcombine.low %v3119_v41, %v3129_v47  ;;  %v485_v10 = vcombine.low %v3134_v48, %v3139_v49 }
  0x76   : > { %v2414_v12 = vld [vmem:[%s3010_s11 + $0x143] ss:$8 sm:$0xf]  ;;  %v2416_v18 = vld [vmem:[%s3010_s11 + $0x144] ss:$8 sm:$0xf]  ;;  %v314_v39 = vor.u32 %v2399_v7, %v2398_v6  ;;  %v337_v40 = vor.u32 %v2407_v11, %v2406_v8  ;;  %v332_v2 = vmul.f32 %v331_v16, %v3161_v14  ;;  %v3211_v11 = vrot.slane %v482_v50, %v3180_v52 }
  0x77   : > { %v2415_v17 = vld [vmem:[%s3010_s11 + $0x143] ss:$8 sm:$0xf0]  ;;  %v3166_v42 = vld [vmem:[%s3010_s11 + $0x44] ss:$8 sm:$0xf]  ;;  %v310_v15 = vmul.f32 %v309_v53, %v3159_v13 }
  0x78   : > { %v3169_v43 = vld [vmem:[%s3010_s11 + $0x44] ss:$8 sm:$0xf0]  ;;  %v3171_v44 = vor.u32 %v2415_v17, %v2414_v12  ;;  %v2418_v46 = vld [vmem:[%s3010_s11 + $0x145] ss:$8 sm:$0xf]  ;;  %v3214_v12 = vrot.slane %v483_v51, %v3180_v52  ;;  %v315_v48 = vmul.f32 %v314_v39, %v3161_v14  ;;  %v338_v49 = vmul.f32 %v337_v40, %v305_v38 }
  0x79   : > { %v2417_v45 = vld [vmem:[%s3010_s11 + $0x144] ss:$8 sm:$0xf0]  ;;  %4785 = vst [vmem:[#allocation24_spill] sm:$0xff] %v3180_v52  ;;  %v320_v16 = vor.u32 %v3169_v43, %v3166_v42  ;;  %v333_v53 = vadd.f32 %v332_v2, %v327_v1  ;;  %v3235_v39 = vsel %vm3057_vm7, 1, %v4677_v28 }
  0x7a   : > { %4784 = vst [vmem:[#allocation23_spill] sm:$0xff] %v3171_v44  ;;  %v2408_v54 = vld [vmem:[%s3010_s11 + $0x40] ss:$8 sm:$0xf]  ;;  %v3186_v58 = vor.u32 %v2417_v45, %v2416_v18  ;;  %4791 = vst [vmem:[#allocation30_spill] sm:$0xff] %v3235_v39 }
  0x7b   : > { %v2409_v55 = vld [vmem:[%s3010_s11 + $0x40] ss:$8 sm:$0xf0]  ;;  %v2410_v56 = vld [vmem:[%s3010_s11 + $0x43] ss:$8 sm:$0xf] }
  0x7c   : > { %v2411_v57 = vld [vmem:[%s3010_s11 + $0x43] ss:$8 sm:$0xf0]  ;;  %4786 = vst [vmem:[#allocation25_spill] sm:$0xff] %v3186_v58  ;;  %v381_v6 = vmax.f32 %v3171_v44, %v3186_v58  ;;  %v343_v45 = vor.u32 %v2409_v55, %v2408_v54 }
  0x7d   : > { %v2419_v59 = vld [vmem:[%s3010_s11 + $0x145] ss:$8 sm:$0xf0]  ;;  %v2420_v37 = vld [vmem:[%s3010_s11 + $0x146] ss:$8 sm:$0xf] }
  0x7e   : > { %v2412_v60 = vld [vmem:[%s3010_s11 + $0x46] ss:$8 sm:$0xf]  ;;  %v3192_v62 = vor.u32 %v2419_v59, %v2418_v46  ;;  %v2422_v0 = vld [vmem:[%s3010_s11 + $0x147] ss:$8 sm:$0xf]  ;;  %v348_v46 = vor.u32 %v2411_v57, %v2410_v56 }
  0x7f   : > { %v2413_v61 = vld [vmem:[%s3010_s11 + $0x46] ss:$8 sm:$0xf0]  ;;  %v2423_v4 = vld [vmem:[%s3010_s11 + $0x147] ss:$8 sm:$0xf0] }
  0x80   : > { %4787 = vst [vmem:[#allocation26_spill] sm:$0xff] %v3192_v62  ;;  %v2421_v63 = vld [vmem:[%s3010_s11 + $0x146] ss:$8 sm:$0xf0]  ;;  %v3219_v17 = vor.u32 %v2423_v4, %v2422_v0  ;;  %v382_v41 = vmax.f32 %v381_v6, %v3192_v62  ;;  %v354_v59 = vor.u32 %v2413_v61, %v2412_v60  ;;  %v506_v61 = vrot.slane %v484_v9, %v3180_v52 }
  0x81   : > { %v3198_v3 = vor.u32 %v2421_v63, %v2420_v37  ;;  %v2424_v5 = vld [vmem:[%s3010_s11 + $0x180] ss:$8 sm:$0xf]  ;;  %v2428_v18 = vld [vmem:[%s3010_s11 + $0xc2] ss:$8 sm:$0xf]  ;;  %v513_v0 = vrot.slane %v485_v10, %v3180_v52  ;;  %v321_v4 = vmul.f32 %v320_v16, %v305_v38  ;;  %v349_v6 = vmul.f32 %v348_v46, %v3161_v14 }
  0x82   : > { %v2425_v7 = vld [vmem:[%s3010_s11 + $0x180] ss:$8 sm:$0xf0]  ;;  %4789 = vst [vmem:[#allocation28_spill] sm:$0xff] %v3219_v17 }
  0x83   : > { %4788 = vst [vmem:[#allocation27_spill] sm:$0xff] %v3198_v3  ;;  %v2426_v8 = vld [vmem:[%s3010_s11 + $0xc0] ss:$8 sm:$0xf]  ;;  %v3227_v42 = vor.u32 %v2425_v7, %v2424_v5  ;;  %v383_v43 = vmax.f32 %v382_v41, %v3198_v3  ;;  %v344_v5 = vmul.f32 %v343_v45, %v3159_v13  ;;  %v514_v7 = vcombine.low %v3211_v11, %v3214_v12 }
  0x84   : > { %v2427_v47 = vld [vmem:[%s3010_s11 + $0xc0] ss:$8 sm:$0xf0]  ;;  %v2429_v50 = vld [vmem:[%s3010_s11 + $0xc2] ss:$8 sm:$0xf0] }
  0x85   : > { %v2430_v51 = vld [vmem:[%s3010_s11 + $0xc3] ss:$8 sm:$0xf]  ;;  %4790 = vst [vmem:[#allocation29_spill] sm:$0xff] %v3227_v42  ;;  %v420_v54 = vor.u32 %v2427_v47, %v2426_v8  ;;  %v424_v55 = vor.u32 %v2429_v50, %v2428_v18  ;;  %v384_v40 = vmax.f32 %v383_v43, %v3219_v17  ;;  %v316_v47 = vadd.f32 %v315_v48, %v310_v15 }
  0x86   : > { %v2431_v37 = vld [vmem:[%s3010_s11 + $0xc3] ss:$8 sm:$0xf0]  ;;  %v2432_v63 = vld [vmem:[%s3010_s11 + $0xc5] ss:$8 sm:$0xf]  ;;  %v3253_v18 = vadd.f32 %v338_v49, %v333_v53  ;;  %v355_v50 = vmul.f32 %v354_v59, %v305_v38  ;;  %v350_v48 = vadd.f32 %v349_v6, %v344_v5  ;;  %v515_v43 = vcombine.low %v506_v61, %v513_v0 }
  0x87   : > { %v3237_v56 = vor.u32 %v2431_v37, %v2430_v51  ;;  %v2433_v57 = vld [vmem:[%s3010_s11 + $0xc5] ss:$8 sm:$0xf0]  ;;  %v2435_v1 = vld [vmem:[%s3010_s11 + $0xc6] ss:$8 sm:$0xf]  ;;  %v3256_v9 = vmax.f32 %v384_v40, %v3227_v42  ;;  %v3281_v37 = vadd.f32 %v321_v4, %v316_v47 }
  0x88   : > { %v3241_v60 = vor.u32 %v2433_v57, %v2432_v63  ;;  %v2436_v2 = vld [vmem:[%s3010_s11 + $0xc6] ss:$8 sm:$0xf0]  ;;  %v2437_v8 = vld [vmem:[%s3010_s11 + $0x100] ss:$8 sm:$0xf]  ;;  %v3302_v6 = vadd.f32 %v355_v50, %v350_v48  ;;  %v3316_v50 = vrot.slane %v515_v43, %v3180_v52 }
  0x89   : > { %v2438_v41 = vld [vmem:[%s3010_s11 + $0x100] ss:$8 sm:$0xf0]  ;;  %4792 = vst [vmem:[#allocation31_spill] sm:$0xff] %v3256_v9  ;;  %v3259_v10 = vsub.f32 %v3237_v56, %v420_v54  ;;  %v3264_v13 = vor.u32 %v2436_v2, %v2435_v1  ;;  %v386_v11 = vsub.f32 %v3171_v44, %v3256_v9  ;;  %v389_v38 = vsub.f32 %v3186_v58, %v3256_v9 }
  0x8a   : > { %v3262_v16 = vsub.f32 %v3241_v60, %v424_v55  ;;  %v3266_v14 = vor.u32 %v2438_v41, %v2437_v8  ;;  %v392_v12 = vsub.f32 %v3192_v62, %v3256_v9  ;;  %v395_v15 = vsub.f32 %v3198_v3, %v3256_v9  ;;  %v2441_v1 = vld [vmem:[%s3010_s11 + $0x142] ss:$8 sm:$0xf]  ;;  %v2443_v4 = vld [vmem:[%s3010_s11 + $0x106] ss:$8 sm:$0xf] }
  0x8b   : > { %4793 = vst [vmem:[#allocation32_spill] sm:$0xff] %v3259_v10  ;;  %v398_v49 = vsub.f32 %v3219_v17, %v3256_v9  ;;  %v401_v45 = vsub.f32 %v3227_v42, %v3256_v9  ;;  %v387_v51 = vmul.f32 1.442695, %v386_v11  ;;  %v390_v53 = vmul.f32 1.442695, %v389_v38 }
  0x8c   : > { %4794 = vst [vmem:[#allocation33_spill] sm:$0xff] %v3262_v16  ;;  %v393_v59 = vmul.f32 1.442695, %v392_v12  ;;  %v396_v63 = vmul.f32 1.442695, %v395_v15  ;;  %v3285_v57 = vmul.f32 %v3259_v10, %v3259_v10  ;;  %v3289_v40 = vsub.f32 %v3264_v13, %v3237_v56 }
  0x8d   : > { %v2442_v2 = vld [vmem:[%s3010_s11 + $0x142] ss:$8 sm:$0xf0]  ;;  %2626 = vpow2.f32 %v387_v51  ;;  %v399_v5 = vmul.f32 1.442695, %v398_v49  ;;  %v3295_v61 = vmul.f32 %v3262_v16, %v3262_v16  ;;  %v3299_v0 = vsub.f32 %v3266_v14, %v3241_v60 }
  0x8e   : > { %2628 = vpow2.f32 %v390_v53  ;;  %v402_v8 = vmul.f32 1.442695, %v401_v45  ;;  %v3305_v41 = vrot.slane %v514_v7, %v3180_v52  ;;  %v2444_v47 = vld [vmem:[%s3010_s11 + $0x106] ss:$8 sm:$0xf0]  ;;  %v3309_v11 = vsub.f32 %v3281_v37, %v420_v54 }
  0x8f   : > { %2630 = vpow2.f32 %v393_v59  ;;  %v3313_v38 = vadd.f32 %v3295_v61, %v3285_v57  ;;  %v2445_v12 = vld [vmem:[%s3010_s11 + $0x104] ss:$8 sm:$0xf]  ;;  %v3321_v7 = vsub.f32 %v3302_v6, %v424_v55  ;;  %v3325_v54 = vmul.f32 %v3289_v40, %v3289_v40  ;;  %v2447_v49 = vld [vmem:[%s3010_s11 + $0x105] ss:$8 sm:$0xf] }
  0x90   : > { %4795 = vst [vmem:[#allocation34_spill] sm:$0xff] %v3309_v11  ;;  %v2446_v15 = vld [vmem:[%s3010_s11 + $0x104] ss:$8 sm:$0xf0]  ;;  %2632 = vpow2.f32 %v396_v63  ;;  %v3329_v48 = vmul.f32 %v3299_v0, %v3299_v0  ;;  %v3335_v51 = vsub.f32 %v3281_v37, %v3237_v56  ;;  %v780_v55 = vor.u32 %v2442_v2, %v2441_v1 }
  0x91   : > { %4796 = vst [vmem:[#allocation35_spill] sm:$0xff] %v3321_v7  ;;  %v2448_v45 = vld [vmem:[%s3010_s11 + $0x105] ss:$8 sm:$0xf0]  ;;  %2634 = vpow2.f32 %v399_v5  ;;  %v785_v53 = vor.u32 %v2444_v47, %v2443_v4  ;;  %v3342_v28 = vsub.f32 %v3302_v6, %v3241_v60  ;;  %v791_v36 = vor.u32 %v2446_v15, %v2445_v12 }
  0x92   : > { %v2450_v59 = vld [vmem:[%s3010_s11 + $0x47] ss:$8 sm:$0xf]  ;;  %v2452_v63 = vld [vmem:[%s3010_s11 + $0x82] ss:$8 sm:$0xf]  ;;  %2636 = vpow2.f32 %v402_v8  ;;  %v3346_v5 = vadd.f32 %v3329_v48, %v3325_v54  ;;  %v3353_v2 = vsub.f32 %v3281_v37, %v780_v55  ;;  %v3358_v60 = vmul.f32 %v3309_v11, %v3262_v16 }
  0x93   : > { %v2451_v43 = vld [vmem:[%s3010_s11 + $0x47] ss:$8 sm:$0xf0]  ;;  %v2453_v56 = vld [vmem:[%s3010_s11 + $0x82] ss:$8 sm:$0xf0]  ;;  %2638 = vrsqrt.f32 %v3313_v38  ;;  %v3362_v47 = vmul.f32 %v3321_v7, %v3259_v10  ;;  %v3366_v12 = vmul.f32 %v3309_v11, %v3259_v10  ;;  %v795_v26 = vor.u32 %v2448_v45, %v2447_v49 }
  0x94   : > { %v2454_v46 = vld [vmem:[%s3010_s11 + $0x85] ss:$8 sm:$0xf]  ;;  %v786_v4 = vmul.f32 0.5, %v785_v53  ;;  %2640 = vrsqrt.f32 %v3346_v5  ;;  %vm446_vm8 = vcmp.eq.f32.partialorder %v3313_v38, inf  ;;  %v796_v27 = vmul.f32 0.5, %v791_v36 }
  0x95   : > { %v2455_v8 = vld [vmem:[%s3010_s11 + $0x85] ss:$8 sm:$0xf0]  ;;  %v2456_v15 = vld [vmem:[%s3010_s11 + $0x80] ss:$8 sm:$0xf]  ;;  %v936_v25 = vor.u32 %v2451_v43, %v2450_v59  ;;  %v941_v9 = vor.u32 %v2453_v56, %v2452_v63  ;;  %v3385_v59 = vmul.f32 %v3321_v7, %v3262_v16 }
  0x96   : > { %v2457_v55 = vld [vmem:[%s3010_s11 + $0x80] ss:$8 sm:$0xf0]  ;;  %v787_v1 = vsub.f32 %v3302_v6, %v786_v4  ;;  %vm448_vm9 = vcmp.eq.f32.partialorder %v3313_v38, 0.0  ;;  %vm652_vm10 = vcmp.eq.f32.partialorder %v3346_v5, inf  ;;  %v947_v42 = vor.u32 %v2455_v8, %v2454_v46 }
  0x97   : > { %v4701_v24 = vand.u32 2147483647, %v3353_v2  ;;  %v2458_v17 = vld [vmem:[%s3010_s11 + $0x83] ss:$8 sm:$0xf]  ;;  %v2627_v62 = vpop.eup %2626  ;;  %vm654_vm11 = vcmp.eq.f32.partialorder %v3346_v5, 0.0  ;;  %v953_v45 = vor.u32 %v2457_v55, %v2456_v15  ;;  %v937_v43 = vmul.f32 %v936_v25, %v3281_v37 }
  0x98   : > { %v2459_v3 = vld [vmem:[%s3010_s11 + $0x83] ss:$8 sm:$0xf0]  ;;  %v797_v53 = vmul.f32 0.5, %v795_v26  ;;  %v798_v49 = vmax.f32 %v796_v27, 1e-06  ;;  %v3381_v44 = vpop.eup %2628  ;;  %v942_v63 = vmul.f32 %v941_v9, %v3253_v18  ;;  %v948_v25 = vmul.f32 %v947_v42, %v3302_v6 }
  0x99   : > { %v804_v36 = vand.u32 2147483647, %v787_v1  ;;  %v2460_v58 = vld [vmem:[%s3010_s11 + $0x86] ss:$8 sm:$0xf]  ;;  %v811_v46 = vsub.f32 %v4701_v24, %v796_v27  ;;  %v3393_v8 = vpop.eup %2630  ;;  %v404_v1 = vadd.f32 %v3381_v44, %v2627_v62  ;;  %v954_v9 = vmul.f32 %v953_v45, %v3281_v37 }
  0x9a   : > { %v2461_v26 = vld [vmem:[%s3010_s11 + $0x86] ss:$8 sm:$0xf0]  ;;  %v2462_v56 = vld [vmem:[%s3010_s11 + $0x81] ss:$8 sm:$0xf]  ;;  %2642 = vrcp.f32 %v798_v49  ;;  %v3399_v20 = vpop.eup %2632  ;;  %v958_v16 = vor.u32 %v2459_v3, %v2458_v17 }
  0x9b   : > { %v800_v15 = vmax.f32 %v797_v53, 1e-06  ;;  %v4797_v55 = vand.u32 2147483647, %v3253_v18  ;;  %v812_v27 = vmax.f32 %v811_v46, 0.0  ;;  %v815_v24 = vsub.f32 %v804_v36, %v786_v4  ;;  %v3404_v11 = vpop.eup %2634 }
  0x9c   : > { %v2463_v23 = vld [vmem:[%s3010_s11 + $0x81] ss:$8 sm:$0xf0]  ;;  %v2464_v7 = vld [vmem:[%s3010_s11 + $0x84] ss:$8 sm:$0xf]  ;;  %v405_v62 = vadd.f32 %v3393_v8, %v404_v1  ;;  %v943_v4 = vadd.f32 %v942_v63, %v937_v43  ;;  %v964_v36 = vor.u32 %v2461_v26, %v2460_v58  ;;  %v959_v35 = vmul.f32 %v958_v16, %v3253_v18 }
  0x9d   : > { %v813_v22 = vsub.f32 %v4797_v55, %v797_v53  ;;  %2644 = vrcp.f32 %v800_v15  ;;  %v2465_v53 = vld [vmem:[%s3010_s11 + $0x84] ss:$8 sm:$0xf0]  ;;  %v3408_v55 = vpop.eup %2636  ;;  %v816_v10 = vmax.f32 %v815_v24, 0.0  ;;  %v817_v46 = vmul.f32 %v812_v27, %v812_v27 }
  0x9e   : > { %v2639_v42 = vpop.eup %2638  ;;  %v406_v45 = vadd.f32 %v3399_v20, %v405_v62  ;;  %v970_v39 = vor.u32 %v2463_v23, %v2462_v56  ;;  %v2466_v1 = vld [vmem:[%s3010_s11 + $0x87] ss:$8 sm:$0xf]  ;;  %v965_v24 = vmul.f32 %v964_v36, %v3302_v6  ;;  %v975_v43 = vor.u32 %v2465_v53, %v2464_v7  ;;  %v2468_v62 = vld [vmem:[%s3010_s11 + $0x141] ss:$8 sm:$0xf] }
  0x9f   : > { %v814_v49 = vmax.f32 %v813_v22, 0.0  ;;  %v2467_v15 = vld [vmem:[%s3010_s11 + $0x87] ss:$8 sm:$0xf0]  ;;  %v2641_v22 = vpop.eup %2640  ;;  %v445_v3 = vmul.f32 %v2639_v42, %v3313_v38  ;;  %v820_v17 = vmul.f32 %v816_v10, %v816_v10  ;;  %v960_v23 = vadd.f32 %v959_v35, %v954_v9 }
  0xa0   : > { %v407_v58 = vadd.f32 %v3404_v11, %v406_v45  ;;  %v651_v63 = vmul.f32 %v2641_v22, %v3346_v5  ;;  %v971_v56 = vmul.f32 %v970_v39, %v3281_v37  ;;  %v976_v10 = vmul.f32 %v975_v43, %v3253_v18  ;;  %v2469_v7 = vld [vmem:[%s3010_s11 + $0x141] ss:$8 sm:$0xf0]  ;;  %v2472_v36 = vld [vmem:[%s3010_s11 + $0x140] ss:$8 sm:$0xf] }
  0xa1   : > { %v818_v52 = vmul.f32 %v814_v49, %v814_v49  ;;  %v447_v26 = vsel %vm446_vm8, %v3313_v38, %v445_v3  ;;  %v981_v27 = vor.u32 %v2467_v15, %v2466_v1  ;;  %v2470_v49 = vld [vmem:[%s3010_s11 + $0x107] ss:$8 sm:$0xf]  ;;  %v4798_v35 = vand.u32 2147483648, %v3313_v38 }
  0xa2   : > { %v3427_v53 = vadd.f32 %v3408_v55, %v407_v58  ;;  %v653_v39 = vsel %vm652_vm10, %v3346_v5, %v651_v63  ;;  %v644_v45 = vmul.f32 %v3342_v28, %v3289_v40  ;;  %v4799_v1 = vand.u32 2147483648, %v3346_v5  ;;  %v2473_v15 = vld [vmem:[%s3010_s11 + $0x140] ss:$8 sm:$0xf0] }
  0xa3   : > { %v819_v16 = vadd.f32 %v818_v52, %v817_v46  ;;  %v439_v52 = vsub.f32 %v3358_v60, %v3362_v47  ;;  %v450_v9 = vsel %vm448_vm9, %v4798_v35, %v447_v26  ;;  %v2471_v46 = vld [vmem:[%s3010_s11 + $0x107] ss:$8 sm:$0xf0]  ;;  %v977_v47 = vadd.f32 %v976_v10, %v971_v56 }
  0xa4   : > { %v451_v42 = vmax.f32 %v450_v9, 1e-06  ;;  %v656_v60 = vsel %vm654_vm11, %v4799_v1, %v653_v39  ;;  %v2643_v22 = vpop.eup %2642  ;;  %2646 = vrcp.f32 %v3427_v53  ;;  %v643_v38 = vmul.f32 %v3335_v51, %v3299_v0  ;;  %v2478_v1 = vld [vmem:[%s3010_s11 + $0xc4] ss:$8 sm:$0xf0] }
  0xa5   : > { %v657_v3 = vmax.f32 %v656_v60, 1e-06  ;;  %v3450_v43 = vadd.f32 %v820_v17, %v819_v16  ;;  %v4800_v58 = vand.u32 2147483647, %v3353_v2  ;;  %v3454_v26 = vadd.f32 %v948_v25, %v943_v4 }
  0xa6   : > { %v3456_v35 = vadd.f32 %v965_v24, %v960_v23  ;;  %v982_v5 = vmul.f32 %v981_v27, %v3302_v6  ;;  %2648 = vrcp.f32 %v451_v42  ;;  %v987_v10 = vor.u32 %v2469_v7, %v2468_v62  ;;  %v2477_v42 = vld [vmem:[%s3010_s11 + $0xc4] ss:$8 sm:$0xf]  ;;  %v2480_v60 = vld [vmem:[%s3010_s11 + $0xc7] ss:$8 sm:$0xf] }
  0xa7   : > { %v805_v63 = vmul.f32 %v2643_v22, %v4800_v58  ;;  %v2645_v56 = vpop.eup %2644  ;;  %v993_v9 = vor.u32 %v2471_v46, %v2470_v49  ;;  %v997_v39 = vor.u32 %v2473_v15, %v2472_v36  ;;  %2650 = vrcp.f32 %v657_v3  ;;  %v2475_v46 = vld [vmem:[%s3010_s11 + $0xc1] ss:$8 sm:$0xf] }
  0xa8   : > { %v660_v2 = vmul.f32 %v3335_v51, %v3289_v40  ;;  %v4801_v25 = vand.u32 2147483647, %v3253_v18  ;;  %v983_v17 = vadd.f32 %v982_v5, %v977_v47  ;;  %2652 = vrsqrt.f32 %v3450_v43  ;;  %v2476_v36 = vld [vmem:[%s3010_s11 + $0xc1] ss:$8 sm:$0xf0] }
  0xa9   : > { %v988_v24 = vmul.f32 0.5, %v987_v10  ;;  %v998_v16 = vmul.f32 0.5, %v993_v9  ;;  %v999_v23 = vmul.f32 0.5, %v997_v39  ;;  %v806_v27 = vsub.f32 1.0, %v805_v63 }
  0xaa   : > { %v807_v4 = vmul.f32 %v2645_v56, %v4801_v25  ;;  %v1006_v7 = vand.u32 2147483647, %v3454_v26  ;;  %v4713_v49 = vand.u32 2147483647, %v3456_v35  ;;  %v661_v47 = vmul.f32 %v3342_v28, %v3299_v0 }
  0xab   : > { %v3473_v15 = vadd.f32 %v988_v24, %v983_v17  ;;  %v1000_v22 = vmax.f32 %v998_v16, 1e-06  ;;  %v1002_v3 = vmax.f32 %v999_v23, 1e-06  ;;  %v3477_v58 = vcombine.low %v3305_v41, %v3316_v50 }
  0xac   : > { %v808_v62 = vsub.f32 1.0, %v807_v4  ;;  %v3480_v63 = vsub.s32 1, %v3027_v19  ;;  %v645_v5 = vsub.f32 %v643_v38, %v644_v45  ;;  %v1004_v56 = vmax.f32 %v988_v24, 1e-06 }
  0xad   : > { %v2481_v10 = vld [vmem:[%s3010_s11 + $0xc7] ss:$8 sm:$0xf0]  ;;  %v456_v9 = vadd.f32 %v3385_v59, %v3366_v12  ;;  %2654 = vrcp.f32 %v1000_v22  ;;  %v4712_v39 = vand.u32 2147483647, %v3473_v15  ;;  %v1018_v25 = vsub.f32 %v1006_v7, %v998_v16 }
  0xae   : > { %4802 = vst [vmem:[#allocation36_spill] sm:$0xff] %v3480_v63  ;;  %v440_v4 = vand.u32 2147483647, %v439_v52  ;;  %v3488_v17 = vmin.f32 %v806_v27, %v808_v62  ;;  %2656 = vrcp.f32 %v1002_v3  ;;  %v1020_v41 = vsub.f32 %v4713_v49, %v999_v23  ;;  %v3492_v50 = vpop.eup %2646 }
  0xaf   : > { %v662_v45 = vadd.f32 %v661_v47, %v660_v2  ;;  %v3494_v38 = vor.u32 %v2476_v36, %v2475_v46  ;;  %v3496_v19 = vor.u32 %v2478_v1, %v2477_v42  ;;  %v3498_v12 = vor.u32 %v2481_v10, %v2480_v60 }
  0xb0   : > { %v412_v59 = vmul.f32 %v3492_v50, %v3399_v20  ;;  %v646_v16 = vand.u32 2147483647, %v645_v5  ;;  %2658 = vrcp.f32 %v1004_v56  ;;  %v2649_v52 = vpop.eup %2648  ;;  %v1019_v23 = vmax.f32 %v1018_v25, 0.0 }
  0xb1   : > { %2660 = vlog2.f32 %v3427_v53  ;;  %v1022_v2 = vsub.f32 %v4712_v39, %v988_v24  ;;  %v2651_v27 = vpop.eup %2650  ;;  %v457_v62 = vmul.f32 %v2649_v52, %v456_v9  ;;  %v827_v36 = vand.u32 2147483648, %v3450_v43 }
  0xb2   : > { %v1021_v20 = vmax.f32 %v1020_v41, 0.0  ;;  %v2653_v42 = vpop.eup %2652  ;;  %v663_v1 = vmul.f32 %v2651_v27, %v662_v45  ;;  %vm770_vm14 = vcmp.gt.f32.partialorder %v412_v59, 0.3  ;;  %v3511_v60 = vsub.f32 %v3496_v19, %v3494_v38 }
  0xb3   : > { %v3515_v53 = vsub.f32 %v3498_v12, %v3496_v19  ;;  %v410_v24 = vmul.f32 %v3492_v50, %v3381_v44  ;;  %v411_v47 = vmul.f32 %v3492_v50, %v3393_v8  ;;  %v413_v22 = vmul.f32 %v3492_v50, %v3404_v11 }
  0xb4   : > { %v458_v3 = vmul.f32 %v2649_v52, %v457_v62  ;;  %v664_v5 = vmul.f32 %v2651_v27, %v663_v1  ;;  %v823_v56 = vmul.f32 %v2653_v42, %v3450_v43  ;;  %v1023_v10 = vmax.f32 %v1022_v2, 0.0 }
  0xb5   : > { %v1024_v9 = vmul.f32 %v1019_v23, %v1019_v23  ;;  %v3524_v25 = vmul.f32 %v2649_v52, %v440_v4  ;;  %v4803_v45 = vmov 0.0   ;;  %v1025_v39 = vmul.f32 %v1021_v20, %v1021_v20 }
  0xb6   : > { %v462_v41 = vsub.f32 0.2, %v458_v3  ;;  %v2440_v46 = vsel %vm770_vm14, 1.0, %v4803_v45  ;;  %vm465_vm15 = vcmp.ge.f32.partialorder %v458_v3, 0.8  ;;  %vm466_vm8 = vcmp.le.f32.partialorder %v458_v3, 1.0 }
  0xb7   : > { %v2655_v49 = vpop.eup %2654  ;;  %v2434_v44 = vadd.f32 -0.8, %v458_v3  ;;  %vm665_vm9 = vcmp.ge.f32.partialorder %v664_v5, 0.0  ;;  %vm459_vm10 = vcmp.ge.f32.partialorder %v458_v3, 0.0  ;;  %vm460_vm11 = vcmp.le.f32.partialorder %v458_v3, 0.2  ;;  %vm3536_vm14 = vmand %vm465_vm15, %vm466_vm8 }
  0xb8   : > { %v2657_v8 = vpop.eup %2656  ;;  %v463_v11 = vmul.f32 %v462_v41, %v462_v41  ;;  %vm666_vm13 = vcmp.le.f32.partialorder %v664_v5, 1.0  ;;  %vm4804_vm6 = vcmp.eq.f32.partialorder %v3450_v43, inf  ;;  %v1009_v52 = vmul.f32 %v2655_v49, %v1006_v7 }
  0xb9   : > { %v469_v62 = vmul.f32 %v2434_v44, %v2434_v44  ;;  %vm667_vm12 = vmand %vm665_vm9, %vm666_vm13  ;;  %v825_v4 = vsel %vm4804_vm6, %v3450_v43, %v823_v56  ;;  %v4805_v23 = vand.u32 2147483647, %v3456_v35  ;;  %v3540_v5 = vmul.f32 %v2651_v27, %v646_v16 }
  0xba   : > { %v2659_v20 = vpop.eup %2658  ;;  %v464_v42 = vmul.f32 25.0, %v463_v11  ;;  %v2439_v41 = vsel %vm667_vm12, 1.0, %v4803_v45  ;;  %v773_v44 = vmul.f32 %v2440_v46, %v412_v59  ;;  %vm461_vm6 = vmand %vm459_vm10, %vm460_vm11  ;;  %vm4808_vm13 = vcmp.eq.f32.partialorder %v3450_v43, 0.0 }
  0xbb   : > { %v1011_v2 = vmul.f32 %v2657_v8, %v4805_v23  ;;  %v2661_v56 = vpop.eup %2660  ;;  %v470_v26 = vmul.f32 25.0, %v469_v62  ;;  %v670_v35 = vmul.f32 %v2439_v41, %v411_v47  ;;  %v3547_v7 = vsel %vm4808_vm13, %v827_v36, %v825_v4  ;;  %v2484_v23 = vld [vmem:[%s3010_s11 + $0x101] ss:$8 sm:$0xf0] }
  0xbc   : > { %v1026_v49 = vadd.f32 %v1025_v39, %v1024_v9  ;;  %v541_v8 = vrot.slane %v3524_v25, %v3480_v63  ;;  %v829_v16 = vmul.f32 2.0, %v3547_v7  ;;  %v3553_v59 = vmul.f32 %v3477_v58, %v413_v22 }
  0xbd   : > { %v1010_v27 = vsub.f32 1.0, %v1009_v52  ;;  %v471_v46 = vsel %vm3536_vm14, %v470_v26, 0.0  ;;  %v1012_v47 = vsub.f32 1.0, %v1011_v2  ;;  %v4810_v43 = vand.u32 2147483647, %v3473_v15 }
  0xbe   : > { %4809 = vst [vmem:[#allocation37_spill] sm:$0xff] %v3553_v59  ;;  %v1027_v39 = vmul.f32 %v1023_v10, %v1023_v10  ;;  %v472_v3 = vsel %vm461_vm6, %v464_v42, %v471_v46  ;;  %v3560_v9 = vmul.f32 %v670_v35, %v3477_v58  ;;  %v680_v11 = vrot.slane %v3540_v5, %v3480_v63  ;;  %v2483_v10 = vld [vmem:[%s3010_s11 + $0x101] ss:$8 sm:$0xf] }
  0xbf   : > { %v1013_v36 = vmul.f32 %v2659_v20, %v4810_v43  ;;  %v3565_v22 = vmul.f32 %v773_v44, %v3477_v58  ;;  %v414_v62 = vmul.f32 %v3492_v50, %v3408_v55  ;;  %v473_v4 = vmul.f32 %v472_v3, %v410_v24  ;;  %v2485_v2 = vld [vmem:[%s3010_s11 + $0x102] ss:$8 sm:$0xf] }
  0xc0   : > { %v3569_v52 = vadd.f32 %v1027_v39, %v1026_v49  ;;  %v3573_v15 = vsub.f32 %v3253_v18, %v3494_v38  ;;  %v3578_v20 = vmul.f32 0.6931472, %v2661_v56  ;;  %v4813_v42 = vmax.f32 %v3488_v17, 0.0  ;;  %v2486_v24 = vld [vmem:[%s3010_s11 + $0x102] ss:$8 sm:$0xf0] }
  0xc1   : > { %4811 = vst [vmem:[#allocation38_spill] sm:$0xff] %v3565_v22  ;;  %v1149_v55 = vmul.f32 %v3511_v60, %v3511_v60  ;;  %v1217_v50 = vmul.f32 %v3515_v53, %v3515_v53  ;;  %v3591_v38 = vrot.slane %v3553_v59, %v3480_v63  ;;  %v1014_v41 = vsub.f32 1.0, %v1013_v36  ;;  %v2487_v56 = vld [vmem:[%s3010_s11 + $0x103] ss:$8 sm:$0xf] }
  0xc2   : > { %4812 = vst [vmem:[#allocation39_spill] sm:$0xff] %v3578_v20  ;;  %v3582_v1 = vadd.f32 %v829_v16, %v4813_v42  ;;  %v1015_v44 = vmin.f32 %v1010_v27, %v1012_v47  ;;  %2662 = vrsqrt.f32 %v3569_v52  ;;  %v575_v17 = vsel %vm3033_vm1, %v541_v8, 0.0  ;;  %v2488_v16 = vld [vmem:[%s3010_s11 + $0x103] ss:$8 sm:$0xf0] }
  0xc3   : > { %v714_v26 = vsel %vm3033_vm1, %v680_v11, 0.0  ;;  %v3601_v35 = vrot.slane %v3560_v9, %v3480_v63  ;;  %v3605_v49 = vmul.f32 %v3565_v22, %v3281_v37  ;;  %v3609_v27 = vmul.f32 %v3477_v58, %v473_v4 }
  0xc4   : > { %v3613_v46 = vmul.f32 %v3565_v22, %v3302_v6  ;;  %vm930_vm12 = vcmp.lt.f32.partialorder %v3547_v7, 0.1  ;;  %v1150_v8 = vadd.f32 %v1149_v55, %v3285_v57  ;;  %v840_v47 = vrot.slane %v3582_v1, %v3480_v63 }
  0xc5   : > { %4814 = vst [vmem:[#allocation40_spill] sm:$0xff] %v3605_v49  ;;  %v1218_v43 = vadd.f32 %v1217_v50, %v3325_v54  ;;  %v1283_v36 = vor.u32 %v2484_v23, %v2483_v10  ;;  %v1287_v39 = vor.u32 %v2486_v24, %v2485_v2  ;;  %v1016_v3 = vmin.f32 %v1015_v44, %v1014_v41 }
  0xc6   : > { %4815 = vst [vmem:[#allocation41_spill] sm:$0xff] %v3613_v46  ;;  %v3621_v11 = vmul.f32 %v3477_v58, %v414_v62  ;;  %v3624_v4 = vadd.f32 %v1150_v8, %v3295_v61  ;;  %v1291_v42 = vor.u32 %v2488_v16, %v2487_v56  ;;  %v763_v20 = vmul.f32 %v3601_v35, %v714_v26  ;;  %v4817_v8 = vld [vmem:[#allocation30_spill] sm:$0xff] }
  0xc7   : > { %v3628_v59 = vadd.f32 %v1218_v43, %v3329_v48  ;;  %v3631_v57 = vsub.f32 %v1283_v36, %v3264_v13  ;;  %v3634_v54 = vsub.f32 %v1287_v39, %v3498_v12  ;;  %v590_v10 = vrot.slane %v3609_v27, %v3480_v63  ;;  %v4819_v36 = vld [vmem:[#allocation24_spill] sm:$0xff] }
  0xc8   : > { %4816 = vst [vmem:[#allocation42_spill] sm:$0xff] %v3621_v11  ;;  %vm1031_vm15 = vcmp.eq.f32.partialorder %v3569_v52, inf  ;;  %v1152_v61 = vmax.f32 %v3624_v4, 1e-12  ;;  %v3641_v58 = vsub.f32 %v1291_v42, %v3266_v14  ;;  %v874_v48 = vsel %vm3033_vm1, %v840_v47, 0.0  ;;  %v4818_v47 = vld [vmem:[#allocation22_spill] sm:$0xff] }
  0xc9   : > { %v4718_v62 = vmax.f32 %v3628_v59, 1e-12  ;;  %v1295_v23 = vmul.f32 %v3631_v57, %v3631_v57  ;;  %v1296_v2 = vmul.f32 %v3634_v54, %v3634_v54  ;;  %vm1033_vm8 = vcmp.eq.f32.partialorder %v3569_v52, 0.0  ;;  %v4827_v4 = vld [vmem:[#allocation35_spill] sm:$0xff] }
  0xca   : > { %2664 = vrsqrt.f32 %v1152_v61  ;;  %v1298_v55 = vmul.f32 %v3641_v58, %v3641_v58  ;;  %v1393_v50 = vcombine.low %v3064_v29, %v3069_v30  ;;  %v1394_v41 = vcombine.low %v3074_v31, %v3079_v32 }
  0xcb   : > { %2666 = vrsqrt.f32 %v4718_v62  ;;  %v1297_v24 = vadd.f32 %v1296_v2, %v1295_v23  ;;  %v1395_v44 = vcombine.low %v3084_v33, %v3089_v34  ;;  %v624_v26 = vmul.f32 %v590_v10, %v575_v17 }
  0xcc   : > { %v2663_v56 = vpop.eup %2662  ;;  %v1034_v16 = vand.u32 2147483648, %v3569_v52  ;;  %v1396_v43 = vcombine.low %v4818_v47, %v4817_v8  ;;  %v1403_v39 = vrot.slane %v1393_v50, %v4819_v36  ;;  %v1410_v42 = vrot.slane %v1394_v41, %v4819_v36 }
  0xcd   : > { %v1030_v29 = vmul.f32 %v2663_v56, %v3569_v52  ;;  %v3668_v30 = vadd.f32 %v1298_v55, %v1297_v24  ;;  %v1417_v31 = vrot.slane %v1395_v44, %v4819_v36  ;;  %v3675_v32 = vsel %vm930_vm12, 1.0, %v4803_v45 }
  0xce   : > { %v1017_v33 = vmax.f32 %v1016_v3, 0.0  ;;  %v1424_v34 = vrot.slane %v1396_v43, %v4819_v36  ;;  %v1456_v17 = vrot.slane %v763_v20, 6  ;;  %v923_v23 = vmul.f32 %v3591_v38, %v874_v48 }
  0xcf   : > { %v1032_v2 = vsel %vm1031_vm15, %v3569_v52, %v1030_v29  ;;  %v4719_v55 = vmax.f32 %v3668_v30, 1e-12  ;;  %vm4746_vm9 = vcmask 1040384   ;;  %v1425_v24 = vcombine.low %v1403_v39, %v1410_v42 }
  0xd0   : > { %v1035_v50 = vsel %vm1033_vm8, %v1034_v16, %v1032_v2  ;;  %v1726_v7 = vsel %vm4746_vm9, %v624_v26, %v590_v10  ;;  %vm4745_vm10 = vcmask 1041408   ;;  %v3688_v20 = vrot.slane %v3621_v11, %v3480_v63 }
  0xd1   : > { %v1036_v3 = vmul.f32 2.0, %v1035_v50  ;;  %vm1137_vm11 = vcmp.lt.f32.partialorder %v1035_v50, 0.1  ;;  %v1426_v48 = vcombine.low %v1417_v31, %v1424_v34  ;;  %v3693_v44 = vsub.f32 %v3253_v18, %v3496_v19 }
  0xd2   : > { %v2474_v41 = vsel %vm1137_vm11, 1.0, %v4803_v45  ;;  %2668 = vrsqrt.f32 %v4719_v55  ;;  %v1735_v52 = vsel %vm4745_vm10, %v1726_v7, %v1456_v17  ;;  %v3702_v56 = vsub.f32 %v3281_v37, %v3264_v13  ;;  %v4822_v13 = vld [vmem:[#allocation32_spill] sm:$0xff] }
  0xd3   : > { %v3698_v10 = vadd.f32 %v1036_v3, %v1017_v33  ;;  %v3706_v26 = vsub.f32 %v3253_v18, %v3498_v12  ;;  %vm4744_vm14 = vcmask 1042432   ;;  %v3710_v19 = vsub.f32 %v3302_v6, %v3266_v14  ;;  %v4824_v6 = vld [vmem:[#allocation33_spill] sm:$0xff] }
  0xd4   : > { %v2665_v16 = vpop.eup %2664  ;;  %v3713_v8 = vrot.slane %v1425_v24, %v4819_v36  ;;  %v1480_v47 = vrot.slane %v923_v23, 4  ;;  %vm1366_vm6 = vcmp.gt.f32.partialorder %v2474_v41, 0.0  ;;  %v3726_v12 = vrot.slane %v1426_v48, %v4819_v36 }
  0xd5   : > { %4820 = vst [vmem:[#allocation30_spill] sm:$0xff] %v3698_v10  ;;  %v3717_v39 = vpop.eup %2666  ;;  %v3720_v37 = vmul.f32 %v2665_v16, %v4822_v13  ;;  %v3723_v18 = vmul.f32 %v2665_v16, %v3511_v60  ;;  %v1047_v14 = vrot.slane %v3698_v10, %v3480_v63  ;;  %v3731_v29 = vmul.f32 %v2665_v16, %v4824_v6 }
  0xd6   : > { %4821 = vst [vmem:[#allocation22_spill] sm:$0xff] %v3713_v8  ;;  %4823 = vst [vmem:[#allocation24_spill] sm:$0xff] %v3726_v12  ;;  %v3735_v42 = vmul.f32 %v3717_v39, %v3515_v53  ;;  %v1744_v31 = vsel %vm4744_vm14, %v1735_v52, %v3601_v35  ;;  %v3744_v36 = vmul.f32 %v3717_v39, %v3289_v40  ;;  %vm4743_vm13 = vcmask 1043456  }
  0xd7   : > { %v1158_v60 = vsub.f32 0.0, %v3723_v18  ;;  %v1160_v33 = vmul.f32 %v3723_v18, %v3723_v18  ;;  %v3748_v34 = vmul.f32 %v3717_v39, %v3299_v0  ;;  %v4825_v17 = vmov 0  }
  0xd8   : > { %v3751_v53 = vsel %vm1366_vm6, 5, %v4825_v17  ;;  %v1226_v0 = vsub.f32 0.0, %v3735_v42  ;;  %v1081_v24 = vsel %vm3033_vm1, %v1047_v14, 0.0  ;;  %v1228_v7 = vmul.f32 %v3735_v42, %v3735_v42 }
  0xd9   : > { %v3758_v2 = vmul.f32 %v1158_v60, %v3720_v37  ;;  %v3760_v50 = vsub.f32 1.0, %v1160_v33  ;;  %v3763_v40 = vmul.f32 %v1158_v60, %v3731_v29  ;;  %v1753_v48 = vsel %vm4743_vm13, %v1744_v31, %v1480_v47  ;;  %v4826_v60 = vld [vmem:[#allocation34_spill] sm:$0xff] }
  0xda   : > { %v3780_v6 = vmul.f32 %v1226_v0, %v3744_v36  ;;  %v1183_v33 = vmul.f32 %v3720_v37, %v4826_v60  ;;  %v1184_v17 = vmul.f32 %v3573_v15, %v3723_v18  ;;  %v3786_v47 = vsub.f32 1.0, %v1228_v7 }
  0xdb   : > { %v1163_v41 = vmul.f32 %v3758_v2, %v3758_v2  ;;  %v1164_v52 = vmul.f32 %v3760_v50, %v3760_v50  ;;  %v1166_v13 = vmul.f32 %v3763_v40, %v3763_v40  ;;  %v3789_v31 = vmul.f32 %v1226_v0, %v3748_v34 }
  0xdc   : > { %v2669_v14 = vpop.eup %2668  ;;  %v1231_v35 = vmul.f32 %v3780_v6, %v3780_v6  ;;  %v1251_v43 = vmul.f32 %v3744_v36, %v3335_v51  ;;  %v1252_v3 = vmul.f32 %v3693_v44, %v3735_v42  ;;  %vm1365_vm12 = vcmp.gt.f32.partialorder %v3675_v32, 0.0 }
  0xdd   : > { %v1165_v23 = vadd.f32 %v1164_v52, %v1163_v41  ;;  %v3800_v62 = vmul.f32 %v2665_v16, %v1152_v61  ;;  %v1232_v0 = vmul.f32 %v3786_v47, %v3786_v47  ;;  %v1234_v7 = vmul.f32 %v3789_v31, %v3789_v31 }
  0xde   : > { %vm4742_vm15 = vcmask 1044480   ;;  %v1130_v41 = vmul.f32 %v3688_v20, %v1081_v24  ;;  %v3808_v55 = vmul.f32 %v2669_v14, %v3631_v57  ;;  %v3811_v21 = vmul.f32 %v2669_v14, %v3634_v54 }
  0xdf   : > { %v1167_v52 = vadd.f32 %v1166_v13, %v1165_v23  ;;  %v1185_v63 = vadd.f32 %v1184_v17, %v1183_v33  ;;  %v1186_v61 = vmul.f32 %v3731_v29, %v4827_v4  ;;  %v1233_v16 = vadd.f32 %v1232_v0, %v1231_v35 }
  0xe0   : > { %v3816_v12 = vmul.f32 %v2669_v14, %v3641_v58  ;;  %v1253_v45 = vadd.f32 %v1252_v3, %v1251_v43  ;;  %v1254_v24 = vmul.f32 %v3748_v34, %v3342_v28  ;;  %v1306_v23 = vsub.f32 0.0, %v3811_v21 }
  0xe1   : > { %v1168_v8 = vmax.f32 %v1167_v52, 1e-12  ;;  %v1235_v57 = vadd.f32 %v1234_v7, %v1233_v16  ;;  %v4828_v13 = vmax.f32 %v3668_v30, 1e-12  ;;  %v1308_v33 = vmul.f32 %v3811_v21, %v3811_v21 }
  0xe2   : > { %v1333_v35 = vmul.f32 %v3702_v56, %v3808_v55  ;;  %v3828_v58 = vmul.f32 %v1306_v23, %v3808_v55  ;;  %v3831_v43 = vmul.f32 %v1306_v23, %v3816_v12  ;;  %v1334_v3 = vmul.f32 %v3706_v26, %v3811_v21 }
  0xe3   : > { %v1302_v54 = vmul.f32 %v2669_v14, %v4828_v13  ;;  %2670 = vrsqrt.f32 %v1168_v8  ;;  %v3835_v17 = vadd.f32 %v1186_v61, %v1185_v63  ;;  %v4829_v30 = vmax.f32 %v3628_v59, 1e-12 }
  0xe4   : > { %v1236_v0 = vmax.f32 %v1235_v57, 1e-12  ;;  %v3842_v7 = vsub.f32 1.0, %v1308_v33  ;;  %v3844_v8 = vadd.f32 %v1254_v24, %v1253_v45  ;;  %v1311_v52 = vmul.f32 %v3828_v58, %v3828_v58  ;;  %v4830_v24 = vld [vmem:[#allocation13_spill] sm:$0xff] }
  0xe5   : > { %v3840_v14 = vmul.f32 %v3717_v39, %v4829_v30  ;;  %v1504_v16 = vrot.slane %v1130_v41, 2  ;;  %v1762_v23 = vsel %vm4742_vm15, %v1753_v48, %v3591_v38  ;;  %v1314_v59 = vmul.f32 %v3831_v43, %v3831_v43 }
  0xe6   : > { %2672 = vrsqrt.f32 %v1236_v0  ;;  %v1312_v63 = vmul.f32 %v3842_v7, %v3842_v7  ;;  %vm4730_vm8 = vcmask 1045504   ;;  %v1335_v39 = vadd.f32 %v1334_v3, %v1333_v35  ;;  %v4833_v3 = vld [vmem:[#allocation37_spill] sm:$0xff] }
  0xe7   : > { %v1336_v45 = vmul.f32 %v3710_v19, %v3816_v12  ;;  %v3856_v61 = vadd.f32 0.3, %v1302_v54  ;;  %v3859_v57 = vsub.s32 0, %v4830_v24  ;;  %v3864_v38 = vsel %vm1365_vm12, 4, %v3751_v53 }
  0xe8   : > { %v1313_v41 = vadd.f32 %v1312_v63, %v1311_v52  ;;  %4832 = vst [vmem:[#allocation33_spill] sm:$0xff] %v3864_v38  ;;  %v1771_v48 = vsel %vm4730_vm8, %v1762_v23, %v1504_v16  ;;  %vm4729_vm11 = vcmask 1046528   ;;  %vm1199_vm6 = vcmp.ge.f32.partialorder %v3835_v17, 0.0 }
  0xe9   : > { %4831 = vst [vmem:[#allocation32_spill] sm:$0xff] %v3859_v57  ;;  %v537_v13 = vrot.slane %v3524_v25, %v3859_v57  ;;  %v3871_v33 = vrot.slane %v3609_v27, %v3859_v57  ;;  %v676_v54 = vrot.slane %v3540_v5, %v3859_v57  ;;  %v3877_v35 = vrot.slane %v3560_v9, %v3859_v57 }
  0xea   : > { %v1315_v32 = vadd.f32 %v1314_v59, %v1313_v41  ;;  %v836_v53 = vrot.slane %v3582_v1, %v3859_v57  ;;  %v3883_v30 = vrot.slane %v4833_v3, %v3859_v57  ;;  %v1043_v0 = vrot.slane %v3698_v10, %v3859_v57 }
  0xeb   : > { %vm1200_vm12 = vcmp.le.f32.partialorder %v3835_v17, %v3800_v62  ;;  %v3890_v52 = vadd.f32 %v1336_v45, %v1335_v39  ;;  %v574_v23 = vsel %vm3029_vm0, %v537_v13, 0.0  ;;  %v713_v63 = vsel %vm3029_vm0, %v676_v54, 0.0 }
  0xec   : > { %v3898_v59 = vrot.slane %v3621_v11, %v3859_v57  ;;  %v1316_v41 = vmax.f32 %v1315_v32, 1e-12  ;;  %v3902_v38 = vsel %vm4729_vm11, %v1771_v48, %v3688_v20  ;;  %v3905_v10 = vmul.f32 %v3877_v35, %v713_v63  ;;  %vm3957_vm15 = vmand %vm1199_vm6, %vm1200_vm12 }
  0xed   : > { %4835 = vst [vmem:[#allocation34_spill] sm:$0xff] %v3902_v38  ;;  %v873_v39 = vsel %vm3029_vm0, %v836_v53, 0.0  ;;  %v2671_v45 = vpop.eup %2670  ;;  %v3910_v13 = vmul.f32 %v3871_v33, %v574_v23  ;;  %v1080_v32 = vsel %vm3029_vm0, %v1043_v0, 0.0  ;;  %vm1267_vm11 = vcmp.ge.f32.partialorder %v3844_v8, 0.0 }
  0xee   : > { %v3913_v54 = vmul.f32 %v3883_v30, %v873_v39  ;;  %v1170_v48 = vmul.f32 %v2671_v45, %v3758_v2  ;;  %v1171_v63 = vmul.f32 %v2671_v45, %v3760_v50  ;;  %v1172_v38 = vmul.f32 %v2671_v45, %v3763_v40 }
  0xef   : > { %2674 = vrsqrt.f32 %v1316_v41  ;;  %vm1268_vm8 = vcmp.le.f32.partialorder %v3844_v8, %v3840_v14  ;;  %v3926_v53 = vmul.f32 %v3898_v59, %v1080_v32 }
  0xf0   : > { %v2673_v50 = vpop.eup %2672  ;;  %v1173_v40 = vmul.f32 %v1172_v38, %v3723_v18  ;;  %v1174_v41 = vmul.f32 %v1171_v63, %v3731_v29  ;;  %v1176_v39 = vmul.f32 %v1170_v48, %v3731_v29  ;;  %v1177_v45 = vmul.f32 %v1172_v38, %v3720_v37  ;;  %vm3987_vm6 = vmand %vm1267_vm11, %vm1268_vm8 }
  0xf1   : > { %v1179_v32 = vmul.f32 %v1171_v63, %v3720_v37  ;;  %v1180_v20 = vmul.f32 %v1170_v48, %v3723_v18  ;;  %v1188_v0 = vmul.f32 %v1170_v48, %v4826_v60  ;;  %v1189_v23 = vmul.f32 %v3573_v15, %v1171_v63 }
  0xf2   : > { %v1175_v16 = vsub.f32 %v1173_v40, %v1174_v41  ;;  %v1178_v46 = vsub.f32 %v1176_v39, %v1177_v45  ;;  %v1191_v2 = vmul.f32 %v1172_v38, %v4827_v4  ;;  %v1238_v57 = vmul.f32 %v2673_v50, %v3780_v6 }
  0xf3   : > { %v1181_v22 = vsub.f32 %v1179_v32, %v1180_v20  ;;  %v1190_v49 = vadd.f32 %v1189_v23, %v1188_v0  ;;  %v1239_v29 = vmul.f32 %v2673_v50, %v3786_v47  ;;  %v1240_v11 = vmul.f32 %v2673_v50, %v3789_v31 }
  0xf4   : > { %v1193_v37 = vmul.f32 %v1175_v16, %v4826_v60  ;;  %v1194_v18 = vmul.f32 %v3573_v15, %v1178_v46  ;;  %v1244_v48 = vmul.f32 %v1238_v57, %v3748_v34  ;;  %v1248_v63 = vmul.f32 %v1238_v57, %v3735_v42 }
  0xf5   : > { %v1192_v40 = vadd.f32 %v1191_v2, %v1190_v49  ;;  %v1196_v41 = vmul.f32 %v1181_v22, %v4827_v4  ;;  %v1241_v38 = vmul.f32 %v1240_v11, %v3735_v42  ;;  %v1242_v6 = vmul.f32 %v1239_v29, %v3748_v34 }
  0xf6   : > { %v1195_v20 = vadd.f32 %v1194_v18, %v1193_v37  ;;  %v1245_v15 = vmul.f32 %v1240_v11, %v3744_v36  ;;  %v1247_v49 = vmul.f32 %v1239_v29, %v3744_v36  ;;  %v1256_v22 = vmul.f32 %v1238_v57, %v3335_v51 }
  0xf7   : > { %vm1202_vm13 = vcmp.ge.f32.partialorder %v1192_v40, -0.4  ;;  %vm1203_vm14 = vcmp.le.f32.partialorder %v1192_v40, 0.4  ;;  %v1243_v46 = vsub.f32 %v1241_v38, %v1242_v6  ;;  %v1257_v42 = vmul.f32 %v3693_v44, %v1239_v29 }
  0xf8   : > { %v1197_v47 = vadd.f32 %v1196_v41, %v1195_v20  ;;  %vm3965_vm10 = vmand %vm1202_vm13, %vm1203_vm14  ;;  %v1246_v31 = vsub.f32 %v1244_v48, %v1245_v15  ;;  %v1249_v4 = vsub.f32 %v1247_v49, %v1248_v63  ;;  %v1259_v17 = vmul.f32 %v1240_v11, %v3342_v28  ;;  %v4022_v63 = vld [vmem:[%s3020_s23 + $0x1] ss:$2 sm:$0xff] }
  0xf9   : > { %v2675_v34 = vpop.eup %2674  ;;  %v1258_v36 = vadd.f32 %v1257_v42, %v1256_v22  ;;  %v1261_v57 = vmul.f32 %v1243_v46, %v3335_v51  ;;  %vm4842_vm14 = vmand %vm3957_vm15, %vm3965_vm10  ;;  %vm4843_vm11 = vcmask 1040384   ;;  %v4846_v18 = vmov 0.0  }
  0xfa   : > { %v1318_v16 = vmul.f32 %v2675_v34, %v3828_v58  ;;  %v1319_v0 = vmul.f32 %v2675_v34, %v3842_v7  ;;  %vm1205_vm12 = vcmp.ge.f32.partialorder %v1197_v47, -0.3  ;;  %vm1206_vm9 = vcmp.le.f32.partialorder %v1197_v47, 1.2 }
  0xfb   : > { %v1262_v11 = vmul.f32 %v3693_v44, %v1246_v31  ;;  %v1264_v23 = vmul.f32 %v1249_v4, %v3342_v28  ;;  %vm1207_vm7 = vmand %vm1205_vm12, %vm1206_vm9  ;;  %v1260_v58 = vadd.f32 %v1259_v17, %v1258_v36  ;;  %v1320_v7 = vmul.f32 %v2675_v34, %v3831_v43 }
  0xfc   : > { %v1322_v2 = vmul.f32 %v1319_v0, %v3816_v12  ;;  %v1324_v50 = vmul.f32 %v1318_v16, %v3816_v12  ;;  %vm1209_vm13 = vmand %vm4842_vm14, %vm1207_vm7  ;;  %v1327_v44 = vmul.f32 %v1319_v0, %v3808_v55  ;;  %v1328_v14 = vmul.f32 %v1318_v16, %v3811_v21 }
  0xfd   : > { %v1263_v28 = vadd.f32 %v1262_v11, %v1261_v57  ;;  %v1338_v8 = vmul.f32 %v3702_v56, %v1318_v16  ;;  %vm1270_vm9 = vcmp.ge.f32.partialorder %v1260_v58, -0.25  ;;  %vm1271_vm8 = vcmp.le.f32.partialorder %v1260_v58, 0.25  ;;  %v4860_v16 = vld [vmem:[#allocation30_spill] sm:$0xff] }
  0xfe   : > { %v1321_v43 = vmul.f32 %v1320_v7, %v3811_v21  ;;  %v1725_v12 = vsel %vm4843_vm11, %v3910_v13, %v3871_v33  ;;  %vm4006_vm12 = vmand %vm1270_vm9, %vm1271_vm8  ;;  %v1325_v32 = vmul.f32 %v1320_v7, %v3808_v55  ;;  %v1329_v29 = vsub.f32 %v1327_v44, %v1328_v14  ;;  %v4864_v44 = vld [vmem:[#allocation24_spill] sm:$0xff] }
  0xff   : > { %v1265_v39 = vadd.f32 %v1264_v23, %v1263_v28  ;;  %v1339_v37 = vmul.f32 %v3706_v26, %v1319_v0  ;;  %v4013_v48 = vsel %vm1209_vm13, 1.0, %v4846_v18  ;;  %vm1276_vm7 = vmand %vm3987_vm6, %vm4006_vm12  ;;  %v1341_v33 = vmul.f32 %v3710_v19, %v1320_v7  ;;  %v4863_v28 = vld [vmem:[#allocation22_spill] sm:$0xff] }
 0x100   : > { %v1323_v21 = vsub.f32 %v1321_v43, %v1322_v2  ;;  %v1479_v13 = vrot.slane %v3913_v54, 4  ;;  %v1326_v55 = vsub.f32 %v1324_v50, %v1325_v32  ;;  %v1503_v38 = vrot.slane %v3926_v53, 2  ;;  %v4862_v2 = vld [vmem:[#allocation42_spill] sm:$0xff] }
 0x101   : > { %vm1273_vm10 = vcmp.ge.f32.partialorder %v1265_v39, -0.3  ;;  %vm1274_vm15 = vcmp.le.f32.partialorder %v1265_v39, 1.0  ;;  %v1340_v40 = vadd.f32 %v1339_v37, %v1338_v8  ;;  %v4847_v6 = vrot.slane %v3905_v10, 6  ;;  %v4869_v39 = vld [vmem:[#allocation41_spill] sm:$0xff] }
 0x102   : > { %vm1275_vm14 = vmand %vm1273_vm10, %vm1274_vm15  ;;  %v1343_v41 = vmul.f32 %v3702_v56, %v1323_v21  ;;  %vm4848_vm13 = vcmask 1041408   ;;  %v4030_v60 = vsub.s32 3, %v4830_v24  ;;  %v1344_v15 = vmul.f32 %v3706_v26, %v1326_v55 }
 0x103   : > { %v1734_v20 = vsel %vm4848_vm13, %v1725_v12, %v4847_v6  ;;  %vm1277_vm6 = vmand %vm1276_vm7, %vm1275_vm14  ;;  %v1342_v54 = vadd.f32 %v1341_v33, %v1340_v40  ;;  %v1346_v49 = vmul.f32 %v3710_v19, %v1329_v29  ;;  %vm4849_vm9 = vcmask 1042432   ;;  %v4868_v12 = vld [vmem:[#allocation40_spill] sm:$0xff] }
 0x104   : > { %v1743_v22 = vsel %vm4849_vm9, %v1734_v20, %v3877_v35  ;;  %vm1372_vm8 = vcmp.eq.s32.totalorder %v4022_v63, 3  ;;  %vm1373_vm11 = vcmp.eq.s32.totalorder %v4022_v63, 5  ;;  %vm4850_vm12 = vcmask 1043456  }
 0x105   : > { %v1752_v10 = vsel %vm4850_vm12, %v1743_v22, %v1479_v13  ;;  %v549_v56 = vrot.slane %v3524_v25, %v4030_v60  ;;  %v598_v53 = vrot.slane %v3609_v27, %v4030_v60  ;;  %v4044_v46 = vsub.s32 2, %v4830_v24  ;;  %v4871_v13 = vld [vmem:[#allocation38_spill] sm:$0xff] }
 0x106   : > { %v2482_v26 = vsel %vm1277_vm6, 1.0, %v4846_v18  ;;  %v1345_v19 = vadd.f32 %v1344_v15, %v1343_v41  ;;  %vm4851_vm7 = vcmp.le.f32.partialorder %v3890_v52, %v3856_v61  ;;  %vm4852_vm10 = vcmp.ge.f32.partialorder %v3890_v52, 0.0 }
 0x107   : > { %vm4052_vm15 = vmand %vm4852_vm10, %vm4851_vm7  ;;  %vm1352_vm14 = vcmp.ge.f32.partialorder %v1342_v54, -0.75  ;;  %vm1353_vm13 = vcmp.le.f32.partialorder %v1342_v54, 0.75  ;;  %vm4857_vm6 = vcmask 1044480   ;;  %v577_v61 = vsel %vm3041_vm3, %v549_v56, 0.0 }
 0x108   : > { %vm4057_vm12 = vmand %vm1352_vm14, %vm1353_vm13  ;;  %v1761_v34 = vsel %vm4857_vm6, %v1752_v10, %v3883_v30  ;;  %v688_v52 = vrot.slane %v3540_v5, %v4030_v60  ;;  %v737_v62 = vrot.slane %v3560_v9, %v4030_v60  ;;  %v1347_v31 = vadd.f32 %v1346_v49, %v1345_v19 }
 0x109   : > { %vm4859_vm7 = vcmask 1045504   ;;  %v626_v17 = vmul.f32 %v598_v53, %v577_v61  ;;  %v848_v36 = vrot.slane %v3582_v1, %v4030_v60  ;;  %vm1358_vm10 = vmand %vm4052_vm15, %vm4057_vm12  ;;  %vm1363_vm14 = vcmp.gt.f32.partialorder %v2482_v26, 0.0 }
 0x10a   : > { %v1770_v4 = vsel %vm4859_vm7, %v1761_v34, %v1503_v38  ;;  %v716_v30 = vsel %vm3041_vm3, %v688_v52, 0.0  ;;  %v897_v57 = vrot.slane %v4833_v3, %v4030_v60  ;;  %v1055_v0 = vrot.slane %v4860_v16, %v4030_v60  ;;  %v4873_v38 = vld [vmem:[#allocation33_spill] sm:$0xff] }
 0x10b   : > { %vm1355_vm13 = vcmp.ge.f32.partialorder %v1347_v31, -0.4  ;;  %vm1356_vm6 = vcmp.le.f32.partialorder %v1347_v31, 1.5  ;;  %v765_v11 = vmul.f32 %v737_v62, %v716_v30  ;;  %v876_v23 = vsel %vm3041_vm3, %v848_v36, 0.0 }
 0x10c   : > { %vm1357_vm7 = vmand %vm1355_vm13, %vm1356_vm6  ;;  %vm4861_vm9 = vcmask 1046528   ;;  %v925_v58 = vmul.f32 %v897_v57, %v876_v23  ;;  %v1083_v7 = vsel %vm3041_vm3, %v1055_v0, 0.0  ;;  %v1104_v50 = vrot.slane %v4862_v2, %v4030_v60 }
 0x10d   : > { %v4086_v51 = vsel %vm4861_vm9, %v1770_v4, %v3898_v59  ;;  %vm1359_vm15 = vmand %vm1358_vm10, %vm1357_vm7  ;;  %v4865_v14 = vcombine.low %v4863_v28, %v4864_v44  ;;  %v1458_v43 = vrot.slane %v765_v11, 6  ;;  %v1617_v59 = vrot.slane %v4868_v12, %v4030_v60  ;;  %v4881_v11 = vld [vmem:[#allocation23_spill] sm:$0xff]  ;;  %v4885_v44 = vld [vmem:[#allocation26_spill] sm:$0xff] }
 0x10e   : > { %v1658_v45 = vrot.slane %v4869_v39, %v4030_v60  ;;  %vm4870_vm9 = vcmask 1040384   ;;  %v2489_v29 = vsel %vm1359_vm15, 1.0, %v4846_v18  ;;  %v1132_v37 = vmul.f32 %v1104_v50, %v1083_v7  ;;  %vm1374_vm7 = vmor %vm1372_vm8, %vm1373_vm11 }
 0x10f   : > { %vm4095_vm12 = vcmp.ne.s32.totalorder %v4865_v14, 0  ;;  %v1728_v32 = vsel %vm4870_vm9, %v626_v17, %v598_v53  ;;  %v1482_v21 = vrot.slane %v925_v58, 4  ;;  %v545_v33 = vrot.slane %v3524_v25, %v4044_v46 }
 0x110   : > { %vm1364_vm10 = vcmp.gt.f32.partialorder %v2489_v29, 0.0  ;;  %v1699_v55 = vrot.slane %v4871_v13, %v4030_v60  ;;  %vm4872_vm13 = vcmask 1041408   ;;  %v684_v41 = vrot.slane %v3540_v5, %v4044_v46 }
 0x111   : > { %v1737_v40 = vsel %vm4872_vm13, %v1728_v32, %v1458_v43  ;;  %v1369_v6 = vsel %vm1364_vm10, 3, %v4873_v38  ;;  %v1506_v20 = vrot.slane %v1132_v37, 2  ;;  %vm4874_vm6 = vcmask 1042432   ;;  %v277_v37 = vld [vmem:[%s3020_s23] ss:$2 sm:$0xff] }
 0x112   : > { %v1746_v54 = vsel %vm4874_vm6, %v1737_v40, %v737_v62  ;;  %v594_v15 = vrot.slane %v3609_v27, %v4044_v46  ;;  %v1370_v49 = vsel %vm1363_vm14, 2, %v1369_v6  ;;  %vm4875_vm15 = vcmask 1043456  }
 0x113   : > { %v1755_v22 = vsel %vm4875_vm15, %v1746_v54, %v1482_v21  ;;  %v576_v56 = vsel %vm3037_vm2, %v545_v33, 0.0  ;;  %v715_v53 = vsel %vm3037_vm2, %v684_v41, 0.0  ;;  %vm4877_vm9 = vcmp.gt.f32.partialorder %v4013_v48, 0.0  ;;  %v4886_v21 = vld [vmem:[#allocation27_spill] sm:$0xff]  ;;  %v4887_v33 = vld [vmem:[#allocation36_spill] sm:$0xff] }
 0x114   : > { %v1371_v19 = vsel %vm4877_vm9, 1, %v1370_v49  ;;  %vm4878_vm10 = vcmask 1044480   ;;  %v733_v26 = vrot.slane %v3560_v9, %v4044_v46  ;;  %v844_v42 = vrot.slane %v3582_v1, %v4044_v46  ;;  %v4888_v41 = vld [vmem:[#allocation32_spill] sm:$0xff] }
 0x115   : > { %v1764_v35 = vsel %vm4878_vm10, %v1755_v22, %v897_v57  ;;  %vm1375_vm8 = vcmp.eq.s32.totalorder %v1371_v19, 0  ;;  %vm4879_vm11 = vcmask 1045504   ;;  %v893_v61 = vrot.slane %v4833_v3, %v4044_v46 }
 0x116   : > { %v1773_v34 = vsel %vm4879_vm11, %v1764_v35, %v1506_v20  ;;  %v1051_v52 = vrot.slane %v4860_v16, %v4044_v46  ;;  %vm1376_vm14 = vmand %vm1374_vm7, %vm1375_vm8  ;;  %v625_v48 = vmul.f32 %v594_v15, %v576_v56  ;;  %v764_v62 = vmul.f32 %v733_v26, %v715_v53  ;;  %v4889_v20 = vld [vmem:[#allocation28_spill] sm:$0xff]  ;;  %v4891_v53 = vld [vmem:[#allocation29_spill] sm:$0xff] }
 0x117   : > { %v875_v31 = vsel %vm3037_vm2, %v844_v42, 0.0  ;;  %v1100_v4 = vrot.slane %v4862_v2, %v4044_v46  ;;  %v1377_v17 = vsel %vm1376_vm14, 0, %v4022_v63  ;;  %vm4880_vm13 = vcmask 1046528   ;;  %v4882_v63 = vld [vmem:[#allocation25_spill] sm:$0xff] }
 0x118   : > { %v4144_v36 = vsel %vm4880_vm13, %v1773_v34, %v1104_v50  ;;  %v924_v30 = vmul.f32 %v893_v61, %v875_v31  ;;  %v1082_v57 = vsel %vm3037_vm2, %v1051_v52, 0.0  ;;  %vm1378_vm6 = vcmp.eq.s32.totalorder %v1377_v17, 0  ;;  %v4893_v52 = vld [vmem:[#allocation31_spill] sm:$0xff] }
 0x119   : > { %vm1380_vm15 = vcmp.eq.s32.totalorder %v1377_v17, 1  ;;  %vm1382_vm7 = vcmp.eq.s32.totalorder %v1377_v17, 2  ;;  %v1613_v0 = vrot.slane %v4868_v12, %v4044_v46  ;;  %v1379_v23 = vsel %vm1378_vm6, %v4881_v11, 0.0 }
 0x11a   : > { %vm1384_vm9 = vcmp.eq.s32.totalorder %v1377_v17, 3  ;;  %vm1386_vm10 = vcmp.eq.s32.totalorder %v1377_v17, 4  ;;  %vm1392_vm8 = vcmp.ne.s32.totalorder %v1377_v17, 4294967196  ;;  %v1381_v58 = vsel %vm1380_vm15, %v4882_v63, %v1379_v23 }
 0x11b   : > { %vm1388_vm11 = vcmp.eq.s32.totalorder %v1377_v17, 5  ;;  %vm4154_vm14 = vmand %vm1392_vm8, %vm4095_vm12  ;;  %v1131_v50 = vmul.f32 %v1100_v4, %v1082_v57  ;;  %v1457_v28 = vrot.slane %v764_v62, 6  ;;  %v1383_v14 = vsel %vm1382_vm7, %v4885_v44, %v1381_v58 }
 0x11c   : > { %v4162_v43 = vsel %vm4154_vm14, 1.0, %v4846_v18  ;;  %v1481_v32 = vrot.slane %v924_v30, 4  ;;  %v1654_v29 = vrot.slane %v4869_v39, %v4044_v46  ;;  %v1385_v8 = vsel %vm1384_vm9, %v4886_v21, %v1383_v14 }
 0x11d   : > { %v1568_v40 = vrot.slane %v4162_v43, %v4887_v33  ;;  %v1564_v38 = vrot.slane %v4162_v43, %v4888_v41  ;;  %v1695_v6 = vrot.slane %v4871_v13, %v4044_v46  ;;  %v1387_v54 = vsel %vm1386_vm10, %v4889_v20, %v1385_v8 }
 0x11e   : > { %v1576_v49 = vrot.slane %v4162_v43, %v4030_v60  ;;  %v1505_v22 = vrot.slane %v1131_v50, 2  ;;  %vm4890_vm12 = vcmask 1040384   ;;  %v1389_v19 = vsel %vm1388_vm11, %v4891_v53, %v1387_v54 }
 0x11f   : > { %v1727_v56 = vsel %vm4890_vm12, %v625_v48, %v594_v15  ;;  %v1572_v35 = vrot.slane %v4162_v43, %v4044_v46  ;;  %vm4892_vm13 = vcmask 1041408   ;;  %v4184_v34 = vadd.s32 1, %v277_v37 }
 0x120   : > { %v1736_v42 = vsel %vm4892_vm13, %v1727_v56, %v1457_v28  ;;  %v1390_v62 = vsub.f32 %v4893_v52, %v1389_v19  ;;  %vm4894_vm6 = vcmask 1042432   ;;  %vm4749_vm15 = vcmp.eq.s32.totalorder %v4830_v24, 0 }
 0x121   : > { %v1745_v31 = vsel %vm4894_vm6, %v1736_v42, %v733_v26  ;;  %v4190_v30 = vsub.s32 5, %v4830_v24  ;;  %vm4895_vm7 = vcmask 1043456   ;;  %v4195_v48 = vrot.slane %v4184_v34, %v4887_v33  ;;  %v4896_v26 = vld [vmem:[#allocation39_spill] sm:$0xff] }
 0x122   : > { %v1754_v15 = vsel %vm4895_vm7, %v1745_v31, %v1481_v32  ;;  %v4199_v17 = vrot.slane %v4184_v34, %v4888_v41  ;;  %v4203_v57 = vrot.slane %v4184_v34, %v4030_v60  ;;  %v1391_v11 = vadd.f32 %v1390_v62, %v4896_v26 }
 0x123   : > { %vm4897_vm9 = vcmask 1044480   ;;  %v557_v63 = vrot.slane %v3524_v25, %v4190_v30  ;;  %v4211_v58 = vrot.slane %v3609_v27, %v4190_v30  ;;  %vm4898_vm10 = vcmask 1045504  }
 0x124   : > { %v1763_v23 = vsel %vm4897_vm9, %v1754_v15, %v893_v61  ;;  %vm1866_vm8 = vcmp.eq.s32.totalorder %v4830_v24, %v4195_v48  ;;  %vm1868_vm11 = vcmp.eq.s32.totalorder %v4830_v24, %v4203_v57  ;;  %v4220_v28 = vsel %vm4154_vm14, %v1391_v11, 0.0 }
 0x125   : > { %v1772_v50 = vsel %vm4898_vm10, %v1763_v23, %v1505_v22  ;;  %vm4899_vm12 = vcmask 1046528   ;;  %vm1882_vm13 = vmor %vm4749_vm15, %vm1866_vm8  ;;  %vm1865_vm6 = vcmp.eq.s32.totalorder %v4830_v24, %v4199_v17  ;;  %v579_v14 = vsel %vm3049_vm5, %v557_v63, 0.0 }
 0x126   : > { %v1781_v61 = vsel %vm4899_vm12, %v1772_v50, %v1100_v4  ;;  %v696_v32 = vrot.slane %v3540_v5, %v4190_v30  ;;  %v1527_v37 = vrot.slane %v4220_v28, %v4887_v33  ;;  %v1523_v7 = vrot.slane %v4220_v28, %v4888_v41  ;;  %vm1906_vm14 = vmand %vm1882_vm13, %vm3033_vm1 }
 0x127   : > { %v1535_v4 = vrot.slane %v4220_v28, %v4030_v60  ;;  %v1531_v21 = vrot.slane %v4220_v28, %v4044_v46  ;;  %v2832_v20 = vmov 1.0   ;;  %v628_v54 = vmul.f32 %v4211_v58, %v579_v14 }
 0x128   : > { %2493 = vmatprep.mubr.msk.f32.mxu0 %vm1906_vm14, %v2832_v20  ;;  %v718_v22 = vsel %vm3049_vm5, %v696_v32, 0.0  ;;  %v745_v56 = vrot.slane %v3560_v9, %v4190_v30  ;;  %v856_v53 = vrot.slane %v3582_v1, %v4190_v30  ;;  %vm4902_vm7 = vcmask 1040384  }
 0x129   : > { %v1788_v19 = vsel %vm4902_vm7, %v1527_v37, %v1568_v40  ;;  %vm4903_vm9 = vmmov %vm4902_vm7  ;;  %v4906_v31 = vrot.slane %v4868_v12, %v4887_v33  ;;  %vm4907_vm12 = vcmask 1041408   ;;  %v4908_v26 = vrot.slane %v4868_v12, %v4888_v41 }
 0x12a   : > { %v1787_v42 = vsel %vm4903_vm9, %v1523_v7, %v1564_v38  ;;  %vm4904_vm10 = vmmov %vm4902_vm7  ;;  %v4914_v23 = vrot.slane %v4869_v39, %v4888_v41  ;;  %v4918_v50 = vrot.slane %v4871_v13, %v4887_v33  ;;  %v4923_v37 = vrot.slane %v4871_v13, %v4888_v41  ;;  %v4927_v7 = vld [vmem:[#allocation34_spill] sm:$0xff] }
 0x12b   : > { %v1790_v52 = vsel %vm4904_vm10, %v1535_v4, %v1576_v49  ;;  %vm4905_vm8 = vmmov %vm4902_vm7  ;;  %v1796_v15 = vsel %vm4907_vm12, %v1788_v19, %v4906_v31  ;;  %v4912_v49 = vrot.slane %v4869_v39, %v4887_v33  ;;  %vm4913_vm10 = vcmask 1042432  }
 0x12c   : > { %v1789_v62 = vsel %vm4905_vm8, %v1531_v21, %v1572_v35  ;;  %vm4909_vm13 = vmmov %vm4907_vm12  ;;  %v878_v41 = vsel %vm3049_vm5, %v856_v53, 0.0  ;;  %v905_v60 = vrot.slane %v4833_v3, %v4190_v30  ;;  %v1625_v31 = vrot.slane %v4868_v12, %v4190_v30 }
 0x12d   : > { %v1795_v11 = vsel %vm4909_vm13, %v1787_v42, %v4908_v26  ;;  %vm4910_vm14 = vmmov %vm4907_vm12  ;;  %v1804_v35 = vsel %vm4913_vm10, %v1796_v15, %v4912_v49 }
 0x12e   : > { %v1798_v40 = vsel %vm4910_vm14, %v1790_v52, %v1617_v59  ;;  %vm4911_vm7 = vmmov %vm4907_vm12  ;;  %vm4919_vm14 = vcmask 1043456   ;;  %v767_v52 = vmul.f32 %v745_v56, %v718_v22  ;;  %v927_v22 = vmul.f32 %v905_v60, %v878_v41 }
 0x12f   : > { %v1797_v38 = vsel %vm4911_vm7, %v1789_v62, %v1613_v0  ;;  %vm1884_vm9 = vmor %vm4749_vm15, %vm1868_vm11  ;;  %v1812_v14 = vsel %vm4919_vm14, %v1804_v35, %v4918_v50  ;;  %vm2833_vm7 = vmmov 1  }
 0x130   : > { %vm4915_vm8 = vmmov %vm4913_vm10  ;;  %vm4920_vm10 = vcmask 1044480   ;;  %v2523_v4 = vpack.c.bf16 %v1812_v14, %v4927_v7  ;;  %v1460_v62 = vrot.slane %v767_v52, 6  ;;  %v1484_v49 = vrot.slane %v927_v22, 4 }
 0x131   : > { %v1803_v59 = vsel %vm4915_vm8, %v1795_v11, %v4914_v23  ;;  %vm4916_vm12 = vmmov %vm4915_vm8  ;;  %v1666_v11 = vrot.slane %v4869_v39, %v4190_v30 }
 0x132   : > { %v1806_v0 = vsel %vm4916_vm12, %v1798_v40, %v1658_v45  ;;  %vm4917_vm13 = vmmov %vm4915_vm8  ;;  %v1707_v40 = vrot.slane %v4871_v13, %v4190_v30 }
 0x133   : > { %v1805_v63 = vsel %vm4917_vm13, %v1797_v38, %v1654_v29  ;;  %vm1908_vm11 = vmand %vm1884_vm9, %vm3041_vm3  ;;  %vm4928_vm13 = vcmp.eq.s32.totalorder %v4830_v24, 0 }
 0x134   : > { %vm4294_vm15 = vmpackc.low %vm4920_vm10, %vm2833_vm7  ;;  %2499 = vmatprep.mubr.msk.f32.mxu1 %vm1908_vm11, %v2832_v20  ;;  %vm4932_vm7 = vcmask 1041408  }
 0x135   : > { %vm4924_vm8 = vmmov %vm4919_vm14  ;;  %2525 = vmatprep.subr.msk.bf16.mxu0 %vm4294_vm15, %v2523_v4  ;;  %vm4931_vm14 = vcmask 1040384  }
 0x136   : > { %v1811_v45 = vsel %vm4924_vm8, %v1803_v59, %v4923_v37  ;;  %vm4925_vm9 = vmmov %vm4924_vm8  ;;  %v1730_v38 = vsel %vm4931_vm14, %v628_v54, %v4211_v58  ;;  %v4357_v59 = vrot.slane %v4184_v34, %v4044_v46 }
 0x137   : > { %v1814_v29 = vsel %vm4925_vm9, %v1806_v0, %v1699_v55  ;;  %vm4926_vm12 = vmmov %vm4924_vm8  ;;  %v2526_v21 = vpack.c.bf16 %v1811_v45, %v4086_v51  ;;  %v1063_v55 = vrot.slane %v4860_v16, %v4190_v30  ;;  %v1112_v51 = vrot.slane %v4862_v2, %v4190_v30 }
 0x138   : > { %v1813_v33 = vsel %vm4926_vm12, %v1805_v63, %v1695_v6  ;;  %v2529_v19 = vpack.c.bf16 %v1814_v29, %v4144_v36  ;;  %v1543_v36 = vrot.slane %v4220_v28, %v4190_v30  ;;  %v1584_v6 = vrot.slane %v4162_v43, %v4190_v30  ;;  %vm4343_vm11 = vmor %vm4928_vm13, %vm1865_vm6 }
 0x139   : > { %v2532_v42 = vpack.c.bf16 %v1813_v33, %v1781_v61  ;;  %v4328_v61 = vsub.s32 4, %v4830_v24  ;;  %2528 = vmatpush1.bf16.xpose.msk.msra.mxu0 %vm4294_vm15, %v2526_v21  ;;  %v1085_v53 = vsel %vm3049_vm5, %v1063_v55, 0.0  ;;  %v1739_v35 = vsel %vm4932_vm7, %v1730_v38, %v1460_v62  ;;  %vm4933_vm10 = vmmov %vm4931_vm14 }
 0x13a   : > { %2531 = vmatprep.subr.msk.bf16.mxu1 %vm4294_vm15, %v2529_v19  ;;  %v1134_v26 = vmul.f32 %v1112_v51, %v1085_v53  ;;  %v1792_v23 = vsel %vm4933_vm10, %v1543_v36, %v1584_v6  ;;  %vm4934_vm6 = vcmask 1042432   ;;  %vm4935_vm8 = vmmov %vm4932_vm7  ;;  %vm1867_vm14 = vcmp.eq.s32.totalorder %v4830_v24, %v4357_v59 }
 0x13b   : > { %2534 = vmatpush1.bf16.xpose.msk.msra.mxu1 %vm4294_vm15, %v2532_v42  ;;  %v1748_v63 = vsel %vm4934_vm6, %v1739_v35, %v745_v56  ;;  %v1800_v50 = vsel %vm4935_vm8, %v1792_v23, %v1625_v31  ;;  %v553_v14 = vrot.slane %v3524_v25, %v4328_v61  ;;  %vm1905_vm9 = vmand %vm4343_vm11, %vm3029_vm0  ;;  %v602_v46 = vrot.slane %v3609_v27, %v4328_v61 }
 0x13c   : > { %v1508_v0 = vrot.slane %v1134_v26, 2  ;;  %v1757_v58 = vsel %vm4926_vm12, %v1748_v63, %v1484_v49  ;;  %vm4937_vm13 = vmmov %vm4934_vm6  ;;  %vm4938_vm7 = vcmask 1044480   ;;  %vm4940_vm6 = vcmp.eq.s32.totalorder %v4830_v24, 0 }
 0x13d   : > { %v1808_v54 = vsel %vm4937_vm13, %v1800_v50, %v1666_v11  ;;  %v1766_v56 = vsel %vm4938_vm7, %v1757_v58, %v905_v60  ;;  %vm4939_vm10 = vmmov %vm4926_vm12  ;;  %v578_v33 = vsel %vm3045_vm4, %v553_v14, 0.0  ;;  %v692_v7 = vrot.slane %v3540_v5, %v4328_v61 }
 0x13e   : > { %v1816_v45 = vsel %vm4939_vm10, %v1808_v54, %v1707_v40  ;;  %vm1883_vm8 = vmor %vm4940_vm6, %vm1867_vm14  ;;  %vm4942_vm11 = vcmask 1045504   ;;  %v627_v21 = vmul.f32 %v602_v46, %v578_v33  ;;  %v741_v19 = vrot.slane %v3560_v9, %v4328_v61 }
 0x13f   : > { %v1775_v4 = vsel %vm4942_vm11, %v1766_v56, %v1508_v0  ;;  %vm1907_vm12 = vmand %vm1883_vm8, %vm3037_vm2  ;;  %v852_v42 = vrot.slane %v3582_v1, %v4328_v61  ;;  %vm4943_vm13 = vcmask 1046528   ;;  %v717_v41 = vsel %vm3045_vm4, %v692_v7, 0.0 }
 0x140   : > { %2494 = vmatmul.mubr.msk.f32.vlgmr.msra.gmra.mrb[0].mxu0 %vm1905_vm9, %v2832_v20  ;;  %v1784_v52 = vsel %vm4943_vm13, %v1775_v4, %v1112_v51  ;;  %v901_v60 = vrot.slane %v4833_v3, %v4328_v61  ;;  %v1059_v55 = vrot.slane %v4860_v16, %v4328_v61  ;;  %v766_v6 = vmul.f32 %v741_v19, %v717_v41 }
 0x141   : > { %v2535_v36 = vpack.c.bf16 %v1816_v45, %v1784_v52  ;;  %v877_v22 = vsel %vm3045_vm4, %v852_v42, 0.0  ;;  %v1108_v53 = vrot.slane %v4862_v2, %v4328_v61  ;;  %v1539_v31 = vrot.slane %v4220_v28, %v4328_v61 }
 0x142   : > { %2500 = vmatmul.mubr.msk.f32.vlgmr.msra.gmra.mrb[0].mxu1 %vm1907_vm12, %v2832_v20  ;;  %v926_v51 = vmul.f32 %v901_v60, %v877_v22  ;;  %v1084_v62 = vsel %vm3045_vm4, %v1059_v55, 0.0  ;;  %v1580_v15 = vrot.slane %v4162_v43, %v4328_v61  ;;  %v1459_v11 = vrot.slane %v766_v6, 6 }
 0x143   : > { %2537 = vmatprep.subr.msk.bf16.mxu0 %vm4294_vm15, %v2535_v36  ;;  %v1133_v26 = vmul.f32 %v1108_v53, %v1084_v62  ;;  %v1621_v40 = vrot.slane %v4868_v12, %v4328_v61  ;;  %v1662_v38 = vrot.slane %v4869_v39, %v4328_v61  ;;  %v1703_v35 = vrot.slane %v4871_v13, %v4328_v61  ;;  %v4954_v36 = vld [vmem:[#allocation21_spill] sm:$0xff] }
 0x144   : > { %v1483_v49 = vrot.slane %v926_v51, 4  ;;  %vm4944_vm9 = vcmask 1040384   ;;  %vm4946_vm7 = vcmask 1041408   ;;  %v4420_v58 = vsub.s32 7, %v4830_v24 }
 0x145   : > { %v1729_v23 = vsel %vm4944_vm9, %v627_v21, %v602_v46  ;;  %vm4945_vm14 = vmmov %vm4944_vm9  ;;  %v1507_v63 = vrot.slane %v1133_v26, 2  ;;  %vm4948_vm6 = vcmask 1042432   ;;  %v4425_v45 = vadd.s32 8, %v4830_v24 }
 0x146   : > { %v1791_v0 = vsel %vm4945_vm14, %v1539_v31, %v1580_v15  ;;  %v1738_v50 = vsel %vm4946_vm7, %v1729_v23, %v1459_v11  ;;  %vm4947_vm10 = vmmov %vm4946_vm7  ;;  %v4428_v33 = vsub.s32 6, %v4830_v24  ;;  %vm4950_vm11 = vcmask 1043456  }
 0x147   : > { %v1799_v14 = vsel %vm4947_vm10, %v1791_v0, %v1621_v40  ;;  %v1747_v54 = vsel %vm4948_vm6, %v1738_v50, %v741_v19  ;;  %vm4949_vm8 = vmmov %vm4948_vm6  ;;  %v565_v4 = vrot.slane %v3524_v25, %v4420_v58  ;;  %v614_v21 = vrot.slane %v3609_v27, %v4420_v58 }
 0x148   : > { %v1807_v56 = vsel %vm4949_vm8, %v1799_v14, %v1662_v38  ;;  %v1756_v46 = vsel %vm4950_vm11, %v1747_v54, %v1483_v49  ;;  %vm4951_vm12 = vmmov %vm4950_vm11  ;;  %vm4952_vm13 = vcmask 1044480   ;;  %v704_v42 = vrot.slane %v3540_v5, %v4420_v58 }
 0x149   : > { %v1815_v7 = vsel %vm4951_vm12, %v1807_v56, %v1703_v35  ;;  %v1765_v19 = vsel %vm4952_vm13, %v1756_v46, %v901_v60  ;;  %v753_v52 = vrot.slane %v3560_v9, %v4420_v58  ;;  %v864_v41 = vrot.slane %v3582_v1, %v4420_v58 }
 0x14a   : > { %vm4953_vm9 = vcmask 1045504   ;;  %vm4955_vm14 = vnez %v4954_v36  ;;  %v913_v22 = vrot.slane %v4833_v3, %v4420_v58  ;;  %v1071_v60 = vrot.slane %v4860_v16, %v4420_v58 }
 0x14b   : > { %v1774_v55 = vsel %vm4953_vm9, %v1765_v19, %v1507_v63  ;;  %v581_v6 = vsel %vm4955_vm14, %v565_v4, 0.0  ;;  %vm4956_vm7 = vcmask 1046528   ;;  %v720_v31 = vsel %vm4955_vm14, %v704_v42, 0.0 }
 0x14c   : > { %v1783_v51 = vsel %vm4956_vm7, %v1774_v55, %v1108_v53  ;;  %v630_v62 = vmul.f32 %v614_v21, %v581_v6  ;;  %v880_v15 = vsel %vm4955_vm14, %v864_v41, 0.0  ;;  %v769_v11 = vmul.f32 %v753_v52, %v720_v31 }
 0x14d   : > { %v2538_v26 = vpack.c.bf16 %v1815_v7, %v1783_v51  ;;  %v929_v40 = vmul.f32 %v913_v22, %v880_v15  ;;  %v1087_v38 = vsel %vm4955_vm14, %v1071_v60, 0.0  ;;  %v1120_v49 = vrot.slane %v4862_v2, %v4420_v58  ;;  %v4965_v60 = vld [vmem:[#allocation20_spill] sm:$0xff] }
 0x14e   : > { %v1551_v35 = vrot.slane %v4220_v28, %v4420_v58  ;;  %v1592_v53 = vrot.slane %v4162_v43, %v4420_v58  ;;  %v1633_v23 = vrot.slane %v4868_v12, %v4420_v58  ;;  %v1462_v0 = vrot.slane %v769_v11, 6 }
 0x14f   : > { %2540 = vmatpush1.bf16.xpose.msk.msra.mxu0 %vm4294_vm15, %v2538_v26  ;;  %v1486_v63 = vrot.slane %v929_v40, 4  ;;  %v1674_v50 = vrot.slane %v4869_v39, %v4420_v58  ;;  %v1715_v14 = vrot.slane %v4871_v13, %v4420_v58  ;;  %v1136_v54 = vmul.f32 %v1120_v49, %v1087_v38 }
 0x150   : > { %vm4957_vm10 = vcmask 1040384   ;;  %vm1874_vm8 = vcmp.eq.s32.totalorder %v4425_v45, %v4195_v48  ;;  %vm4959_vm11 = vcmask 1041408   ;;  %v561_v19 = vrot.slane %v3524_v25, %v4428_v33 }
 0x151   : > { %v1732_v56 = vsel %vm4957_vm10, %v630_v62, %v614_v21  ;;  %vm4958_vm6 = vmmov %vm4957_vm10  ;;  %v610_v42 = vrot.slane %v3609_v27, %v4428_v33  ;;  %v1510_v41 = vrot.slane %v1136_v54, 2  ;;  %vm4961_vm9 = vcmask 1042432  }
 0x152   : > { %v1794_v46 = vsel %vm4958_vm6, %v1551_v35, %v1592_v53  ;;  %v1741_v7 = vsel %vm4959_vm11, %v1732_v56, %v1462_v0  ;;  %vm4960_vm12 = vmmov %vm4959_vm11  ;;  %v700_v48 = vrot.slane %v3540_v5, %v4428_v33  ;;  %vm4963_vm10 = vcmask 1043456  }
 0x153   : > { %v1802_v4 = vsel %vm4960_vm12, %v1794_v46, %v1633_v23  ;;  %vm1914_vm13 = vmand %vm1874_vm8, %vm3033_vm1  ;;  %v1750_v21 = vsel %vm4961_vm9, %v1741_v7, %v753_v52  ;;  %vm4966_vm1 = vnez %v4965_v60  ;;  %v749_v27 = vrot.slane %v3560_v9, %v4428_v33 }
 0x154   : > { %vm4962_vm7 = vmmov %vm4961_vm9  ;;  %2495 = vmatprep.mubr.msk.f32.mxu0 %vm1914_vm13, %v2832_v20  ;;  %v1759_v6 = vsel %vm4963_vm10, %v1750_v21, %v1486_v63  ;;  %v580_v25 = vsel %vm4966_vm1, %v561_v19, 0.0  ;;  %vm4967_vm8 = vcmask 1044480   ;;  %v719_v62 = vsel %vm4966_vm1, %v700_v48, 0.0 }
 0x155   : > { %v1810_v55 = vsel %vm4962_vm7, %v1802_v4, %v1674_v50  ;;  %vm4964_vm6 = vmmov %vm4963_vm10  ;;  %v1768_v51 = vsel %vm4967_vm8, %v1759_v6, %v913_v22  ;;  %v629_v52 = vmul.f32 %v610_v42, %v580_v25  ;;  %v860_v31 = vrot.slane %v3582_v1, %v4428_v33 }
 0x156   : > { %v1818_v8 = vsel %vm4964_vm6, %v1810_v55, %v1715_v14  ;;  %vm4968_vm11 = vcmask 1045504   ;;  %v768_v15 = vmul.f32 %v749_v27, %v719_v62  ;;  %v909_v26 = vrot.slane %v4833_v3, %v4428_v33 }
 0x157   : > { %v1777_v5 = vsel %vm4968_vm11, %v1768_v51, %v1510_v41  ;;  %v1067_v11 = vrot.slane %v4860_v16, %v4428_v33  ;;  %vm4969_vm12 = vcmask 1046528   ;;  %v879_v22 = vsel %vm4966_vm1, %v860_v31, 0.0 }
 0x158   : > { %v1786_v9 = vsel %vm4969_vm12, %v1777_v5, %v1120_v49  ;;  %v1116_v40 = vrot.slane %v4862_v2, %v4428_v33  ;;  %v1547_v1 = vrot.slane %v4220_v28, %v4428_v33  ;;  %v928_v35 = vmul.f32 %v909_v26, %v879_v22 }
 0x159   : > { %v2541_v38 = vpack.c.bf16 %v1818_v8, %v1786_v9  ;;  %v1086_v53 = vsel %vm4966_vm1, %v1067_v11, 0.0  ;;  %v1461_v3 = vrot.slane %v768_v15, 6  ;;  %v1588_v16 = vrot.slane %v4162_v43, %v4428_v33 }
 0x15a   : > { %v1135_v23 = vmul.f32 %v1116_v40, %v1086_v53  ;;  %v1629_v49 = vrot.slane %v4868_v12, %v4428_v33  ;;  %v1670_v0 = vrot.slane %v4869_v39, %v4428_v33  ;;  %v1485_v2 = vrot.slane %v928_v35, 4 }
 0x15b   : > { %2543 = vmatprep.subr.msk.bf16.mxu1 %vm4294_vm15, %v2541_v38  ;;  %v1711_v28 = vrot.slane %v4871_v13, %v4428_v33  ;;  %vm4970_vm13 = vcmask 1040384   ;;  %vm1873_vm9 = vcmp.eq.s32.totalorder %v4425_v45, %v4199_v17  ;;  %vm4971_vm7 = vcmask 1041408  }
 0x15c   : > { %v1731_v63 = vsel %vm4970_vm13, %v629_v52, %v610_v42  ;;  %v1509_v50 = vrot.slane %v1135_v23, 2  ;;  %vm4972_vm10 = vmmov %vm4970_vm13  ;;  %vm1876_vm8 = vcmp.eq.s32.totalorder %v4425_v45, %v4203_v57  ;;  %vm4973_vm11 = vcmask 1042432  }
 0x15d   : > { %v1740_v43 = vsel %vm4971_vm7, %v1731_v63, %v1461_v3  ;;  %v1793_v12 = vsel %vm4972_vm10, %v1547_v1, %v1588_v16  ;;  %vm1913_vm6 = vmand %vm1873_vm9, %vm3029_vm0  ;;  %v1856_v17 = vrot.slane %v4184_v34, %v4190_v30  ;;  %vm4975_vm10 = vcmask 1043456  }
 0x15e   : > { %v1749_v39 = vsel %vm4973_vm11, %v1740_v43, %v749_v27  ;;  %vm4974_vm12 = vmmov %vm4971_vm7  ;;  %2496 = vmatmul.mubr.msk.f32.gmra.mrb[2].mxu0 %vm1913_vm6, %v2832_v20  ;;  %vm1875_vm7 = vcmp.eq.s32.totalorder %v4425_v45, %v4357_v59  ;;  %v1852_v57 = vrot.slane %v4184_v34, %v4328_v61  ;;  %v1864_v47 = vrot.slane %v4184_v34, %v4420_v58 }
 0x15f   : > { %v1801_v13 = vsel %vm4974_vm12, %v1793_v12, %v1629_v49  ;;  %vm1916_vm13 = vmand %vm1876_vm8, %vm3041_vm3  ;;  %v1758_v37 = vsel %vm4975_vm10, %v1749_v39, %v1485_v2  ;;  %vm4977_vm3 = vcmask 1044480   ;;  %vm1870_vm8 = vcmp.eq.s32.totalorder %v4830_v24, %v1856_v17 }
 0x160   : > { %vm4976_vm0 = vmmov %vm4973_vm11  ;;  %2501 = vmatprep.mubr.msk.f32.mxu1 %vm1916_vm13, %v2832_v20  ;;  %v1767_v59 = vsel %vm4977_vm3, %v1758_v37, %v909_v26  ;;  %v1860_v30 = vrot.slane %v4184_v34, %v4428_v33  ;;  %vm4979_vm11 = vcmask 1045504   ;;  %vm1869_vm13 = vcmp.eq.s32.totalorder %v4830_v24, %v1852_v57 }
 0x161   : > { %v1809_v14 = vsel %vm4976_vm0, %v1801_v13, %v1670_v0  ;;  %vm1915_vm9 = vmand %vm1875_vm7, %vm3037_vm2  ;;  %v1776_v10 = vsel %vm4979_vm11, %v1767_v59, %v1509_v50  ;;  %vm4980_vm2 = vcmp.eq.s32.totalorder %v4830_v24, 0  ;;  %vm4981_vm7 = vcmask 1046528  }
 0x162   : > { %vm4978_vm6 = vmmov %vm4975_vm10  ;;  %2502 = vmatmul.mubr.msk.f32.gmra.mrb[2].mxu1 %vm1915_vm9, %v2832_v20  ;;  %v1785_v61 = vsel %vm4981_vm7, %v1776_v10, %v1116_v40  ;;  %vm1872_vm0 = vcmp.eq.s32.totalorder %v4830_v24, %v1864_v47  ;;  %vm1878_vm7 = vcmp.eq.s32.totalorder %v4425_v45, %v1856_v17 }
 0x163   : > { %v1817_v54 = vsel %vm4978_vm6, %v1809_v14, %v1711_v28  ;;  %vm1886_vm12 = vmor %vm4980_vm2, %vm1870_vm8  ;;  %vm1871_vm8 = vcmp.eq.s32.totalorder %v4830_v24, %v1860_v30 }
 0x164   : > { %vm1910_vm10 = vmand %vm1886_vm12, %vm3049_vm5  ;;  %v2544_v58 = vpack.c.bf16 %v1817_v54, %v1785_v61 }
 0x165   : > { %2505 = vmatprep.mubr.msk.f32.mxu0 %vm1910_vm10, %v2832_v20  ;;  %vm4982_vm9 = vmmov %vm4980_vm2 }
 0x166   : > { %vm1885_vm3 = vmor %vm4982_vm9, %vm1869_vm13  ;;  %2546 = vmatpush1.bf16.xpose.msk.msra.mxu1 %vm4294_vm15, %v2544_v58 }
 0x167   : > { %vm1909_vm6 = vmand %vm1885_vm3, %vm3045_vm4  ;;  %vm1880_vm3 = vcmp.eq.s32.totalorder %v4425_v45, %v1864_v47 }
 0x168   : > { %2506 = vmatmul.mubr.msk.f32.vlgmr.msra.gmra.mrb[4].mxu0 %vm1909_vm6, %v2832_v20  ;;  %vm4983_vm11 = vmmov %vm4980_vm2 }
 0x169   : > { %vm1888_vm2 = vmor %vm4983_vm11, %vm1872_vm0  ;;  %vm1879_vm11 = vcmp.eq.s32.totalorder %v4425_v45, %v1860_v30 }
 0x16a   : > { %vm1912_vm12 = vmand %vm1888_vm2, %vm4955_vm14 }
 0x16b   : > { %2511 = vmatprep.mubr.msk.f32.mxu1 %vm1912_vm12, %v2832_v20  ;;  %vm4984_vm13 = vmmov %vm4982_vm9  ;;  %vm1877_vm9 = vcmp.eq.s32.totalorder %v4425_v45, %v1852_v57 }
 0x16c   : > { %vm1887_vm10 = vmor %vm4984_vm13, %vm1871_vm8 }
 0x16d   : > { %vm1911_vm15 = vmand %vm1887_vm10, %vm4966_vm1 }
 0x16e   : > { %vm1918_vm0 = vmand %vm1878_vm7, %vm3049_vm5  ;;  %2512 = vmatmul.mubr.msk.f32.vlgmr.msra.gmra.mrb[4].mxu1 %vm1911_vm15, %v2832_v20  ;;  %vm228_vm5 = vcmask 130048  }
 0x16f   : > { %2507 = vmatprep.mubr.msk.f32.mxu0 %vm1918_vm0, %v2832_v20  ;;  %vm1917_vm6 = vmand %vm1877_vm9, %vm3045_vm4  ;;  %229 = vst.msk [vmem:[%s4601_s25] sm:$0xff] %vm228_vm5, %v4846_v18 }
 0x170   : > { %2508 = vmatmul.mubr.msk.f32.gmra.mrb[6].mxu0 %vm1917_vm6, %v2832_v20  ;;  %vm1920_vm8 = vmand %vm1880_vm3, %vm4955_vm14  ;;  %230 = vst.msk [vmem:[%s4601_s25 + $0x8] sm:$0xff] %vm228_vm5, %v4846_v18 }
 0x171   : > { %2513 = vmatprep.mubr.msk.f32.mxu1 %vm1920_vm8, %v2832_v20  ;;  %vm1919_vm2 = vmand %vm1879_vm11, %vm4966_vm1 }
 0x172   : > { %2514 = vmatmul.mubr.msk.f32.gmra.mrb[6].mxu1 %vm1919_vm2, %v2832_v20 }
 0x176   : > { %v2237_v42 = vld [vmem:[%s4601_s25] sm:$0xff] }
 0x177   : > { %v2238_v60 = vld [vmem:[%s4601_s25 + $0x8] sm:$0xff] }
 0x213   : > { %v2003_v24 = vpop.f32.mrb[0].mxu0 }
 0x214   : > { %v2005_v44 = vpop.f32.mrb[1].mxu0 }
 0x215   : > { %v2078_v34 = vpop.f32.mrb[0].mxu1 }
 0x216   : > { %v2079_v32 = vadd.f32 %v2078_v34, %v2003_v24  ;;  %v2080_v29 = vpop.f32.mrb[1].mxu1 }
 0x231   : > { %v2008_v45 = vpop.f32.mrb[2].mxu0 }
 0x232   : > { %v2010_v20 = vpop.f32.mrb[3].mxu0 }
 0x235   : > { %v2083_v33 = vpop.f32.mrb[2].mxu1 }
 0x236   : > { %v2084_v36 = vadd.f32 %v2083_v33, %v2008_v45  ;;  %v2085_v56 = vpop.f32.mrb[3].mxu1 }
 0x23b   : > { %v2153_v46 = vpop.f32.mrb[4].mxu0 }
 0x23c   : > { %v2154_v7 = vadd.f32 %v2153_v46, %v2079_v32  ;;  %v2155_v4 = vpop.f32.mrb[5].mxu0 }
 0x241   : > { %v2228_v18 = vpop.f32.mrb[4].mxu1 }
 0x242   : > { %v2229_v55 = vadd.f32 %v2228_v18, %v2154_v7  ;;  %v2230_v48 = vpop.f32.mrb[5].mxu1 }
 0x243   : > { %v2158_v19 = vpop.f32.mrb[6].mxu0 }
 0x244   : > { %v2159_v41 = vadd.f32 %v2158_v19, %v2084_v36  ;;  %v2160_v21 = vpop.f32.mrb[7].mxu0  ;;  %v2239_v6 = vadd.f32 %v2237_v42, %v2229_v55 }
 0x245   : > { %v2233_v8 = vpop.f32.mrb[6].mxu1 }
 0x246   : > { %2242 = vst.msk [vmem:[%s4601_s25] sm:$0xff] %vm228_vm5, %v2239_v6  ;;  %v2234_v25 = vadd.f32 %v2233_v8, %v2159_v41  ;;  %v2235_v27 = vpop.f32.mrb[7].mxu1 }
 0x248   : > { %v2240_v51 = vadd.f32 %v2238_v60, %v2234_v25 }
 0x24a   : > { %2243 = vst.msk [vmem:[%s4601_s25 + $0x8] sm:$0xff] %vm228_vm5, %v2240_v51 }
 0x24b   : > { %2749 = shalt.err (!%p2746_p9)
}
 0x24c   : > { %s2750_s10 = scalar_lea.hbm %s4618_s29, 256  ;;  %s2754_s0 = scalar_lea.hbm %s4674_s3, 512 }
 0x24d   : > { %p2751_p4 = scmp.ne.s32.totalorder %s4618_s29, %s2750_s10  ;;  %p2755_p3 = scmp.lt.u32.totalorder %s4618_s29, %s4674_s3 }
 0x24e   : > { %p2756_p13 = scmp.lt.u32.totalorder %s2754_s0, %s2750_s10  ;;  %p2758_p0 = scmp.lt.u32.totalorder %s2750_s10, %s4618_s29 }
 0x24f   : > { %p2752_p10 = pnand %p2751_p4, %p4985_p2 }
 0x250   : > { %p2757_p8 = por %p2756_p13, %p2755_p3 }
 0x251   : > { %p2753_p1 = pneg %p2752_p10 }
 0x252   : > { %p2759_p11 = por %p2758_p0, %p2757_p8 }
 0x254   : > { %p2760_p5 = pnand %p2759_p11, %p2753_p1 }
 0x256   : > { %2763 = shalt.err (!%p2760_p5)
}
 0x257   : > { %s2835_s8 = smov 128   ;;  %s2836_s25 = smov 8  }
 0x258   : > { %2553 = dma.vmem_to_hbm [thread:$0]  (%p4985_p2), %s4620_s7, 256, %s4618_s29, %s2245_s17, %s2835_s8, %s2835_s8, %s2836_s25  }
 0x259 PF: > { %s2273_s6 = sand.u32 1, %s2802_s14   ;;  %p4986_p6 = scmp.ne.s32.totalorder %s4753_s28, 0 }
 0x25a   : > { %p4987_p7 = scmp.ge.s32.totalorder %s2822_s19, 2  ;;  %s2274_s9 = scalar_lea.sflag [#allocation6], %s2273_s6 }
 0x25c   : > { %p2563_p12 = pnand %p4987_p7, %p4986_p6 }
 0x25e   : > { %2797 = dma.done.wait (!%p2563_p12), %s2274_s9, 256  }
 0x25f   : > { %2799 = vsyncadd (!%p2563_p12), %s2274_s9, 4294967040  ;;  %s23_s19 = sadd.s32 1, %s2822_s19   ;;  %s4988_s14 = smov %s2806_s15 }
 0x260   : > { %p20_p9 = scmp.ge.s32.totalorder %s23_s19, 4   ;;  %s4989_s15 = smov %s2810_s16 }
 0x261   : > { %s4990_s16 = smov %s2916_s27  ;;  %s4991_s17 = smov %s2818_s18 }
 0x262   : > { %s4992_s18 = smov %s4994_s21  ;;  %22 = sbr.rel (!%p20_p9) target bundleno = 10 (0xa), region = 139 }
 0x269   :  { %2279 = vsyncpa [#allocation5], 1 }
 0x26a   :  { %2281 = vsyncpa [#allocation5 + $0x1], 1 }
 0x26b   :  { %2282 = vsyncpa [#allocation8], 1 }
 0x26c   :  { %2284 = vsyncpa [#allocation8 + $0x1], 1 }
 0x26d   :  { %2285 = vsyncpa [#allocation6], 1 }
 0x26e   :  { %2287 = vsyncpa [#allocation6 + $0x1], 1 }

</bundles_post_ra>
